<compile_context>
chip_gen: v5e
topology: v5e:2x2
jax: 0.10.0
libtpu: 0.0.40
codegen_flags: <defaults>
</compile_context>

<pallas_src>
import jax
import jax.numpy as jnp
from jax import lax
from jax.experimental import pallas as pl
from jax.experimental.pallas import tpu as pltpu

# Flattened, zero-padded activation geometry (row pitch includes the border):
#   conv1 input : 30x30 padded image, flat length 960 (30*32, window slack)
#   conv1 output: 28 rows x 30 pitch -> width 840
#   conv2 input : 16x16 padded pooled1 -> width 272 (17*16, slack row of zeros)
#   conv2 output: 14 rows x 16 pitch -> width 224
_IN_W = 960
_C1_W = 840
_P1_W = 272
_C2_W = 224


def _even_selector(n_in, n_out):
    """(n_in, n_out) 0/1 matrix with S[2j, j] = 1: `x @ S` picks even lanes."""
    r = lax.broadcasted_iota(jnp.int32, (n_in, n_out), 0)
    c = lax.broadcasted_iota(jnp.int32, (n_in, n_out), 1)
    return (r == 2 * c).astype(jnp.float32)


def _convnet_kernel(x_ref, cw1_ref, cb1_ref, cw2_ref, cb2_ref,
                    fw1_ref, fb1_ref, fw2_ref, fb2_ref, fw3_ref, fb3_ref,
                    out_ref, c1_ref, p1_ref, c2_ref, f_ref):
    """One image per grid step; all activations stay in VMEM scratch."""
    f32 = jnp.float32

    # ---- conv1 (1 -> 8, 3x3, pad 1) + ReLU -------------------------------
    # 9 shifted windows of the flat padded image; K == 1 so a broadcast FMA
    # on the VPU beats feeding the MXU.
    acc1 = jnp.zeros((8, _C1_W), f32)
    for kh in range(3):
        for kw in range(3):
            win = x_ref[0, :, pl.ds(kh * 30 + kw, _C1_W)]          # (1, 840)
            acc1 = acc1 + cw1_ref[kh * 3 + kw] * win               # (8,1)*(1,840)
    c1_ref[...] = jnp.maximum(acc1 + cb1_ref[...], 0.0)

    # ---- pool1 (2x2) fused epilogue -> padded conv2 input ----------------
    sel28 = _even_selector(28, 14)
    p1_ref[...] = jnp.zeros_like(p1_ref)
    for ho in range(14):
        base = 60 * ho                                             # row 2*ho
        m = jnp.maximum(
            jnp.maximum(c1_ref[:, pl.ds(base, 28)],
                        c1_ref[:, pl.ds(base + 1, 28)]),
            jnp.maximum(c1_ref[:, pl.ds(base + 30, 28)],
                        c1_ref[:, pl.ds(base + 31, 28)]))
        pooled = jnp.dot(m, sel28, preferred_element_type=f32)     # (8, 14)
        p1_ref[:, pl.ds((ho + 1) * 16 + 1, 14)] = pooled

    # ---- conv2 (8 -> 16, 3x3, pad 1) + ReLU: 9 MXU matmuls ---------------
    acc2 = jnp.zeros((16, _C2_W), f32)
    for kh in range(3):
        for kw in range(3):
            win = p1_ref[:, pl.ds(kh * 16 + kw, _C2_W)]            # (8, 224)
            acc2 = acc2 + jnp.dot(cw2_ref[kh * 3 + kw], win,
                                  preferred_element_type=f32)
    c2_ref[...] = jnp.maximum(acc2 + cb2_ref[...], 0.0)

    # ---- pool2 (2x2) -> torch-order (C, H*W) feature scratch -------------
    sel14 = _even_selector(14, 7)
    for ho in range(7):
        base = 32 * ho
        m = jnp.maximum(
            jnp.maximum(c2_ref[:, pl.ds(base, 14)],
                        c2_ref[:, pl.ds(base + 1, 14)]),
            jnp.maximum(c2_ref[:, pl.ds(base + 16, 14)],
                        c2_ref[:, pl.ds(base + 17, 14)]))
        f_ref[:, pl.ds(ho * 7, 7)] = jnp.dot(m, sel14,
                                             preferred_element_type=f32)

    # ---- MLP head: fc1(784->64)+ReLU, fc2(64->32)+ReLU, fc3(32->10) ------
    # fc1 contracts over the (C, H*W) layout channel-by-channel: no in-kernel
    # reshape/transpose needed and torch's flatten order is preserved.
    h = jnp.zeros((1, 64), f32)
    for c in range(16):
        h = h + jnp.dot(f_ref[pl.ds(c, 1), :], fw1_ref[c],
                        preferred_element_type=f32)
    h = jnp.maximum(h + fb1_ref[...], 0.0)
    h = jnp.maximum(jnp.dot(h, fw2_ref[...], preferred_element_type=f32)
                    + fb2_ref[...], 0.0)
    logits = jnp.dot(h, fw3_ref[...], preferred_element_type=f32) + fb3_ref[...]
    out_ref[0] = logits.astype(out_ref.dtype)                      # (1, 128)


def _resident(shape):
    """Full-array block kept VMEM-resident across the whole grid."""
    zeros = (0,) * len(shape)
    return pl.BlockSpec(shape, lambda i, _z=zeros: _z)


def convnet_forward(params, x):
    """x: (B, 1, 28, 28) float32 -> (B, 10) logits (matches the torch module)."""
    B = x.shape[0]
    x = x.astype(jnp.float32)

    # Conv padding=1 applied once in XLA (tiny), each image flattened to one
    # lane-dense row with slack so every shifted window stays in bounds.
    xp = jnp.pad(x.reshape(B, 28, 28), ((0, 0), (1, 1), (1, 1)))     # (B,30,30)
    xflat = jnp.pad(xp.reshape(B, 1, 900), ((0, 0), (0, 0), (0, _IN_W - 900)))

    # One-time weight relayouts: tap-major convs, per-channel fc1, padded fc3.
    cw1 = jnp.transpose(params["conv1_w"], (2, 3, 0, 1)).reshape(9, 8, 1)
    cb1 = params["conv1_b"].reshape(8, 1)
    cw2 = jnp.transpose(params["conv2_w"], (2, 3, 0, 1)).reshape(9, 16, 8)
    cb2 = params["conv2_b"].reshape(16, 1)
    fw1 = params["fc1_w"].reshape(16, 49, 64)
    fb1 = params["fc1_b"].reshape(1, 64)
    fw2 = params["fc2_w"]                                            # (64, 32)
    fb2 = params["fc2_b"].reshape(1, 32)
    fw3 = jnp.pad(params["fc3_w"], ((0, 0), (0, 118)))               # (32, 128)
    fb3 = jnp.pad(params["fc3_b"].reshape(1, 10), ((0, 0), (0, 118)))

    out = pl.pallas_call(
        _convnet_kernel,
        out_shape=jax.ShapeDtypeStruct((B, 1, 128), jnp.float32),
        grid=(B,),
        in_specs=[
            pl.BlockSpec((1, 1, _IN_W), lambda i: (i, 0, 0)),
            _resident((9, 8, 1)), _resident((8, 1)),
            _resident((9, 16, 8)), _resident((16, 1)),
            _resident((16, 49, 64)), _resident((1, 64)),
            _resident((64, 32)), _resident((1, 32)),
            _resident((32, 128)), _resident((1, 128)),
        ],
        out_specs=pl.BlockSpec((1, 1, 128), lambda i: (i, 0, 0)),
        scratch_shapes=[
            pltpu.VMEM((8, _C1_W), jnp.float32),     # conv1 output (flat rows)
            pltpu.VMEM((8, _P1_W), jnp.float32),     # padded pooled1 / conv2 in
            pltpu.VMEM((16, _C2_W), jnp.float32),    # conv2 output (flat rows)
            pltpu.VMEM((16, 49), jnp.float32),       # torch-order features
        ],
        compiler_params=pltpu.CompilerParams(
            dimension_semantics=("parallel",)),
    )(xflat, cw1, cb1, cw2, cb2, fw1, fb1, fw2, fb2, fw3, fb3)

    return out.reshape(B, 128)[:, :10]


# ----------------------------------------------------------------------------
# Deterministic parameter init (mirrors the torch module's shapes/init style)
# ----------------------------------------------------------------------------
def init_params(key):
    ks = jax.random.split(key, 8)

    def kaiming(k, shape):
        fan_in = shape[1] * shape[2] * shape[3]
        return jax.random.normal(k, shape, jnp.float32) * jnp.sqrt(2.0 / fan_in)

    def linear(kw, kb, fan_in, fan_out):
        bound = 1.0 / jnp.sqrt(fan_in)
        w = jax.random.uniform(kw, (fan_in, fan_out), jnp.float32, -bound, bound)
        b = jax.random.uniform(kb, (fan_out,), jnp.float32, -bound, bound)
        return w, b

    params = {
        "conv1_w": kaiming(ks[0], (8, 1, 3, 3)),
        "conv1_b": jnp.zeros((8,), jnp.float32),
        "conv2_w": kaiming(ks[1], (16, 8, 3, 3)),
        "conv2_b": jnp.zeros((16,), jnp.float32),
    }
    params["fc1_w"], params["fc1_b"] = linear(ks[2], ks[3], 16 * 7 * 7, 64)
    params["fc2_w"], params["fc2_b"] = linear(ks[4], ks[5], 64, 32)
    params["fc3_w"], params["fc3_b"] = linear(ks[6], ks[7], 32, 10)
    return params


def _reference_forward(params, x):
    """Pure-JAX/XLA reference (HIGHEST precision) used only for validation."""
    hi = jax.lax.Precision.HIGHEST

    def conv(x, w, b):
        y = jax.lax.conv_general_dilated(
            x, w, window_strides=(1, 1), padding="SAME",
            dimension_numbers=("NCHW", "OIHW", "NCHW"), precision=hi)
        return jax.nn.relu(y + b.reshape(1, -1, 1, 1))

    def pool(x):
        B, C, H, W = x.shape
        return x.reshape(B, C, H // 2, 2, W // 2, 2).max(axis=(3, 5))

    y = pool(conv(x, params["conv1_w"], params["conv1_b"]))
    y = pool(conv(y, params["conv2_w"], params["conv2_b"]))
    y = y.reshape(x.shape[0], -1)                       # torch-order flatten
    y = jax.nn.relu(jnp.dot(y, params["fc1_w"], precision=hi) + params["fc1_b"])
    y = jax.nn.relu(jnp.dot(y, params["fc2_w"], precision=hi) + params["fc2_b"])
    return jnp.dot(y, params["fc3_w"], precision=hi) + params["fc3_b"]


if __name__ == "__main__":
    key = jax.random.PRNGKey(0)
    kp, kx = jax.random.split(key)
    params = init_params(kp)
    x = jax.random.normal(kx, (2, 1, 28, 28), jnp.float32)  # MNIST-shaped batch

    logits = jax.block_until_ready(jax.jit(convnet_forward)(params, x))
    assert logits.shape == (2, 10), logits.shape
    assert bool(jnp.all(jnp.isfinite(logits)))

    ref = _reference_forward(params, x)
    assert bool(jnp.allclose(logits, ref, atol=5e-2, rtol=5e-2)), (
        float(jnp.max(jnp.abs(logits - ref))))
    print("KERNEL_OK")
</pallas_src>

<mosaic_0001>
module attributes {stable_mosaic.version = 11 : i64} {
  func.func @_convnet_kernel(%arg0: i32, %arg1: memref<1x1x960xf32, #tpu.memory_space<vmem>>, %arg2: memref<9x8x1xf32, #tpu.memory_space<vmem>>, %arg3: memref<8x1xf32, #tpu.memory_space<vmem>>, %arg4: memref<9x16x8xf32, #tpu.memory_space<vmem>>, %arg5: memref<16x1xf32, #tpu.memory_space<vmem>>, %arg6: memref<16x49x64xf32, #tpu.memory_space<vmem>>, %arg7: memref<1x64xf32, #tpu.memory_space<vmem>>, %arg8: memref<64x32xf32, #tpu.memory_space<vmem>>, %arg9: memref<1x32xf32, #tpu.memory_space<vmem>>, %arg10: memref<32x128xf32, #tpu.memory_space<vmem>>, %arg11: memref<1x128xf32, #tpu.memory_space<vmem>>, %arg12: memref<1x1x128xf32, #tpu.memory_space<vmem>>, %arg13: memref<8x840xf32, #tpu.memory_space<vmem>>, %arg14: memref<8x272xf32, #tpu.memory_space<vmem>>, %arg15: memref<16x224xf32, #tpu.memory_space<vmem>>, %arg16: memref<16x49xf32, #tpu.memory_space<vmem>>) attributes {dimension_semantics = [#tpu.dimension_semantics<parallel>], iteration_bounds = array<i64: 2>, scalar_prefetch = 0 : i64, scratch_operands = 4 : i64, tpu.core_type = #tpu.core_type<tc>, window_params = [{transform_indices = @transform_0, window_bounds = array<i64: 1, 1, 960>}, {pipeline_mode = #tpu.pipeline_mode<synchronous>, transform_indices = @transform_1, window_bounds = array<i64: 9, 8, 1>}, {pipeline_mode = #tpu.pipeline_mode<synchronous>, transform_indices = @transform_2, window_bounds = array<i64: 8, 1>}, {pipeline_mode = #tpu.pipeline_mode<synchronous>, transform_indices = @transform_3, window_bounds = array<i64: 9, 16, 8>}, {pipeline_mode = #tpu.pipeline_mode<synchronous>, transform_indices = @transform_4, window_bounds = array<i64: 16, 1>}, {pipeline_mode = #tpu.pipeline_mode<synchronous>, transform_indices = @transform_5, window_bounds = array<i64: 16, 49, 64>}, {pipeline_mode = #tpu.pipeline_mode<synchronous>, transform_indices = @transform_6, window_bounds = array<i64: 1, 64>}, {pipeline_mode = #tpu.pipeline_mode<synchronous>, transform_indices = @transform_7, window_bounds = array<i64: 64, 32>}, {pipeline_mode = #tpu.pipeline_mode<synchronous>, transform_indices = @transform_8, window_bounds = array<i64: 1, 32>}, {pipeline_mode = #tpu.pipeline_mode<synchronous>, transform_indices = @transform_9, window_bounds = array<i64: 32, 128>}, {pipeline_mode = #tpu.pipeline_mode<synchronous>, transform_indices = @transform_10, window_bounds = array<i64: 1, 128>}, {transform_indices = @transform_11, window_bounds = array<i64: 1, 1, 128>}]} {
    %cst = arith.constant 0.000000e+00 : f32
    %0 = vector.broadcast %cst : f32 to vector<8x840xf32>
    %c0 = arith.constant 0 : index
    %c0_0 = arith.constant 0 : index
    %c0_1 = arith.constant 0 : index
    %1 = vector.load %arg1[%c0, %c0_0, %c0_1] : memref<1x1x960xf32, #tpu.memory_space<vmem>>, vector<1x1x840xf32>
    %2 = vector.shape_cast %1 : vector<1x1x840xf32> to vector<1x840xf32>
    %c0_2 = arith.constant 0 : index
    %c0_3 = arith.constant 0 : index
    %c0_4 = arith.constant 0 : index
    %3 = vector.load %arg2[%c0_2, %c0_3, %c0_4] : memref<9x8x1xf32, #tpu.memory_space<vmem>>, vector<1x8x1xf32>
    %4 = vector.shape_cast %3 : vector<1x8x1xf32> to vector<8x1xf32>
    %5 = vector.broadcast %4 : vector<8x1xf32> to vector<8x840xf32>
    %6 = vector.broadcast %2 : vector<1x840xf32> to vector<8x840xf32>
    %7 = arith.mulf %5, %6 : vector<8x840xf32>
    %8 = arith.addf %0, %7 : vector<8x840xf32>
    %c0_5 = arith.constant 0 : index
    %c0_6 = arith.constant 0 : index
    %c1 = arith.constant 1 : index
    %9 = vector.load %arg1[%c0_5, %c0_6, %c1] : memref<1x1x960xf32, #tpu.memory_space<vmem>>, vector<1x1x840xf32>
    %10 = vector.shape_cast %9 : vector<1x1x840xf32> to vector<1x840xf32>
    %c1_7 = arith.constant 1 : index
    %c0_8 = arith.constant 0 : index
    %c0_9 = arith.constant 0 : index
    %11 = vector.load %arg2[%c1_7, %c0_8, %c0_9] : memref<9x8x1xf32, #tpu.memory_space<vmem>>, vector<1x8x1xf32>
    %12 = vector.shape_cast %11 : vector<1x8x1xf32> to vector<8x1xf32>
    %13 = vector.broadcast %12 : vector<8x1xf32> to vector<8x840xf32>
    %14 = vector.broadcast %10 : vector<1x840xf32> to vector<8x840xf32>
    %15 = arith.mulf %13, %14 : vector<8x840xf32>
    %16 = arith.addf %8, %15 : vector<8x840xf32>
    %c0_10 = arith.constant 0 : index
    %c0_11 = arith.constant 0 : index
    %c2 = arith.constant 2 : index
    %17 = vector.load %arg1[%c0_10, %c0_11, %c2] : memref<1x1x960xf32, #tpu.memory_space<vmem>>, vector<1x1x840xf32>
    %18 = vector.shape_cast %17 : vector<1x1x840xf32> to vector<1x840xf32>
    %c2_12 = arith.constant 2 : index
    %c0_13 = arith.constant 0 : index
    %c0_14 = arith.constant 0 : index
    %19 = vector.load %arg2[%c2_12, %c0_13, %c0_14] : memref<9x8x1xf32, #tpu.memory_space<vmem>>, vector<1x8x1xf32>
    %20 = vector.shape_cast %19 : vector<1x8x1xf32> to vector<8x1xf32>
    %21 = vector.broadcast %20 : vector<8x1xf32> to vector<8x840xf32>
    %22 = vector.broadcast %18 : vector<1x840xf32> to vector<8x840xf32>
    %23 = arith.mulf %21, %22 : vector<8x840xf32>
    %24 = arith.addf %16, %23 : vector<8x840xf32>
    %c0_15 = arith.constant 0 : index
    %c0_16 = arith.constant 0 : index
    %c30 = arith.constant 30 : index
    %25 = vector.load %arg1[%c0_15, %c0_16, %c30] : memref<1x1x960xf32, #tpu.memory_space<vmem>>, vector<1x1x840xf32>
    %26 = vector.shape_cast %25 : vector<1x1x840xf32> to vector<1x840xf32>
    %c3 = arith.constant 3 : index
    %c0_17 = arith.constant 0 : index
    %c0_18 = arith.constant 0 : index
    %27 = vector.load %arg2[%c3, %c0_17, %c0_18] : memref<9x8x1xf32, #tpu.memory_space<vmem>>, vector<1x8x1xf32>
    %28 = vector.shape_cast %27 : vector<1x8x1xf32> to vector<8x1xf32>
    %29 = vector.broadcast %28 : vector<8x1xf32> to vector<8x840xf32>
    %30 = vector.broadcast %26 : vector<1x840xf32> to vector<8x840xf32>
    %31 = arith.mulf %29, %30 : vector<8x840xf32>
    %32 = arith.addf %24, %31 : vector<8x840xf32>
    %c0_19 = arith.constant 0 : index
    %c0_20 = arith.constant 0 : index
    %c31 = arith.constant 31 : index
    %33 = vector.load %arg1[%c0_19, %c0_20, %c31] : memref<1x1x960xf32, #tpu.memory_space<vmem>>, vector<1x1x840xf32>
    %34 = vector.shape_cast %33 : vector<1x1x840xf32> to vector<1x840xf32>
    %c4 = arith.constant 4 : index
    %c0_21 = arith.constant 0 : index
    %c0_22 = arith.constant 0 : index
    %35 = vector.load %arg2[%c4, %c0_21, %c0_22] : memref<9x8x1xf32, #tpu.memory_space<vmem>>, vector<1x8x1xf32>
    %36 = vector.shape_cast %35 : vector<1x8x1xf32> to vector<8x1xf32>
    %37 = vector.broadcast %36 : vector<8x1xf32> to vector<8x840xf32>
    %38 = vector.broadcast %34 : vector<1x840xf32> to vector<8x840xf32>
    %39 = arith.mulf %37, %38 : vector<8x840xf32>
    %40 = arith.addf %32, %39 : vector<8x840xf32>
    %c0_23 = arith.constant 0 : index
    %c0_24 = arith.constant 0 : index
    %c32 = arith.constant 32 : index
    %41 = vector.load %arg1[%c0_23, %c0_24, %c32] : memref<1x1x960xf32, #tpu.memory_space<vmem>>, vector<1x1x840xf32>
    %42 = vector.shape_cast %41 : vector<1x1x840xf32> to vector<1x840xf32>
    %c5 = arith.constant 5 : index
    %c0_25 = arith.constant 0 : index
    %c0_26 = arith.constant 0 : index
    %43 = vector.load %arg2[%c5, %c0_25, %c0_26] : memref<9x8x1xf32, #tpu.memory_space<vmem>>, vector<1x8x1xf32>
    %44 = vector.shape_cast %43 : vector<1x8x1xf32> to vector<8x1xf32>
    %45 = vector.broadcast %44 : vector<8x1xf32> to vector<8x840xf32>
    %46 = vector.broadcast %42 : vector<1x840xf32> to vector<8x840xf32>
    %47 = arith.mulf %45, %46 : vector<8x840xf32>
    %48 = arith.addf %40, %47 : vector<8x840xf32>
    %c0_27 = arith.constant 0 : index
    %c0_28 = arith.constant 0 : index
    %c60 = arith.constant 60 : index
    %49 = vector.load %arg1[%c0_27, %c0_28, %c60] : memref<1x1x960xf32, #tpu.memory_space<vmem>>, vector<1x1x840xf32>
    %50 = vector.shape_cast %49 : vector<1x1x840xf32> to vector<1x840xf32>
    %c6 = arith.constant 6 : index
    %c0_29 = arith.constant 0 : index
    %c0_30 = arith.constant 0 : index
    %51 = vector.load %arg2[%c6, %c0_29, %c0_30] : memref<9x8x1xf32, #tpu.memory_space<vmem>>, vector<1x8x1xf32>
    %52 = vector.shape_cast %51 : vector<1x8x1xf32> to vector<8x1xf32>
    %53 = vector.broadcast %52 : vector<8x1xf32> to vector<8x840xf32>
    %54 = vector.broadcast %50 : vector<1x840xf32> to vector<8x840xf32>
    %55 = arith.mulf %53, %54 : vector<8x840xf32>
    %56 = arith.addf %48, %55 : vector<8x840xf32>
    %c0_31 = arith.constant 0 : index
    %c0_32 = arith.constant 0 : index
    %c61 = arith.constant 61 : index
    %57 = vector.load %arg1[%c0_31, %c0_32, %c61] : memref<1x1x960xf32, #tpu.memory_space<vmem>>, vector<1x1x840xf32>
    %58 = vector.shape_cast %57 : vector<1x1x840xf32> to vector<1x840xf32>
    %c7 = arith.constant 7 : index
    %c0_33 = arith.constant 0 : index
    %c0_34 = arith.constant 0 : index
    %59 = vector.load %arg2[%c7, %c0_33, %c0_34] : memref<9x8x1xf32, #tpu.memory_space<vmem>>, vector<1x8x1xf32>
    %60 = vector.shape_cast %59 : vector<1x8x1xf32> to vector<8x1xf32>
    %61 = vector.broadcast %60 : vector<8x1xf32> to vector<8x840xf32>
    %62 = vector.broadcast %58 : vector<1x840xf32> to vector<8x840xf32>
    %63 = arith.mulf %61, %62 : vector<8x840xf32>
    %64 = arith.addf %56, %63 : vector<8x840xf32>
    %c0_35 = arith.constant 0 : index
    %c0_36 = arith.constant 0 : index
    %c62 = arith.constant 62 : index
    %65 = vector.load %arg1[%c0_35, %c0_36, %c62] : memref<1x1x960xf32, #tpu.memory_space<vmem>>, vector<1x1x840xf32>
    %66 = vector.shape_cast %65 : vector<1x1x840xf32> to vector<1x840xf32>
    %c8 = arith.constant 8 : index
    %c0_37 = arith.constant 0 : index
    %c0_38 = arith.constant 0 : index
    %67 = vector.load %arg2[%c8, %c0_37, %c0_38] : memref<9x8x1xf32, #tpu.memory_space<vmem>>, vector<1x8x1xf32>
    %68 = vector.shape_cast %67 : vector<1x8x1xf32> to vector<8x1xf32>
    %69 = vector.broadcast %68 : vector<8x1xf32> to vector<8x840xf32>
    %70 = vector.broadcast %66 : vector<1x840xf32> to vector<8x840xf32>
    %71 = arith.mulf %69, %70 : vector<8x840xf32>
    %72 = arith.addf %64, %71 : vector<8x840xf32>
    %c0_39 = arith.constant 0 : index
    %c0_40 = arith.constant 0 : index
    %73 = vector.load %arg3[%c0_39, %c0_40] : memref<8x1xf32, #tpu.memory_space<vmem>>, vector<8x1xf32>
    %74 = vector.broadcast %73 : vector<8x1xf32> to vector<8x840xf32>
    %75 = arith.addf %72, %74 : vector<8x840xf32>
    %cst_41 = arith.constant 0.000000e+00 : f32
    %76 = vector.broadcast %cst_41 : f32 to vector<8x840xf32>
    %77 = arith.maximumf %75, %76 : vector<8x840xf32>
    %c0_42 = arith.constant 0 : index
    %c0_43 = arith.constant 0 : index
    %78 = vector.load %arg13[%c0_42, %c0_43] : memref<8x840xf32, #tpu.memory_space<vmem>>, vector<8x840xf32>
    tpu.vector_store %arg13[%c0_42, %c0_43], %77 {strides = array<i32>} : memref<8x840xf32, #tpu.memory_space<vmem>>, vector<8x840xf32>,
    %79 = tpu.iota {dimensions = array<i32: 0>} : vector<28x14xi32>
    %80 = tpu.iota {dimensions = array<i32: 1>} : vector<28x14xi32>
    %c2_i32 = arith.constant 2 : i32
    %81 = vector.broadcast %c2_i32 : i32 to vector<28x14xi32>
    %82 = arith.muli %81, %80 : vector<28x14xi32>
    %83 = arith.cmpi eq, %79, %82 : vector<28x14xi32>
    %84 = arith.extui %83 : vector<28x14xi1> to vector<28x14xi32>
    %85 = arith.sitofp %84 : vector<28x14xi32> to vector<28x14xf32>
    %cst_44 = arith.constant 0.000000e+00 : f32
    %86 = vector.broadcast %cst_44 : f32 to vector<8x272xf32>
    %c0_45 = arith.constant 0 : index
    %c0_46 = arith.constant 0 : index
    %87 = vector.load %arg14[%c0_45, %c0_46] : memref<8x272xf32, #tpu.memory_space<vmem>>, vector<8x272xf32>
    tpu.vector_store %arg14[%c0_45, %c0_46], %86 {strides = array<i32>} : memref<8x272xf32, #tpu.memory_space<vmem>>, vector<8x272xf32>,
    %c0_47 = arith.constant 0 : index
    %c0_48 = arith.constant 0 : index
    %88 = vector.load %arg13[%c0_47, %c0_48] : memref<8x840xf32, #tpu.memory_space<vmem>>, vector<8x28xf32>
    %c0_49 = arith.constant 0 : index
    %c1_50 = arith.constant 1 : index
    %89 = vector.load %arg13[%c0_49, %c1_50] : memref<8x840xf32, #tpu.memory_space<vmem>>, vector<8x28xf32>
    %90 = arith.maximumf %88, %89 : vector<8x28xf32>
    %c0_51 = arith.constant 0 : index
    %c30_52 = arith.constant 30 : index
    %91 = vector.load %arg13[%c0_51, %c30_52] : memref<8x840xf32, #tpu.memory_space<vmem>>, vector<8x28xf32>
    %c0_53 = arith.constant 0 : index
    %c31_54 = arith.constant 31 : index
    %92 = vector.load %arg13[%c0_53, %c31_54] : memref<8x840xf32, #tpu.memory_space<vmem>>, vector<8x28xf32>
    %93 = arith.maximumf %91, %92 : vector<8x28xf32>
    %94 = arith.maximumf %90, %93 : vector<8x28xf32>
    %cst_55 = arith.constant dense<0.000000e+00> : vector<8x14xf32>
    %95 = tpu.matmul %94, %85, %cst_55 {dimension_numbers = #tpu.dot_dimension_numbers<[1], [0], [0], [1], [0, 0, 1, 1], [], []>} : vector<8x28xf32>, vector<28x14xf32>, vector<8x14xf32> -> vector<8x14xf32>
    %c0_56 = arith.constant 0 : index
    %c17 = arith.constant 17 : index
    %96 = vector.load %arg14[%c0_56, %c17] : memref<8x272xf32, #tpu.memory_space<vmem>>, vector<8x14xf32>
    tpu.vector_store %arg14[%c0_56, %c17], %95 {strides = array<i32>} : memref<8x272xf32, #tpu.memory_space<vmem>>, vector<8x14xf32>,
    %c0_57 = arith.constant 0 : index
    %c60_58 = arith.constant 60 : index
    %97 = vector.load %arg13[%c0_57, %c60_58] : memref<8x840xf32, #tpu.memory_space<vmem>>, vector<8x28xf32>
    %c0_59 = arith.constant 0 : index
    %c61_60 = arith.constant 61 : index
    %98 = vector.load %arg13[%c0_59, %c61_60] : memref<8x840xf32, #tpu.memory_space<vmem>>, vector<8x28xf32>
    %99 = arith.maximumf %97, %98 : vector<8x28xf32>
    %c0_61 = arith.constant 0 : index
    %c90 = arith.constant 90 : index
    %100 = vector.load %arg13[%c0_61, %c90] : memref<8x840xf32, #tpu.memory_space<vmem>>, vector<8x28xf32>
    %c0_62 = arith.constant 0 : index
    %c91 = arith.constant 91 : index
    %101 = vector.load %arg13[%c0_62, %c91] : memref<8x840xf32, #tpu.memory_space<vmem>>, vector<8x28xf32>
    %102 = arith.maximumf %100, %101 : vector<8x28xf32>
    %103 = arith.maximumf %99, %102 : vector<8x28xf32>
    %cst_63 = arith.constant dense<0.000000e+00> : vector<8x14xf32>
    %104 = tpu.matmul %103, %85, %cst_63 {dimension_numbers = #tpu.dot_dimension_numbers<[1], [0], [0], [1], [0, 0, 1, 1], [], []>} : vector<8x28xf32>, vector<28x14xf32>, vector<8x14xf32> -> vector<8x14xf32>
    %c0_64 = arith.constant 0 : index
    %c33 = arith.constant 33 : index
    %105 = vector.load %arg14[%c0_64, %c33] : memref<8x272xf32, #tpu.memory_space<vmem>>, vector<8x14xf32>
    tpu.vector_store %arg14[%c0_64, %c33], %104 {strides = array<i32>} : memref<8x272xf32, #tpu.memory_space<vmem>>, vector<8x14xf32>,
    %c0_65 = arith.constant 0 : index
    %c120 = arith.constant 120 : index
    %106 = vector.load %arg13[%c0_65, %c120] : memref<8x840xf32, #tpu.memory_space<vmem>>, vector<8x28xf32>
    %c0_66 = arith.constant 0 : index
    %c121 = arith.constant 121 : index
    %107 = vector.load %arg13[%c0_66, %c121] : memref<8x840xf32, #tpu.memory_space<vmem>>, vector<8x28xf32>
    %108 = arith.maximumf %106, %107 : vector<8x28xf32>
    %c0_67 = arith.constant 0 : index
    %c150 = arith.constant 150 : index
    %109 = vector.load %arg13[%c0_67, %c150] : memref<8x840xf32, #tpu.memory_space<vmem>>, vector<8x28xf32>
    %c0_68 = arith.constant 0 : index
    %c151 = arith.constant 151 : index
    %110 = vector.load %arg13[%c0_68, %c151] : memref<8x840xf32, #tpu.memory_space<vmem>>, vector<8x28xf32>
    %111 = arith.maximumf %109, %110 : vector<8x28xf32>
    %112 = arith.maximumf %108, %111 : vector<8x28xf32>
    %cst_69 = arith.constant dense<0.000000e+00> : vector<8x14xf32>
    %113 = tpu.matmul %112, %85, %cst_69 {dimension_numbers = #tpu.dot_dimension_numbers<[1], [0], [0], [1], [0, 0, 1, 1], [], []>} : vector<8x28xf32>, vector<28x14xf32>, vector<8x14xf32> -> vector<8x14xf32>
    %c0_70 = arith.constant 0 : index
    %c49 = arith.constant 49 : index
    %114 = vector.load %arg14[%c0_70, %c49] : memref<8x272xf32, #tpu.memory_space<vmem>>, vector<8x14xf32>
    tpu.vector_store %arg14[%c0_70, %c49], %113 {strides = array<i32>} : memref<8x272xf32, #tpu.memory_space<vmem>>, vector<8x14xf32>,
    %c0_71 = arith.constant 0 : index
    %c180 = arith.constant 180 : index
    %115 = vector.load %arg13[%c0_71, %c180] : memref<8x840xf32, #tpu.memory_space<vmem>>, vector<8x28xf32>
    %c0_72 = arith.constant 0 : index
    %c181 = arith.constant 181 : index
    %116 = vector.load %arg13[%c0_72, %c181] : memref<8x840xf32, #tpu.memory_space<vmem>>, vector<8x28xf32>
    %117 = arith.maximumf %115, %116 : vector<8x28xf32>
    %c0_73 = arith.constant 0 : index
    %c210 = arith.constant 210 : index
    %118 = vector.load %arg13[%c0_73, %c210] : memref<8x840xf32, #tpu.memory_space<vmem>>, vector<8x28xf32>
    %c0_74 = arith.constant 0 : index
    %c211 = arith.constant 211 : index
    %119 = vector.load %arg13[%c0_74, %c211] : memref<8x840xf32, #tpu.memory_space<vmem>>, vector<8x28xf32>
    %120 = arith.maximumf %118, %119 : vector<8x28xf32>
    %121 = arith.maximumf %117, %120 : vector<8x28xf32>
    %cst_75 = arith.constant dense<0.000000e+00> : vector<8x14xf32>
    %122 = tpu.matmul %121, %85, %cst_75 {dimension_numbers = #tpu.dot_dimension_numbers<[1], [0], [0], [1], [0, 0, 1, 1], [], []>} : vector<8x28xf32>, vector<28x14xf32>, vector<8x14xf32> -> vector<8x14xf32>
    %c0_76 = arith.constant 0 : index
    %c65 = arith.constant 65 : index
    %123 = vector.load %arg14[%c0_76, %c65] : memref<8x272xf32, #tpu.memory_space<vmem>>, vector<8x14xf32>
    tpu.vector_store %arg14[%c0_76, %c65], %122 {strides = array<i32>} : memref<8x272xf32, #tpu.memory_space<vmem>>, vector<8x14xf32>,
    %c0_77 = arith.constant 0 : index
    %c240 = arith.constant 240 : index
    %124 = vector.load %arg13[%c0_77, %c240] : memref<8x840xf32, #tpu.memory_space<vmem>>, vector<8x28xf32>
    %c0_78 = arith.constant 0 : index
    %c241 = arith.constant 241 : index
    %125 = vector.load %arg13[%c0_78, %c241] : memref<8x840xf32, #tpu.memory_space<vmem>>, vector<8x28xf32>
    %126 = arith.maximumf %124, %125 : vector<8x28xf32>
    %c0_79 = arith.constant 0 : index
    %c270 = arith.constant 270 : index
    %127 = vector.load %arg13[%c0_79, %c270] : memref<8x840xf32, #tpu.memory_space<vmem>>, vector<8x28xf32>
    %c0_80 = arith.constant 0 : index
    %c271 = arith.constant 271 : index
    %128 = vector.load %arg13[%c0_80, %c271] : memref<8x840xf32, #tpu.memory_space<vmem>>, vector<8x28xf32>
    %129 = arith.maximumf %127, %128 : vector<8x28xf32>
    %130 = arith.maximumf %126, %129 : vector<8x28xf32>
    %cst_81 = arith.constant dense<0.000000e+00> : vector<8x14xf32>
    %131 = tpu.matmul %130, %85, %cst_81 {dimension_numbers = #tpu.dot_dimension_numbers<[1], [0], [0], [1], [0, 0, 1, 1], [], []>} : vector<8x28xf32>, vector<28x14xf32>, vector<8x14xf32> -> vector<8x14xf32>
    %c0_82 = arith.constant 0 : index
    %c81 = arith.constant 81 : index
    %132 = vector.load %arg14[%c0_82, %c81] : memref<8x272xf32, #tpu.memory_space<vmem>>, vector<8x14xf32>
    tpu.vector_store %arg14[%c0_82, %c81], %131 {strides = array<i32>} : memref<8x272xf32, #tpu.memory_space<vmem>>, vector<8x14xf32>,
    %c0_83 = arith.constant 0 : index
    %c300 = arith.constant 300 : index
    %133 = vector.load %arg13[%c0_83, %c300] : memref<8x840xf32, #tpu.memory_space<vmem>>, vector<8x28xf32>
    %c0_84 = arith.constant 0 : index
    %c301 = arith.constant 301 : index
    %134 = vector.load %arg13[%c0_84, %c301] : memref<8x840xf32, #tpu.memory_space<vmem>>, vector<8x28xf32>
    %135 = arith.maximumf %133, %134 : vector<8x28xf32>
    %c0_85 = arith.constant 0 : index
    %c330 = arith.constant 330 : index
    %136 = vector.load %arg13[%c0_85, %c330] : memref<8x840xf32, #tpu.memory_space<vmem>>, vector<8x28xf32>
    %c0_86 = arith.constant 0 : index
    %c331 = arith.constant 331 : index
    %137 = vector.load %arg13[%c0_86, %c331] : memref<8x840xf32, #tpu.memory_space<vmem>>, vector<8x28xf32>
    %138 = arith.maximumf %136, %137 : vector<8x28xf32>
    %139 = arith.maximumf %135, %138 : vector<8x28xf32>
    %cst_87 = arith.constant dense<0.000000e+00> : vector<8x14xf32>
    %140 = tpu.matmul %139, %85, %cst_87 {dimension_numbers = #tpu.dot_dimension_numbers<[1], [0], [0], [1], [0, 0, 1, 1], [], []>} : vector<8x28xf32>, vector<28x14xf32>, vector<8x14xf32> -> vector<8x14xf32>
    %c0_88 = arith.constant 0 : index
    %c97 = arith.constant 97 : index
    %141 = vector.load %arg14[%c0_88, %c97] : memref<8x272xf32, #tpu.memory_space<vmem>>, vector<8x14xf32>
    tpu.vector_store %arg14[%c0_88, %c97], %140 {strides = array<i32>} : memref<8x272xf32, #tpu.memory_space<vmem>>, vector<8x14xf32>,
    %c0_89 = arith.constant 0 : index
    %c360 = arith.constant 360 : index
    %142 = vector.load %arg13[%c0_89, %c360] : memref<8x840xf32, #tpu.memory_space<vmem>>, vector<8x28xf32>
    %c0_90 = arith.constant 0 : index
    %c361 = arith.constant 361 : index
    %143 = vector.load %arg13[%c0_90, %c361] : memref<8x840xf32, #tpu.memory_space<vmem>>, vector<8x28xf32>
    %144 = arith.maximumf %142, %143 : vector<8x28xf32>
    %c0_91 = arith.constant 0 : index
    %c390 = arith.constant 390 : index
    %145 = vector.load %arg13[%c0_91, %c390] : memref<8x840xf32, #tpu.memory_space<vmem>>, vector<8x28xf32>
    %c0_92 = arith.constant 0 : index
    %c391 = arith.constant 391 : index
    %146 = vector.load %arg13[%c0_92, %c391] : memref<8x840xf32, #tpu.memory_space<vmem>>, vector<8x28xf32>
    %147 = arith.maximumf %145, %146 : vector<8x28xf32>
    %148 = arith.maximumf %144, %147 : vector<8x28xf32>
    %cst_93 = arith.constant dense<0.000000e+00> : vector<8x14xf32>
    %149 = tpu.matmul %148, %85, %cst_93 {dimension_numbers = #tpu.dot_dimension_numbers<[1], [0], [0], [1], [0, 0, 1, 1], [], []>} : vector<8x28xf32>, vector<28x14xf32>, vector<8x14xf32> -> vector<8x14xf32>
    %c0_94 = arith.constant 0 : index
    %c113 = arith.constant 113 : index
    %150 = vector.load %arg14[%c0_94, %c113] : memref<8x272xf32, #tpu.memory_space<vmem>>, vector<8x14xf32>
    tpu.vector_store %arg14[%c0_94, %c113], %149 {strides = array<i32>} : memref<8x272xf32, #tpu.memory_space<vmem>>, vector<8x14xf32>,
    %c0_95 = arith.constant 0 : index
    %c420 = arith.constant 420 : index
    %151 = vector.load %arg13[%c0_95, %c420] : memref<8x840xf32, #tpu.memory_space<vmem>>, vector<8x28xf32>
    %c0_96 = arith.constant 0 : index
    %c421 = arith.constant 421 : index
    %152 = vector.load %arg13[%c0_96, %c421] : memref<8x840xf32, #tpu.memory_space<vmem>>, vector<8x28xf32>
    %153 = arith.maximumf %151, %152 : vector<8x28xf32>
    %c0_97 = arith.constant 0 : index
    %c450 = arith.constant 450 : index
    %154 = vector.load %arg13[%c0_97, %c450] : memref<8x840xf32, #tpu.memory_space<vmem>>, vector<8x28xf32>
    %c0_98 = arith.constant 0 : index
    %c451 = arith.constant 451 : index
    %155 = vector.load %arg13[%c0_98, %c451] : memref<8x840xf32, #tpu.memory_space<vmem>>, vector<8x28xf32>
    %156 = arith.maximumf %154, %155 : vector<8x28xf32>
    %157 = arith.maximumf %153, %156 : vector<8x28xf32>
    %cst_99 = arith.constant dense<0.000000e+00> : vector<8x14xf32>
    %158 = tpu.matmul %157, %85, %cst_99 {dimension_numbers = #tpu.dot_dimension_numbers<[1], [0], [0], [1], [0, 0, 1, 1], [], []>} : vector<8x28xf32>, vector<28x14xf32>, vector<8x14xf32> -> vector<8x14xf32>
    %c0_100 = arith.constant 0 : index
    %c129 = arith.constant 129 : index
    %159 = vector.load %arg14[%c0_100, %c129] : memref<8x272xf32, #tpu.memory_space<vmem>>, vector<8x14xf32>
    tpu.vector_store %arg14[%c0_100, %c129], %158 {strides = array<i32>} : memref<8x272xf32, #tpu.memory_space<vmem>>, vector<8x14xf32>,
    %c0_101 = arith.constant 0 : index
    %c480 = arith.constant 480 : index
    %160 = vector.load %arg13[%c0_101, %c480] : memref<8x840xf32, #tpu.memory_space<vmem>>, vector<8x28xf32>
    %c0_102 = arith.constant 0 : index
    %c481 = arith.constant 481 : index
    %161 = vector.load %arg13[%c0_102, %c481] : memref<8x840xf32, #tpu.memory_space<vmem>>, vector<8x28xf32>
    %162 = arith.maximumf %160, %161 : vector<8x28xf32>
    %c0_103 = arith.constant 0 : index
    %c510 = arith.constant 510 : index
    %163 = vector.load %arg13[%c0_103, %c510] : memref<8x840xf32, #tpu.memory_space<vmem>>, vector<8x28xf32>
    %c0_104 = arith.constant 0 : index
    %c511 = arith.constant 511 : index
    %164 = vector.load %arg13[%c0_104, %c511] : memref<8x840xf32, #tpu.memory_space<vmem>>, vector<8x28xf32>
    %165 = arith.maximumf %163, %164 : vector<8x28xf32>
    %166 = arith.maximumf %162, %165 : vector<8x28xf32>
    %cst_105 = arith.constant dense<0.000000e+00> : vector<8x14xf32>
    %167 = tpu.matmul %166, %85, %cst_105 {dimension_numbers = #tpu.dot_dimension_numbers<[1], [0], [0], [1], [0, 0, 1, 1], [], []>} : vector<8x28xf32>, vector<28x14xf32>, vector<8x14xf32> -> vector<8x14xf32>
    %c0_106 = arith.constant 0 : index
    %c145 = arith.constant 145 : index
    %168 = vector.load %arg14[%c0_106, %c145] : memref<8x272xf32, #tpu.memory_space<vmem>>, vector<8x14xf32>
    tpu.vector_store %arg14[%c0_106, %c145], %167 {strides = array<i32>} : memref<8x272xf32, #tpu.memory_space<vmem>>, vector<8x14xf32>,
    %c0_107 = arith.constant 0 : index
    %c540 = arith.constant 540 : index
    %169 = vector.load %arg13[%c0_107, %c540] : memref<8x840xf32, #tpu.memory_space<vmem>>, vector<8x28xf32>
    %c0_108 = arith.constant 0 : index
    %c541 = arith.constant 541 : index
    %170 = vector.load %arg13[%c0_108, %c541] : memref<8x840xf32, #tpu.memory_space<vmem>>, vector<8x28xf32>
    %171 = arith.maximumf %169, %170 : vector<8x28xf32>
    %c0_109 = arith.constant 0 : index
    %c570 = arith.constant 570 : index
    %172 = vector.load %arg13[%c0_109, %c570] : memref<8x840xf32, #tpu.memory_space<vmem>>, vector<8x28xf32>
    %c0_110 = arith.constant 0 : index
    %c571 = arith.constant 571 : index
    %173 = vector.load %arg13[%c0_110, %c571] : memref<8x840xf32, #tpu.memory_space<vmem>>, vector<8x28xf32>
    %174 = arith.maximumf %172, %173 : vector<8x28xf32>
    %175 = arith.maximumf %171, %174 : vector<8x28xf32>
    %cst_111 = arith.constant dense<0.000000e+00> : vector<8x14xf32>
    %176 = tpu.matmul %175, %85, %cst_111 {dimension_numbers = #tpu.dot_dimension_numbers<[1], [0], [0], [1], [0, 0, 1, 1], [], []>} : vector<8x28xf32>, vector<28x14xf32>, vector<8x14xf32> -> vector<8x14xf32>
    %c0_112 = arith.constant 0 : index
    %c161 = arith.constant 161 : index
    %177 = vector.load %arg14[%c0_112, %c161] : memref<8x272xf32, #tpu.memory_space<vmem>>, vector<8x14xf32>
    tpu.vector_store %arg14[%c0_112, %c161], %176 {strides = array<i32>} : memref<8x272xf32, #tpu.memory_space<vmem>>, vector<8x14xf32>,
    %c0_113 = arith.constant 0 : index
    %c600 = arith.constant 600 : index
    %178 = vector.load %arg13[%c0_113, %c600] : memref<8x840xf32, #tpu.memory_space<vmem>>, vector<8x28xf32>
    %c0_114 = arith.constant 0 : index
    %c601 = arith.constant 601 : index
    %179 = vector.load %arg13[%c0_114, %c601] : memref<8x840xf32, #tpu.memory_space<vmem>>, vector<8x28xf32>
    %180 = arith.maximumf %178, %179 : vector<8x28xf32>
    %c0_115 = arith.constant 0 : index
    %c630 = arith.constant 630 : index
    %181 = vector.load %arg13[%c0_115, %c630] : memref<8x840xf32, #tpu.memory_space<vmem>>, vector<8x28xf32>
    %c0_116 = arith.constant 0 : index
    %c631 = arith.constant 631 : index
    %182 = vector.load %arg13[%c0_116, %c631] : memref<8x840xf32, #tpu.memory_space<vmem>>, vector<8x28xf32>
    %183 = arith.maximumf %181, %182 : vector<8x28xf32>
    %184 = arith.maximumf %180, %183 : vector<8x28xf32>
    %cst_117 = arith.constant dense<0.000000e+00> : vector<8x14xf32>
    %185 = tpu.matmul %184, %85, %cst_117 {dimension_numbers = #tpu.dot_dimension_numbers<[1], [0], [0], [1], [0, 0, 1, 1], [], []>} : vector<8x28xf32>, vector<28x14xf32>, vector<8x14xf32> -> vector<8x14xf32>
    %c0_118 = arith.constant 0 : index
    %c177 = arith.constant 177 : index
    %186 = vector.load %arg14[%c0_118, %c177] : memref<8x272xf32, #tpu.memory_space<vmem>>, vector<8x14xf32>
    tpu.vector_store %arg14[%c0_118, %c177], %185 {strides = array<i32>} : memref<8x272xf32, #tpu.memory_space<vmem>>, vector<8x14xf32>,
    %c0_119 = arith.constant 0 : index
    %c660 = arith.constant 660 : index
    %187 = vector.load %arg13[%c0_119, %c660] : memref<8x840xf32, #tpu.memory_space<vmem>>, vector<8x28xf32>
    %c0_120 = arith.constant 0 : index
    %c661 = arith.constant 661 : index
    %188 = vector.load %arg13[%c0_120, %c661] : memref<8x840xf32, #tpu.memory_space<vmem>>, vector<8x28xf32>
    %189 = arith.maximumf %187, %188 : vector<8x28xf32>
    %c0_121 = arith.constant 0 : index
    %c690 = arith.constant 690 : index
    %190 = vector.load %arg13[%c0_121, %c690] : memref<8x840xf32, #tpu.memory_space<vmem>>, vector<8x28xf32>
    %c0_122 = arith.constant 0 : index
    %c691 = arith.constant 691 : index
    %191 = vector.load %arg13[%c0_122, %c691] : memref<8x840xf32, #tpu.memory_space<vmem>>, vector<8x28xf32>
    %192 = arith.maximumf %190, %191 : vector<8x28xf32>
    %193 = arith.maximumf %189, %192 : vector<8x28xf32>
    %cst_123 = arith.constant dense<0.000000e+00> : vector<8x14xf32>
    %194 = tpu.matmul %193, %85, %cst_123 {dimension_numbers = #tpu.dot_dimension_numbers<[1], [0], [0], [1], [0, 0, 1, 1], [], []>} : vector<8x28xf32>, vector<28x14xf32>, vector<8x14xf32> -> vector<8x14xf32>
    %c0_124 = arith.constant 0 : index
    %c193 = arith.constant 193 : index
    %195 = vector.load %arg14[%c0_124, %c193] : memref<8x272xf32, #tpu.memory_space<vmem>>, vector<8x14xf32>
    tpu.vector_store %arg14[%c0_124, %c193], %194 {strides = array<i32>} : memref<8x272xf32, #tpu.memory_space<vmem>>, vector<8x14xf32>,
    %c0_125 = arith.constant 0 : index
    %c720 = arith.constant 720 : index
    %196 = vector.load %arg13[%c0_125, %c720] : memref<8x840xf32, #tpu.memory_space<vmem>>, vector<8x28xf32>
    %c0_126 = arith.constant 0 : index
    %c721 = arith.constant 721 : index
    %197 = vector.load %arg13[%c0_126, %c721] : memref<8x840xf32, #tpu.memory_space<vmem>>, vector<8x28xf32>
    %198 = arith.maximumf %196, %197 : vector<8x28xf32>
    %c0_127 = arith.constant 0 : index
    %c750 = arith.constant 750 : index
    %199 = vector.load %arg13[%c0_127, %c750] : memref<8x840xf32, #tpu.memory_space<vmem>>, vector<8x28xf32>
    %c0_128 = arith.constant 0 : index
    %c751 = arith.constant 751 : index
    %200 = vector.load %arg13[%c0_128, %c751] : memref<8x840xf32, #tpu.memory_space<vmem>>, vector<8x28xf32>
    %201 = arith.maximumf %199, %200 : vector<8x28xf32>
    %202 = arith.maximumf %198, %201 : vector<8x28xf32>
    %cst_129 = arith.constant dense<0.000000e+00> : vector<8x14xf32>
    %203 = tpu.matmul %202, %85, %cst_129 {dimension_numbers = #tpu.dot_dimension_numbers<[1], [0], [0], [1], [0, 0, 1, 1], [], []>} : vector<8x28xf32>, vector<28x14xf32>, vector<8x14xf32> -> vector<8x14xf32>
    %c0_130 = arith.constant 0 : index
    %c209 = arith.constant 209 : index
    %204 = vector.load %arg14[%c0_130, %c209] : memref<8x272xf32, #tpu.memory_space<vmem>>, vector<8x14xf32>
    tpu.vector_store %arg14[%c0_130, %c209], %203 {strides = array<i32>} : memref<8x272xf32, #tpu.memory_space<vmem>>, vector<8x14xf32>,
    %c0_131 = arith.constant 0 : index
    %c780 = arith.constant 780 : index
    %205 = vector.load %arg13[%c0_131, %c780] : memref<8x840xf32, #tpu.memory_space<vmem>>, vector<8x28xf32>
    %c0_132 = arith.constant 0 : index
    %c781 = arith.constant 781 : index
    %206 = vector.load %arg13[%c0_132, %c781] : memref<8x840xf32, #tpu.memory_space<vmem>>, vector<8x28xf32>
    %207 = arith.maximumf %205, %206 : vector<8x28xf32>
    %c0_133 = arith.constant 0 : index
    %c810 = arith.constant 810 : index
    %208 = vector.load %arg13[%c0_133, %c810] : memref<8x840xf32, #tpu.memory_space<vmem>>, vector<8x28xf32>
    %c0_134 = arith.constant 0 : index
    %c811 = arith.constant 811 : index
    %209 = vector.load %arg13[%c0_134, %c811] : memref<8x840xf32, #tpu.memory_space<vmem>>, vector<8x28xf32>
    %210 = arith.maximumf %208, %209 : vector<8x28xf32>
    %211 = arith.maximumf %207, %210 : vector<8x28xf32>
    %cst_135 = arith.constant dense<0.000000e+00> : vector<8x14xf32>
    %212 = tpu.matmul %211, %85, %cst_135 {dimension_numbers = #tpu.dot_dimension_numbers<[1], [0], [0], [1], [0, 0, 1, 1], [], []>} : vector<8x28xf32>, vector<28x14xf32>, vector<8x14xf32> -> vector<8x14xf32>
    %c0_136 = arith.constant 0 : index
    %c225 = arith.constant 225 : index
    %213 = vector.load %arg14[%c0_136, %c225] : memref<8x272xf32, #tpu.memory_space<vmem>>, vector<8x14xf32>
    tpu.vector_store %arg14[%c0_136, %c225], %212 {strides = array<i32>} : memref<8x272xf32, #tpu.memory_space<vmem>>, vector<8x14xf32>,
    %cst_137 = arith.constant 0.000000e+00 : f32
    %214 = vector.broadcast %cst_137 : f32 to vector<16x224xf32>
    %c0_138 = arith.constant 0 : index
    %c0_139 = arith.constant 0 : index
    %215 = vector.load %arg14[%c0_138, %c0_139] : memref<8x272xf32, #tpu.memory_space<vmem>>, vector<8x224xf32>
    %c0_140 = arith.constant 0 : index
    %c0_141 = arith.constant 0 : index
    %c0_142 = arith.constant 0 : index
    %216 = vector.load %arg4[%c0_140, %c0_141, %c0_142] : memref<9x16x8xf32, #tpu.memory_space<vmem>>, vector<1x16x8xf32>
    %217 = vector.shape_cast %216 : vector<1x16x8xf32> to vector<16x8xf32>
    %cst_143 = arith.constant dense<0.000000e+00> : vector<16x224xf32>
    %218 = tpu.matmul %217, %215, %cst_143 {dimension_numbers = #tpu.dot_dimension_numbers<[1], [0], [0], [1], [0, 0, 1, 1], [], []>} : vector<16x8xf32>, vector<8x224xf32>, vector<16x224xf32> -> vector<16x224xf32>
    %219 = arith.addf %214, %218 : vector<16x224xf32>
    %c0_144 = arith.constant 0 : index
    %c1_145 = arith.constant 1 : index
    %220 = vector.load %arg14[%c0_144, %c1_145] : memref<8x272xf32, #tpu.memory_space<vmem>>, vector<8x224xf32>
    %c1_146 = arith.constant 1 : index
    %c0_147 = arith.constant 0 : index
    %c0_148 = arith.constant 0 : index
    %221 = vector.load %arg4[%c1_146, %c0_147, %c0_148] : memref<9x16x8xf32, #tpu.memory_space<vmem>>, vector<1x16x8xf32>
    %222 = vector.shape_cast %221 : vector<1x16x8xf32> to vector<16x8xf32>
    %cst_149 = arith.constant dense<0.000000e+00> : vector<16x224xf32>
    %223 = tpu.matmul %222, %220, %cst_149 {dimension_numbers = #tpu.dot_dimension_numbers<[1], [0], [0], [1], [0, 0, 1, 1], [], []>} : vector<16x8xf32>, vector<8x224xf32>, vector<16x224xf32> -> vector<16x224xf32>
    %224 = arith.addf %219, %223 : vector<16x224xf32>
    %c0_150 = arith.constant 0 : index
    %c2_151 = arith.constant 2 : index
    %225 = vector.load %arg14[%c0_150, %c2_151] : memref<8x272xf32, #tpu.memory_space<vmem>>, vector<8x224xf32>
    %c2_152 = arith.constant 2 : index
    %c0_153 = arith.constant 0 : index
    %c0_154 = arith.constant 0 : index
    %226 = vector.load %arg4[%c2_152, %c0_153, %c0_154] : memref<9x16x8xf32, #tpu.memory_space<vmem>>, vector<1x16x8xf32>
    %227 = vector.shape_cast %226 : vector<1x16x8xf32> to vector<16x8xf32>
    %cst_155 = arith.constant dense<0.000000e+00> : vector<16x224xf32>
    %228 = tpu.matmul %227, %225, %cst_155 {dimension_numbers = #tpu.dot_dimension_numbers<[1], [0], [0], [1], [0, 0, 1, 1], [], []>} : vector<16x8xf32>, vector<8x224xf32>, vector<16x224xf32> -> vector<16x224xf32>
    %229 = arith.addf %224, %228 : vector<16x224xf32>
    %c0_156 = arith.constant 0 : index
    %c16 = arith.constant 16 : index
    %230 = vector.load %arg14[%c0_156, %c16] : memref<8x272xf32, #tpu.memory_space<vmem>>, vector<8x224xf32>
    %c3_157 = arith.constant 3 : index
    %c0_158 = arith.constant 0 : index
    %c0_159 = arith.constant 0 : index
    %231 = vector.load %arg4[%c3_157, %c0_158, %c0_159] : memref<9x16x8xf32, #tpu.memory_space<vmem>>, vector<1x16x8xf32>
    %232 = vector.shape_cast %231 : vector<1x16x8xf32> to vector<16x8xf32>
    %cst_160 = arith.constant dense<0.000000e+00> : vector<16x224xf32>
    %233 = tpu.matmul %232, %230, %cst_160 {dimension_numbers = #tpu.dot_dimension_numbers<[1], [0], [0], [1], [0, 0, 1, 1], [], []>} : vector<16x8xf32>, vector<8x224xf32>, vector<16x224xf32> -> vector<16x224xf32>
    %234 = arith.addf %229, %233 : vector<16x224xf32>
    %c0_161 = arith.constant 0 : index
    %c17_162 = arith.constant 17 : index
    %235 = vector.load %arg14[%c0_161, %c17_162] : memref<8x272xf32, #tpu.memory_space<vmem>>, vector<8x224xf32>
    %c4_163 = arith.constant 4 : index
    %c0_164 = arith.constant 0 : index
    %c0_165 = arith.constant 0 : index
    %236 = vector.load %arg4[%c4_163, %c0_164, %c0_165] : memref<9x16x8xf32, #tpu.memory_space<vmem>>, vector<1x16x8xf32>
    %237 = vector.shape_cast %236 : vector<1x16x8xf32> to vector<16x8xf32>
    %cst_166 = arith.constant dense<0.000000e+00> : vector<16x224xf32>
    %238 = tpu.matmul %237, %235, %cst_166 {dimension_numbers = #tpu.dot_dimension_numbers<[1], [0], [0], [1], [0, 0, 1, 1], [], []>} : vector<16x8xf32>, vector<8x224xf32>, vector<16x224xf32> -> vector<16x224xf32>
    %239 = arith.addf %234, %238 : vector<16x224xf32>
    %c0_167 = arith.constant 0 : index
    %c18 = arith.constant 18 : index
    %240 = vector.load %arg14[%c0_167, %c18] : memref<8x272xf32, #tpu.memory_space<vmem>>, vector<8x224xf32>
    %c5_168 = arith.constant 5 : index
    %c0_169 = arith.constant 0 : index
    %c0_170 = arith.constant 0 : index
    %241 = vector.load %arg4[%c5_168, %c0_169, %c0_170] : memref<9x16x8xf32, #tpu.memory_space<vmem>>, vector<1x16x8xf32>
    %242 = vector.shape_cast %241 : vector<1x16x8xf32> to vector<16x8xf32>
    %cst_171 = arith.constant dense<0.000000e+00> : vector<16x224xf32>
    %243 = tpu.matmul %242, %240, %cst_171 {dimension_numbers = #tpu.dot_dimension_numbers<[1], [0], [0], [1], [0, 0, 1, 1], [], []>} : vector<16x8xf32>, vector<8x224xf32>, vector<16x224xf32> -> vector<16x224xf32>
    %244 = arith.addf %239, %243 : vector<16x224xf32>
    %c0_172 = arith.constant 0 : index
    %c32_173 = arith.constant 32 : index
    %245 = vector.load %arg14[%c0_172, %c32_173] : memref<8x272xf32, #tpu.memory_space<vmem>>, vector<8x224xf32>
    %c6_174 = arith.constant 6 : index
    %c0_175 = arith.constant 0 : index
    %c0_176 = arith.constant 0 : index
    %246 = vector.load %arg4[%c6_174, %c0_175, %c0_176] : memref<9x16x8xf32, #tpu.memory_space<vmem>>, vector<1x16x8xf32>
    %247 = vector.shape_cast %246 : vector<1x16x8xf32> to vector<16x8xf32>
    %cst_177 = arith.constant dense<0.000000e+00> : vector<16x224xf32>
    %248 = tpu.matmul %247, %245, %cst_177 {dimension_numbers = #tpu.dot_dimension_numbers<[1], [0], [0], [1], [0, 0, 1, 1], [], []>} : vector<16x8xf32>, vector<8x224xf32>, vector<16x224xf32> -> vector<16x224xf32>
    %249 = arith.addf %244, %248 : vector<16x224xf32>
    %c0_178 = arith.constant 0 : index
    %c33_179 = arith.constant 33 : index
    %250 = vector.load %arg14[%c0_178, %c33_179] : memref<8x272xf32, #tpu.memory_space<vmem>>, vector<8x224xf32>
    %c7_180 = arith.constant 7 : index
    %c0_181 = arith.constant 0 : index
    %c0_182 = arith.constant 0 : index
    %251 = vector.load %arg4[%c7_180, %c0_181, %c0_182] : memref<9x16x8xf32, #tpu.memory_space<vmem>>, vector<1x16x8xf32>
    %252 = vector.shape_cast %251 : vector<1x16x8xf32> to vector<16x8xf32>
    %cst_183 = arith.constant dense<0.000000e+00> : vector<16x224xf32>
    %253 = tpu.matmul %252, %250, %cst_183 {dimension_numbers = #tpu.dot_dimension_numbers<[1], [0], [0], [1], [0, 0, 1, 1], [], []>} : vector<16x8xf32>, vector<8x224xf32>, vector<16x224xf32> -> vector<16x224xf32>
    %254 = arith.addf %249, %253 : vector<16x224xf32>
    %c0_184 = arith.constant 0 : index
    %c34 = arith.constant 34 : index
    %255 = vector.load %arg14[%c0_184, %c34] : memref<8x272xf32, #tpu.memory_space<vmem>>, vector<8x224xf32>
    %c8_185 = arith.constant 8 : index
    %c0_186 = arith.constant 0 : index
    %c0_187 = arith.constant 0 : index
    %256 = vector.load %arg4[%c8_185, %c0_186, %c0_187] : memref<9x16x8xf32, #tpu.memory_space<vmem>>, vector<1x16x8xf32>
    %257 = vector.shape_cast %256 : vector<1x16x8xf32> to vector<16x8xf32>
    %cst_188 = arith.constant dense<0.000000e+00> : vector<16x224xf32>
    %258 = tpu.matmul %257, %255, %cst_188 {dimension_numbers = #tpu.dot_dimension_numbers<[1], [0], [0], [1], [0, 0, 1, 1], [], []>} : vector<16x8xf32>, vector<8x224xf32>, vector<16x224xf32> -> vector<16x224xf32>
    %259 = arith.addf %254, %258 : vector<16x224xf32>
    %c0_189 = arith.constant 0 : index
    %c0_190 = arith.constant 0 : index
    %260 = vector.load %arg5[%c0_189, %c0_190] : memref<16x1xf32, #tpu.memory_space<vmem>>, vector<16x1xf32>
    %261 = vector.broadcast %260 : vector<16x1xf32> to vector<16x224xf32>
    %262 = arith.addf %259, %261 : vector<16x224xf32>
    %cst_191 = arith.constant 0.000000e+00 : f32
    %263 = vector.broadcast %cst_191 : f32 to vector<16x224xf32>
    %264 = arith.maximumf %262, %263 : vector<16x224xf32>
    %c0_192 = arith.constant 0 : index
    %c0_193 = arith.constant 0 : index
    %265 = vector.load %arg15[%c0_192, %c0_193] : memref<16x224xf32, #tpu.memory_space<vmem>>, vector<16x224xf32>
    tpu.vector_store %arg15[%c0_192, %c0_193], %264 {strides = array<i32>} : memref<16x224xf32, #tpu.memory_space<vmem>>, vector<16x224xf32>,
    %266 = tpu.iota {dimensions = array<i32: 0>} : vector<14x7xi32>
    %267 = tpu.iota {dimensions = array<i32: 1>} : vector<14x7xi32>
    %c2_i32_194 = arith.constant 2 : i32
    %268 = vector.broadcast %c2_i32_194 : i32 to vector<14x7xi32>
    %269 = arith.muli %268, %267 : vector<14x7xi32>
    %270 = arith.cmpi eq, %266, %269 : vector<14x7xi32>
    %271 = arith.extui %270 : vector<14x7xi1> to vector<14x7xi32>
    %272 = arith.sitofp %271 : vector<14x7xi32> to vector<14x7xf32>
    %c0_195 = arith.constant 0 : index
    %c0_196 = arith.constant 0 : index
    %273 = vector.load %arg15[%c0_195, %c0_196] : memref<16x224xf32, #tpu.memory_space<vmem>>, vector<16x14xf32>
    %c0_197 = arith.constant 0 : index
    %c1_198 = arith.constant 1 : index
    %274 = vector.load %arg15[%c0_197, %c1_198] : memref<16x224xf32, #tpu.memory_space<vmem>>, vector<16x14xf32>
    %275 = arith.maximumf %273, %274 : vector<16x14xf32>
    %c0_199 = arith.constant 0 : index
    %c16_200 = arith.constant 16 : index
    %276 = vector.load %arg15[%c0_199, %c16_200] : memref<16x224xf32, #tpu.memory_space<vmem>>, vector<16x14xf32>
    %c0_201 = arith.constant 0 : index
    %c17_202 = arith.constant 17 : index
    %277 = vector.load %arg15[%c0_201, %c17_202] : memref<16x224xf32, #tpu.memory_space<vmem>>, vector<16x14xf32>
    %278 = arith.maximumf %276, %277 : vector<16x14xf32>
    %279 = arith.maximumf %275, %278 : vector<16x14xf32>
    %cst_203 = arith.constant dense<0.000000e+00> : vector<16x7xf32>
    %280 = tpu.matmul %279, %272, %cst_203 {dimension_numbers = #tpu.dot_dimension_numbers<[1], [0], [0], [1], [0, 0, 1, 1], [], []>} : vector<16x14xf32>, vector<14x7xf32>, vector<16x7xf32> -> vector<16x7xf32>
    %c0_204 = arith.constant 0 : index
    %c0_205 = arith.constant 0 : index
    %281 = vector.load %arg16[%c0_204, %c0_205] : memref<16x49xf32, #tpu.memory_space<vmem>>, vector<16x7xf32>
    tpu.vector_store %arg16[%c0_204, %c0_205], %280 {strides = array<i32>} : memref<16x49xf32, #tpu.memory_space<vmem>>, vector<16x7xf32>,
    %c0_206 = arith.constant 0 : index
    %c32_207 = arith.constant 32 : index
    %282 = vector.load %arg15[%c0_206, %c32_207] : memref<16x224xf32, #tpu.memory_space<vmem>>, vector<16x14xf32>
    %c0_208 = arith.constant 0 : index
    %c33_209 = arith.constant 33 : index
    %283 = vector.load %arg15[%c0_208, %c33_209] : memref<16x224xf32, #tpu.memory_space<vmem>>, vector<16x14xf32>
    %284 = arith.maximumf %282, %283 : vector<16x14xf32>
    %c0_210 = arith.constant 0 : index
    %c48 = arith.constant 48 : index
    %285 = vector.load %arg15[%c0_210, %c48] : memref<16x224xf32, #tpu.memory_space<vmem>>, vector<16x14xf32>
    %c0_211 = arith.constant 0 : index
    %c49_212 = arith.constant 49 : index
    %286 = vector.load %arg15[%c0_211, %c49_212] : memref<16x224xf32, #tpu.memory_space<vmem>>, vector<16x14xf32>
    %287 = arith.maximumf %285, %286 : vector<16x14xf32>
    %288 = arith.maximumf %284, %287 : vector<16x14xf32>
    %cst_213 = arith.constant dense<0.000000e+00> : vector<16x7xf32>
    %289 = tpu.matmul %288, %272, %cst_213 {dimension_numbers = #tpu.dot_dimension_numbers<[1], [0], [0], [1], [0, 0, 1, 1], [], []>} : vector<16x14xf32>, vector<14x7xf32>, vector<16x7xf32> -> vector<16x7xf32>
    %c0_214 = arith.constant 0 : index
    %c7_215 = arith.constant 7 : index
    %290 = vector.load %arg16[%c0_214, %c7_215] : memref<16x49xf32, #tpu.memory_space<vmem>>, vector<16x7xf32>
    tpu.vector_store %arg16[%c0_214, %c7_215], %289 {strides = array<i32>} : memref<16x49xf32, #tpu.memory_space<vmem>>, vector<16x7xf32>,
    %c0_216 = arith.constant 0 : index
    %c64 = arith.constant 64 : index
    %291 = vector.load %arg15[%c0_216, %c64] : memref<16x224xf32, #tpu.memory_space<vmem>>, vector<16x14xf32>
    %c0_217 = arith.constant 0 : index
    %c65_218 = arith.constant 65 : index
    %292 = vector.load %arg15[%c0_217, %c65_218] : memref<16x224xf32, #tpu.memory_space<vmem>>, vector<16x14xf32>
    %293 = arith.maximumf %291, %292 : vector<16x14xf32>
    %c0_219 = arith.constant 0 : index
    %c80 = arith.constant 80 : index
    %294 = vector.load %arg15[%c0_219, %c80] : memref<16x224xf32, #tpu.memory_space<vmem>>, vector<16x14xf32>
    %c0_220 = arith.constant 0 : index
    %c81_221 = arith.constant 81 : index
    %295 = vector.load %arg15[%c0_220, %c81_221] : memref<16x224xf32, #tpu.memory_space<vmem>>, vector<16x14xf32>
    %296 = arith.maximumf %294, %295 : vector<16x14xf32>
    %297 = arith.maximumf %293, %296 : vector<16x14xf32>
    %cst_222 = arith.constant dense<0.000000e+00> : vector<16x7xf32>
    %298 = tpu.matmul %297, %272, %cst_222 {dimension_numbers = #tpu.dot_dimension_numbers<[1], [0], [0], [1], [0, 0, 1, 1], [], []>} : vector<16x14xf32>, vector<14x7xf32>, vector<16x7xf32> -> vector<16x7xf32>
    %c0_223 = arith.constant 0 : index
    %c14 = arith.constant 14 : index
    %299 = vector.load %arg16[%c0_223, %c14] : memref<16x49xf32, #tpu.memory_space<vmem>>, vector<16x7xf32>
    tpu.vector_store %arg16[%c0_223, %c14], %298 {strides = array<i32>} : memref<16x49xf32, #tpu.memory_space<vmem>>, vector<16x7xf32>,
    %c0_224 = arith.constant 0 : index
    %c96 = arith.constant 96 : index
    %300 = vector.load %arg15[%c0_224, %c96] : memref<16x224xf32, #tpu.memory_space<vmem>>, vector<16x14xf32>
    %c0_225 = arith.constant 0 : index
    %c97_226 = arith.constant 97 : index
    %301 = vector.load %arg15[%c0_225, %c97_226] : memref<16x224xf32, #tpu.memory_space<vmem>>, vector<16x14xf32>
    %302 = arith.maximumf %300, %301 : vector<16x14xf32>
    %c0_227 = arith.constant 0 : index
    %c112 = arith.constant 112 : index
    %303 = vector.load %arg15[%c0_227, %c112] : memref<16x224xf32, #tpu.memory_space<vmem>>, vector<16x14xf32>
    %c0_228 = arith.constant 0 : index
    %c113_229 = arith.constant 113 : index
    %304 = vector.load %arg15[%c0_228, %c113_229] : memref<16x224xf32, #tpu.memory_space<vmem>>, vector<16x14xf32>
    %305 = arith.maximumf %303, %304 : vector<16x14xf32>
    %306 = arith.maximumf %302, %305 : vector<16x14xf32>
    %cst_230 = arith.constant dense<0.000000e+00> : vector<16x7xf32>
    %307 = tpu.matmul %306, %272, %cst_230 {dimension_numbers = #tpu.dot_dimension_numbers<[1], [0], [0], [1], [0, 0, 1, 1], [], []>} : vector<16x14xf32>, vector<14x7xf32>, vector<16x7xf32> -> vector<16x7xf32>
    %c0_231 = arith.constant 0 : index
    %c21 = arith.constant 21 : index
    %308 = vector.load %arg16[%c0_231, %c21] : memref<16x49xf32, #tpu.memory_space<vmem>>, vector<16x7xf32>
    tpu.vector_store %arg16[%c0_231, %c21], %307 {strides = array<i32>} : memref<16x49xf32, #tpu.memory_space<vmem>>, vector<16x7xf32>,
    %c0_232 = arith.constant 0 : index
    %c128 = arith.constant 128 : index
    %309 = vector.load %arg15[%c0_232, %c128] : memref<16x224xf32, #tpu.memory_space<vmem>>, vector<16x14xf32>
    %c0_233 = arith.constant 0 : index
    %c129_234 = arith.constant 129 : index
    %310 = vector.load %arg15[%c0_233, %c129_234] : memref<16x224xf32, #tpu.memory_space<vmem>>, vector<16x14xf32>
    %311 = arith.maximumf %309, %310 : vector<16x14xf32>
    %c0_235 = arith.constant 0 : index
    %c144 = arith.constant 144 : index
    %312 = vector.load %arg15[%c0_235, %c144] : memref<16x224xf32, #tpu.memory_space<vmem>>, vector<16x14xf32>
    %c0_236 = arith.constant 0 : index
    %c145_237 = arith.constant 145 : index
    %313 = vector.load %arg15[%c0_236, %c145_237] : memref<16x224xf32, #tpu.memory_space<vmem>>, vector<16x14xf32>
    %314 = arith.maximumf %312, %313 : vector<16x14xf32>
    %315 = arith.maximumf %311, %314 : vector<16x14xf32>
    %cst_238 = arith.constant dense<0.000000e+00> : vector<16x7xf32>
    %316 = tpu.matmul %315, %272, %cst_238 {dimension_numbers = #tpu.dot_dimension_numbers<[1], [0], [0], [1], [0, 0, 1, 1], [], []>} : vector<16x14xf32>, vector<14x7xf32>, vector<16x7xf32> -> vector<16x7xf32>
    %c0_239 = arith.constant 0 : index
    %c28 = arith.constant 28 : index
    %317 = vector.load %arg16[%c0_239, %c28] : memref<16x49xf32, #tpu.memory_space<vmem>>, vector<16x7xf32>
    tpu.vector_store %arg16[%c0_239, %c28], %316 {strides = array<i32>} : memref<16x49xf32, #tpu.memory_space<vmem>>, vector<16x7xf32>,
    %c0_240 = arith.constant 0 : index
    %c160 = arith.constant 160 : index
    %318 = vector.load %arg15[%c0_240, %c160] : memref<16x224xf32, #tpu.memory_space<vmem>>, vector<16x14xf32>
    %c0_241 = arith.constant 0 : index
    %c161_242 = arith.constant 161 : index
    %319 = vector.load %arg15[%c0_241, %c161_242] : memref<16x224xf32, #tpu.memory_space<vmem>>, vector<16x14xf32>
    %320 = arith.maximumf %318, %319 : vector<16x14xf32>
    %c0_243 = arith.constant 0 : index
    %c176 = arith.constant 176 : index
    %321 = vector.load %arg15[%c0_243, %c176] : memref<16x224xf32, #tpu.memory_space<vmem>>, vector<16x14xf32>
    %c0_244 = arith.constant 0 : index
    %c177_245 = arith.constant 177 : index
    %322 = vector.load %arg15[%c0_244, %c177_245] : memref<16x224xf32, #tpu.memory_space<vmem>>, vector<16x14xf32>
    %323 = arith.maximumf %321, %322 : vector<16x14xf32>
    %324 = arith.maximumf %320, %323 : vector<16x14xf32>
    %cst_246 = arith.constant dense<0.000000e+00> : vector<16x7xf32>
    %325 = tpu.matmul %324, %272, %cst_246 {dimension_numbers = #tpu.dot_dimension_numbers<[1], [0], [0], [1], [0, 0, 1, 1], [], []>} : vector<16x14xf32>, vector<14x7xf32>, vector<16x7xf32> -> vector<16x7xf32>
    %c0_247 = arith.constant 0 : index
    %c35 = arith.constant 35 : index
    %326 = vector.load %arg16[%c0_247, %c35] : memref<16x49xf32, #tpu.memory_space<vmem>>, vector<16x7xf32>
    tpu.vector_store %arg16[%c0_247, %c35], %325 {strides = array<i32>} : memref<16x49xf32, #tpu.memory_space<vmem>>, vector<16x7xf32>,
    %c0_248 = arith.constant 0 : index
    %c192 = arith.constant 192 : index
    %327 = vector.load %arg15[%c0_248, %c192] : memref<16x224xf32, #tpu.memory_space<vmem>>, vector<16x14xf32>
    %c0_249 = arith.constant 0 : index
    %c193_250 = arith.constant 193 : index
    %328 = vector.load %arg15[%c0_249, %c193_250] : memref<16x224xf32, #tpu.memory_space<vmem>>, vector<16x14xf32>
    %329 = arith.maximumf %327, %328 : vector<16x14xf32>
    %c0_251 = arith.constant 0 : index
    %c208 = arith.constant 208 : index
    %330 = vector.load %arg15[%c0_251, %c208] : memref<16x224xf32, #tpu.memory_space<vmem>>, vector<16x14xf32>
    %c0_252 = arith.constant 0 : index
    %c209_253 = arith.constant 209 : index
    %331 = vector.load %arg15[%c0_252, %c209_253] : memref<16x224xf32, #tpu.memory_space<vmem>>, vector<16x14xf32>
    %332 = arith.maximumf %330, %331 : vector<16x14xf32>
    %333 = arith.maximumf %329, %332 : vector<16x14xf32>
    %cst_254 = arith.constant dense<0.000000e+00> : vector<16x7xf32>
    %334 = tpu.matmul %333, %272, %cst_254 {dimension_numbers = #tpu.dot_dimension_numbers<[1], [0], [0], [1], [0, 0, 1, 1], [], []>} : vector<16x14xf32>, vector<14x7xf32>, vector<16x7xf32> -> vector<16x7xf32>
    %c0_255 = arith.constant 0 : index
    %c42 = arith.constant 42 : index
    %335 = vector.load %arg16[%c0_255, %c42] : memref<16x49xf32, #tpu.memory_space<vmem>>, vector<16x7xf32>
    tpu.vector_store %arg16[%c0_255, %c42], %334 {strides = array<i32>} : memref<16x49xf32, #tpu.memory_space<vmem>>, vector<16x7xf32>,
    %cst_256 = arith.constant 0.000000e+00 : f32
    %336 = vector.broadcast %cst_256 : f32 to vector<1x64xf32>
    %c0_257 = arith.constant 0 : index
    %c0_258 = arith.constant 0 : index
    %337 = vector.load %arg16[%c0_257, %c0_258] : memref<16x49xf32, #tpu.memory_space<vmem>>, vector<1x49xf32>
    %c0_259 = arith.constant 0 : index
    %c0_260 = arith.constant 0 : index
    %c0_261 = arith.constant 0 : index
    %338 = vector.load %arg6[%c0_259, %c0_260, %c0_261] : memref<16x49x64xf32, #tpu.memory_space<vmem>>, vector<1x49x64xf32>
    %339 = vector.shape_cast %338 : vector<1x49x64xf32> to vector<49x64xf32>
    %cst_262 = arith.constant dense<0.000000e+00> : vector<1x64xf32>
    %340 = tpu.matmul %337, %339, %cst_262 {dimension_numbers = #tpu.dot_dimension_numbers<[1], [0], [0], [1], [0, 0, 1, 1], [], []>} : vector<1x49xf32>, vector<49x64xf32>, vector<1x64xf32> -> vector<1x64xf32>
    %341 = arith.addf %336, %340 : vector<1x64xf32>
    %c1_263 = arith.constant 1 : index
    %c0_264 = arith.constant 0 : index
    %342 = vector.load %arg16[%c1_263, %c0_264] : memref<16x49xf32, #tpu.memory_space<vmem>>, vector<1x49xf32>
    %c1_265 = arith.constant 1 : index
    %c0_266 = arith.constant 0 : index
    %c0_267 = arith.constant 0 : index
    %343 = vector.load %arg6[%c1_265, %c0_266, %c0_267] : memref<16x49x64xf32, #tpu.memory_space<vmem>>, vector<1x49x64xf32>
    %344 = vector.shape_cast %343 : vector<1x49x64xf32> to vector<49x64xf32>
    %cst_268 = arith.constant dense<0.000000e+00> : vector<1x64xf32>
    %345 = tpu.matmul %342, %344, %cst_268 {dimension_numbers = #tpu.dot_dimension_numbers<[1], [0], [0], [1], [0, 0, 1, 1], [], []>} : vector<1x49xf32>, vector<49x64xf32>, vector<1x64xf32> -> vector<1x64xf32>
    %346 = arith.addf %341, %345 : vector<1x64xf32>
    %c2_269 = arith.constant 2 : index
    %c0_270 = arith.constant 0 : index
    %347 = vector.load %arg16[%c2_269, %c0_270] : memref<16x49xf32, #tpu.memory_space<vmem>>, vector<1x49xf32>
    %c2_271 = arith.constant 2 : index
    %c0_272 = arith.constant 0 : index
    %c0_273 = arith.constant 0 : index
    %348 = vector.load %arg6[%c2_271, %c0_272, %c0_273] : memref<16x49x64xf32, #tpu.memory_space<vmem>>, vector<1x49x64xf32>
    %349 = vector.shape_cast %348 : vector<1x49x64xf32> to vector<49x64xf32>
    %cst_274 = arith.constant dense<0.000000e+00> : vector<1x64xf32>
    %350 = tpu.matmul %347, %349, %cst_274 {dimension_numbers = #tpu.dot_dimension_numbers<[1], [0], [0], [1], [0, 0, 1, 1], [], []>} : vector<1x49xf32>, vector<49x64xf32>, vector<1x64xf32> -> vector<1x64xf32>
    %351 = arith.addf %346, %350 : vector<1x64xf32>
    %c3_275 = arith.constant 3 : index
    %c0_276 = arith.constant 0 : index
    %352 = vector.load %arg16[%c3_275, %c0_276] : memref<16x49xf32, #tpu.memory_space<vmem>>, vector<1x49xf32>
    %c3_277 = arith.constant 3 : index
    %c0_278 = arith.constant 0 : index
    %c0_279 = arith.constant 0 : index
    %353 = vector.load %arg6[%c3_277, %c0_278, %c0_279] : memref<16x49x64xf32, #tpu.memory_space<vmem>>, vector<1x49x64xf32>
    %354 = vector.shape_cast %353 : vector<1x49x64xf32> to vector<49x64xf32>
    %cst_280 = arith.constant dense<0.000000e+00> : vector<1x64xf32>
    %355 = tpu.matmul %352, %354, %cst_280 {dimension_numbers = #tpu.dot_dimension_numbers<[1], [0], [0], [1], [0, 0, 1, 1], [], []>} : vector<1x49xf32>, vector<49x64xf32>, vector<1x64xf32> -> vector<1x64xf32>
    %356 = arith.addf %351, %355 : vector<1x64xf32>
    %c4_281 = arith.constant 4 : index
    %c0_282 = arith.constant 0 : index
    %357 = vector.load %arg16[%c4_281, %c0_282] : memref<16x49xf32, #tpu.memory_space<vmem>>, vector<1x49xf32>
    %c4_283 = arith.constant 4 : index
    %c0_284 = arith.constant 0 : index
    %c0_285 = arith.constant 0 : index
    %358 = vector.load %arg6[%c4_283, %c0_284, %c0_285] : memref<16x49x64xf32, #tpu.memory_space<vmem>>, vector<1x49x64xf32>
    %359 = vector.shape_cast %358 : vector<1x49x64xf32> to vector<49x64xf32>
    %cst_286 = arith.constant dense<0.000000e+00> : vector<1x64xf32>
    %360 = tpu.matmul %357, %359, %cst_286 {dimension_numbers = #tpu.dot_dimension_numbers<[1], [0], [0], [1], [0, 0, 1, 1], [], []>} : vector<1x49xf32>, vector<49x64xf32>, vector<1x64xf32> -> vector<1x64xf32>
    %361 = arith.addf %356, %360 : vector<1x64xf32>
    %c5_287 = arith.constant 5 : index
    %c0_288 = arith.constant 0 : index
    %362 = vector.load %arg16[%c5_287, %c0_288] : memref<16x49xf32, #tpu.memory_space<vmem>>, vector<1x49xf32>
    %c5_289 = arith.constant 5 : index
    %c0_290 = arith.constant 0 : index
    %c0_291 = arith.constant 0 : index
    %363 = vector.load %arg6[%c5_289, %c0_290, %c0_291] : memref<16x49x64xf32, #tpu.memory_space<vmem>>, vector<1x49x64xf32>
    %364 = vector.shape_cast %363 : vector<1x49x64xf32> to vector<49x64xf32>
    %cst_292 = arith.constant dense<0.000000e+00> : vector<1x64xf32>
    %365 = tpu.matmul %362, %364, %cst_292 {dimension_numbers = #tpu.dot_dimension_numbers<[1], [0], [0], [1], [0, 0, 1, 1], [], []>} : vector<1x49xf32>, vector<49x64xf32>, vector<1x64xf32> -> vector<1x64xf32>
    %366 = arith.addf %361, %365 : vector<1x64xf32>
    %c6_293 = arith.constant 6 : index
    %c0_294 = arith.constant 0 : index
    %367 = vector.load %arg16[%c6_293, %c0_294] : memref<16x49xf32, #tpu.memory_space<vmem>>, vector<1x49xf32>
    %c6_295 = arith.constant 6 : index
    %c0_296 = arith.constant 0 : index
    %c0_297 = arith.constant 0 : index
    %368 = vector.load %arg6[%c6_295, %c0_296, %c0_297] : memref<16x49x64xf32, #tpu.memory_space<vmem>>, vector<1x49x64xf32>
    %369 = vector.shape_cast %368 : vector<1x49x64xf32> to vector<49x64xf32>
    %cst_298 = arith.constant dense<0.000000e+00> : vector<1x64xf32>
    %370 = tpu.matmul %367, %369, %cst_298 {dimension_numbers = #tpu.dot_dimension_numbers<[1], [0], [0], [1], [0, 0, 1, 1], [], []>} : vector<1x49xf32>, vector<49x64xf32>, vector<1x64xf32> -> vector<1x64xf32>
    %371 = arith.addf %366, %370 : vector<1x64xf32>
    %c7_299 = arith.constant 7 : index
    %c0_300 = arith.constant 0 : index
    %372 = vector.load %arg16[%c7_299, %c0_300] : memref<16x49xf32, #tpu.memory_space<vmem>>, vector<1x49xf32>
    %c7_301 = arith.constant 7 : index
    %c0_302 = arith.constant 0 : index
    %c0_303 = arith.constant 0 : index
    %373 = vector.load %arg6[%c7_301, %c0_302, %c0_303] : memref<16x49x64xf32, #tpu.memory_space<vmem>>, vector<1x49x64xf32>
    %374 = vector.shape_cast %373 : vector<1x49x64xf32> to vector<49x64xf32>
    %cst_304 = arith.constant dense<0.000000e+00> : vector<1x64xf32>
    %375 = tpu.matmul %372, %374, %cst_304 {dimension_numbers = #tpu.dot_dimension_numbers<[1], [0], [0], [1], [0, 0, 1, 1], [], []>} : vector<1x49xf32>, vector<49x64xf32>, vector<1x64xf32> -> vector<1x64xf32>
    %376 = arith.addf %371, %375 : vector<1x64xf32>
    %c8_305 = arith.constant 8 : index
    %c0_306 = arith.constant 0 : index
    %377 = vector.load %arg16[%c8_305, %c0_306] : memref<16x49xf32, #tpu.memory_space<vmem>>, vector<1x49xf32>
    %c8_307 = arith.constant 8 : index
    %c0_308 = arith.constant 0 : index
    %c0_309 = arith.constant 0 : index
    %378 = vector.load %arg6[%c8_307, %c0_308, %c0_309] : memref<16x49x64xf32, #tpu.memory_space<vmem>>, vector<1x49x64xf32>
    %379 = vector.shape_cast %378 : vector<1x49x64xf32> to vector<49x64xf32>
    %cst_310 = arith.constant dense<0.000000e+00> : vector<1x64xf32>
    %380 = tpu.matmul %377, %379, %cst_310 {dimension_numbers = #tpu.dot_dimension_numbers<[1], [0], [0], [1], [0, 0, 1, 1], [], []>} : vector<1x49xf32>, vector<49x64xf32>, vector<1x64xf32> -> vector<1x64xf32>
    %381 = arith.addf %376, %380 : vector<1x64xf32>
    %c9 = arith.constant 9 : index
    %c0_311 = arith.constant 0 : index
    %382 = vector.load %arg16[%c9, %c0_311] : memref<16x49xf32, #tpu.memory_space<vmem>>, vector<1x49xf32>
    %c9_312 = arith.constant 9 : index
    %c0_313 = arith.constant 0 : index
    %c0_314 = arith.constant 0 : index
    %383 = vector.load %arg6[%c9_312, %c0_313, %c0_314] : memref<16x49x64xf32, #tpu.memory_space<vmem>>, vector<1x49x64xf32>
    %384 = vector.shape_cast %383 : vector<1x49x64xf32> to vector<49x64xf32>
    %cst_315 = arith.constant dense<0.000000e+00> : vector<1x64xf32>
    %385 = tpu.matmul %382, %384, %cst_315 {dimension_numbers = #tpu.dot_dimension_numbers<[1], [0], [0], [1], [0, 0, 1, 1], [], []>} : vector<1x49xf32>, vector<49x64xf32>, vector<1x64xf32> -> vector<1x64xf32>
    %386 = arith.addf %381, %385 : vector<1x64xf32>
    %c10 = arith.constant 10 : index
    %c0_316 = arith.constant 0 : index
    %387 = vector.load %arg16[%c10, %c0_316] : memref<16x49xf32, #tpu.memory_space<vmem>>, vector<1x49xf32>
    %c10_317 = arith.constant 10 : index
    %c0_318 = arith.constant 0 : index
    %c0_319 = arith.constant 0 : index
    %388 = vector.load %arg6[%c10_317, %c0_318, %c0_319] : memref<16x49x64xf32, #tpu.memory_space<vmem>>, vector<1x49x64xf32>
    %389 = vector.shape_cast %388 : vector<1x49x64xf32> to vector<49x64xf32>
    %cst_320 = arith.constant dense<0.000000e+00> : vector<1x64xf32>
    %390 = tpu.matmul %387, %389, %cst_320 {dimension_numbers = #tpu.dot_dimension_numbers<[1], [0], [0], [1], [0, 0, 1, 1], [], []>} : vector<1x49xf32>, vector<49x64xf32>, vector<1x64xf32> -> vector<1x64xf32>
    %391 = arith.addf %386, %390 : vector<1x64xf32>
    %c11 = arith.constant 11 : index
    %c0_321 = arith.constant 0 : index
    %392 = vector.load %arg16[%c11, %c0_321] : memref<16x49xf32, #tpu.memory_space<vmem>>, vector<1x49xf32>
    %c11_322 = arith.constant 11 : index
    %c0_323 = arith.constant 0 : index
    %c0_324 = arith.constant 0 : index
    %393 = vector.load %arg6[%c11_322, %c0_323, %c0_324] : memref<16x49x64xf32, #tpu.memory_space<vmem>>, vector<1x49x64xf32>
    %394 = vector.shape_cast %393 : vector<1x49x64xf32> to vector<49x64xf32>
    %cst_325 = arith.constant dense<0.000000e+00> : vector<1x64xf32>
    %395 = tpu.matmul %392, %394, %cst_325 {dimension_numbers = #tpu.dot_dimension_numbers<[1], [0], [0], [1], [0, 0, 1, 1], [], []>} : vector<1x49xf32>, vector<49x64xf32>, vector<1x64xf32> -> vector<1x64xf32>
    %396 = arith.addf %391, %395 : vector<1x64xf32>
    %c12 = arith.constant 12 : index
    %c0_326 = arith.constant 0 : index
    %397 = vector.load %arg16[%c12, %c0_326] : memref<16x49xf32, #tpu.memory_space<vmem>>, vector<1x49xf32>
    %c12_327 = arith.constant 12 : index
    %c0_328 = arith.constant 0 : index
    %c0_329 = arith.constant 0 : index
    %398 = vector.load %arg6[%c12_327, %c0_328, %c0_329] : memref<16x49x64xf32, #tpu.memory_space<vmem>>, vector<1x49x64xf32>
    %399 = vector.shape_cast %398 : vector<1x49x64xf32> to vector<49x64xf32>
    %cst_330 = arith.constant dense<0.000000e+00> : vector<1x64xf32>
    %400 = tpu.matmul %397, %399, %cst_330 {dimension_numbers = #tpu.dot_dimension_numbers<[1], [0], [0], [1], [0, 0, 1, 1], [], []>} : vector<1x49xf32>, vector<49x64xf32>, vector<1x64xf32> -> vector<1x64xf32>
    %401 = arith.addf %396, %400 : vector<1x64xf32>
    %c13 = arith.constant 13 : index
    %c0_331 = arith.constant 0 : index
    %402 = vector.load %arg16[%c13, %c0_331] : memref<16x49xf32, #tpu.memory_space<vmem>>, vector<1x49xf32>
    %c13_332 = arith.constant 13 : index
    %c0_333 = arith.constant 0 : index
    %c0_334 = arith.constant 0 : index
    %403 = vector.load %arg6[%c13_332, %c0_333, %c0_334] : memref<16x49x64xf32, #tpu.memory_space<vmem>>, vector<1x49x64xf32>
    %404 = vector.shape_cast %403 : vector<1x49x64xf32> to vector<49x64xf32>
    %cst_335 = arith.constant dense<0.000000e+00> : vector<1x64xf32>
    %405 = tpu.matmul %402, %404, %cst_335 {dimension_numbers = #tpu.dot_dimension_numbers<[1], [0], [0], [1], [0, 0, 1, 1], [], []>} : vector<1x49xf32>, vector<49x64xf32>, vector<1x64xf32> -> vector<1x64xf32>
    %406 = arith.addf %401, %405 : vector<1x64xf32>
    %c14_336 = arith.constant 14 : index
    %c0_337 = arith.constant 0 : index
    %407 = vector.load %arg16[%c14_336, %c0_337] : memref<16x49xf32, #tpu.memory_space<vmem>>, vector<1x49xf32>
    %c14_338 = arith.constant 14 : index
    %c0_339 = arith.constant 0 : index
    %c0_340 = arith.constant 0 : index
    %408 = vector.load %arg6[%c14_338, %c0_339, %c0_340] : memref<16x49x64xf32, #tpu.memory_space<vmem>>, vector<1x49x64xf32>
    %409 = vector.shape_cast %408 : vector<1x49x64xf32> to vector<49x64xf32>
    %cst_341 = arith.constant dense<0.000000e+00> : vector<1x64xf32>
    %410 = tpu.matmul %407, %409, %cst_341 {dimension_numbers = #tpu.dot_dimension_numbers<[1], [0], [0], [1], [0, 0, 1, 1], [], []>} : vector<1x49xf32>, vector<49x64xf32>, vector<1x64xf32> -> vector<1x64xf32>
    %411 = arith.addf %406, %410 : vector<1x64xf32>
    %c15 = arith.constant 15 : index
    %c0_342 = arith.constant 0 : index
    %412 = vector.load %arg16[%c15, %c0_342] : memref<16x49xf32, #tpu.memory_space<vmem>>, vector<1x49xf32>
    %c15_343 = arith.constant 15 : index
    %c0_344 = arith.constant 0 : index
    %c0_345 = arith.constant 0 : index
    %413 = vector.load %arg6[%c15_343, %c0_344, %c0_345] : memref<16x49x64xf32, #tpu.memory_space<vmem>>, vector<1x49x64xf32>
    %414 = vector.shape_cast %413 : vector<1x49x64xf32> to vector<49x64xf32>
    %cst_346 = arith.constant dense<0.000000e+00> : vector<1x64xf32>
    %415 = tpu.matmul %412, %414, %cst_346 {dimension_numbers = #tpu.dot_dimension_numbers<[1], [0], [0], [1], [0, 0, 1, 1], [], []>} : vector<1x49xf32>, vector<49x64xf32>, vector<1x64xf32> -> vector<1x64xf32>
    %416 = arith.addf %411, %415 : vector<1x64xf32>
    %c0_347 = arith.constant 0 : index
    %c0_348 = arith.constant 0 : index
    %417 = vector.load %arg7[%c0_347, %c0_348] : memref<1x64xf32, #tpu.memory_space<vmem>>, vector<1x64xf32>
    %418 = arith.addf %416, %417 : vector<1x64xf32>
    %cst_349 = arith.constant 0.000000e+00 : f32
    %419 = vector.broadcast %cst_349 : f32 to vector<1x64xf32>
    %420 = arith.maximumf %418, %419 : vector<1x64xf32>
    %c0_350 = arith.constant 0 : index
    %c0_351 = arith.constant 0 : index
    %421 = vector.load %arg8[%c0_350, %c0_351] : memref<64x32xf32, #tpu.memory_space<vmem>>, vector<64x32xf32>
    %cst_352 = arith.constant dense<0.000000e+00> : vector<1x32xf32>
    %422 = tpu.matmul %420, %421, %cst_352 {dimension_numbers = #tpu.dot_dimension_numbers<[1], [0], [0], [1], [0, 0, 1, 1], [], []>} : vector<1x64xf32>, vector<64x32xf32>, vector<1x32xf32> -> vector<1x32xf32>
    %c0_353 = arith.constant 0 : index
    %c0_354 = arith.constant 0 : index
    %423 = vector.load %arg9[%c0_353, %c0_354] : memref<1x32xf32, #tpu.memory_space<vmem>>, vector<1x32xf32>
    %424 = arith.addf %422, %423 : vector<1x32xf32>
    %cst_355 = arith.constant 0.000000e+00 : f32
    %425 = vector.broadcast %cst_355 : f32 to vector<1x32xf32>
    %426 = arith.maximumf %424, %425 : vector<1x32xf32>
    %c0_356 = arith.constant 0 : index
    %c0_357 = arith.constant 0 : index
    %427 = vector.load %arg10[%c0_356, %c0_357] : memref<32x128xf32, #tpu.memory_space<vmem>>, vector<32x128xf32>
    %cst_358 = arith.constant dense<0.000000e+00> : vector<1x128xf32>
    %428 = tpu.matmul %426, %427, %cst_358 {dimension_numbers = #tpu.dot_dimension_numbers<[1], [0], [0], [1], [0, 0, 1, 1], [], []>} : vector<1x32xf32>, vector<32x128xf32>, vector<1x128xf32> -> vector<1x128xf32>
    %c0_359 = arith.constant 0 : index
    %c0_360 = arith.constant 0 : index
    %429 = vector.load %arg11[%c0_359, %c0_360] : memref<1x128xf32, #tpu.memory_space<vmem>>, vector<1x128xf32>
    %430 = arith.addf %428, %429 : vector<1x128xf32>
    %c0_361 = arith.constant 0 : index
    %c0_362 = arith.constant 0 : index
    %c0_363 = arith.constant 0 : index
    %431 = vector.load %arg12[%c0_361, %c0_362, %c0_363] : memref<1x1x128xf32, #tpu.memory_space<vmem>>, vector<1x1x128xf32>
    %432 = vector.shape_cast %431 : vector<1x1x128xf32> to vector<1x128xf32>
    %433 = vector.shape_cast %430 : vector<1x128xf32> to vector<1x1x128xf32>
    tpu.vector_store %arg12[%c0_361, %c0_362, %c0_363], %433 {strides = array<i32>} : memref<1x1x128xf32, #tpu.memory_space<vmem>>, vector<1x1x128xf32>,
    return
  }
  func.func @transform_0(%arg0: i32) -> (i32, i32, i32) {
    %c0_i32 = arith.constant 0 : i32
    %c0_i32_0 = arith.constant 0 : i32
    %c0_i32_1 = arith.constant 0 : i32
    return %arg0, %c0_i32, %c0_i32_0 : i32, i32, i32
  }
  func.func @transform_1(%arg0: i32) -> (i32, i32, i32) {
    %c0_i32 = arith.constant 0 : i32
    %c0_i32_0 = arith.constant 0 : i32
    %c0_i32_1 = arith.constant 0 : i32
    %c0_i32_2 = arith.constant 0 : i32
    return %c0_i32, %c0_i32_0, %c0_i32_1 : i32, i32, i32
  }
  func.func @transform_2(%arg0: i32) -> (i32, i32) {
    %c0_i32 = arith.constant 0 : i32
    %c0_i32_0 = arith.constant 0 : i32
    %c0_i32_1 = arith.constant 0 : i32
    return %c0_i32, %c0_i32_0 : i32, i32
  }
  func.func @transform_3(%arg0: i32) -> (i32, i32, i32) {
    %c0_i32 = arith.constant 0 : i32
    %c0_i32_0 = arith.constant 0 : i32
    %c0_i32_1 = arith.constant 0 : i32
    %c0_i32_2 = arith.constant 0 : i32
    return %c0_i32, %c0_i32_0, %c0_i32_1 : i32, i32, i32
  }
  func.func @transform_4(%arg0: i32) -> (i32, i32) {
    %c0_i32 = arith.constant 0 : i32
    %c0_i32_0 = arith.constant 0 : i32
    %c0_i32_1 = arith.constant 0 : i32
    return %c0_i32, %c0_i32_0 : i32, i32
  }
  func.func @transform_5(%arg0: i32) -> (i32, i32, i32) {
    %c0_i32 = arith.constant 0 : i32
    %c0_i32_0 = arith.constant 0 : i32
    %c0_i32_1 = arith.constant 0 : i32
    %c0_i32_2 = arith.constant 0 : i32
    return %c0_i32, %c0_i32_0, %c0_i32_1 : i32, i32, i32
  }
  func.func @transform_6(%arg0: i32) -> (i32, i32) {
    %c0_i32 = arith.constant 0 : i32
    %c0_i32_0 = arith.constant 0 : i32
    %c0_i32_1 = arith.constant 0 : i32
    return %c0_i32, %c0_i32_0 : i32, i32
  }
  func.func @transform_7(%arg0: i32) -> (i32, i32) {
    %c0_i32 = arith.constant 0 : i32
    %c0_i32_0 = arith.constant 0 : i32
    %c0_i32_1 = arith.constant 0 : i32
    return %c0_i32, %c0_i32_0 : i32, i32
  }
  func.func @transform_8(%arg0: i32) -> (i32, i32) {
    %c0_i32 = arith.constant 0 : i32
    %c0_i32_0 = arith.constant 0 : i32
    %c0_i32_1 = arith.constant 0 : i32
    return %c0_i32, %c0_i32_0 : i32, i32
  }
  func.func @transform_9(%arg0: i32) -> (i32, i32) {
    %c0_i32 = arith.constant 0 : i32
    %c0_i32_0 = arith.constant 0 : i32
    %c0_i32_1 = arith.constant 0 : i32
    return %c0_i32, %c0_i32_0 : i32, i32
  }
  func.func @transform_10(%arg0: i32) -> (i32, i32) {
    %c0_i32 = arith.constant 0 : i32
    %c0_i32_0 = arith.constant 0 : i32
    %c0_i32_1 = arith.constant 0 : i32
    return %c0_i32, %c0_i32_0 : i32, i32
  }
  func.func @transform_11(%arg0: i32) -> (i32, i32, i32) {
    %c0_i32 = arith.constant 0 : i32
    %c0_i32_0 = arith.constant 0 : i32
    %c0_i32_1 = arith.constant 0 : i32
    return %arg0, %c0_i32, %c0_i32_0 : i32, i32, i32
  }
}

</mosaic_0001>

<bundles_post_ra>
// kernel: convnet_forward.1
= control target key start
LH: loop header
LB: loop body
LE: loop exit
PB: predicated region body
PF: predicated region fallthrough
CT: control target
= control target key end

     0   :  { %s5503_s0 = inlined_call_operand.vmem [shape: f32[2,1,960], index: 0, kind: input, shape index: {}]   ;;  %s5504_s1 = inlined_call_operand.vmem [shape: f32[9,8,1], index: 1, kind: input, shape index: {}]   ;;  %s5505_s2 = inlined_call_operand.vmem [shape: f32[8,1], index: 2, kind: input, shape index: {}]   ;;  %s5506_s3 = inlined_call_operand.vmem [shape: f32[9,16,8], index: 3, kind: input, shape index: {}]   ;;  %s5507_s4 = inlined_call_operand.vmem [shape: f32[16,1], index: 4, kind: input, shape index: {}]   ;;  %s5508_s5 = inlined_call_operand.vmem [shape: f32[16,49,64], index: 5, kind: input, shape index: {}]   ;;  %s5509_s6 = inlined_call_operand.vmem [shape: f32[1,64], index: 6, kind: input, shape index: {}]   ;;  %s5510_s7 = inlined_call_operand.vmem [shape: f32[64,32], index: 7, kind: input, shape index: {}]   ;;  %s5511_s8 = inlined_call_operand.vmem [shape: f32[1,32], index: 8, kind: input, shape index: {}]   ;;  %s5512_s9 = inlined_call_operand.vmem [shape: f32[32,128], index: 9, kind: input, shape index: {}]   ;;  %s5513_s10 = inlined_call_operand.vmem [shape: f32[1,128], index: 10, kind: input, shape index: {}]   ;;  %s5514_s11 = inlined_call_operand.hbm [shape: f32[2,1,128], index: 11, kind: output, shape index: {}]  }
   0x1   :  { %5523 = sst [smem:[#allocation9_spill]] %s5503_s0 }
   0x2   :  { %5524 = sst [smem:[#allocation10_spill]] %s5504_s1 }
   0x3   :  { %16 = vsyncpa [#allocation7], 0 }
   0x4   :  { %18 = vsyncpa [#allocation7 + $0x1], 0  ;;  %s3994_s17 = smov 0   ;;  %s3996_s18 = smov 0  }
   0x5   :  { %s3998_s19 = smov 0   ;;  %s4000_s20 = smov 0  }
   0x6 LB: > { %s4015_s21 = sadd.s32 4294967295, %s3890_s20   ;;  %s3396_s22 = sadd.s32 4294967294, %s3890_s20   ;;  %s3890_s20 = sphi %s4000_s20, %s5542_s20   ;;  %s3886_s19 = sphi %s3998_s19, %s5541_s19   ;;  %s3882_s18 = sphi %s3996_s18, %s5540_s18   ;;  %s3878_s17 = sphi %s3994_s17, %s5539_s17  }
   0x7   : > { %s4019_s23 = sadd.s32 1, %s3890_s20   ;;  %s267_s24 = sadd.s32 1, %s3886_s19 }
   0x8   : > { %s264_s25 = ssub.s32 %s3890_s20, %s4019_s23  ;;  %p277_p0 = scmp.ne.s32.totalorder %s3886_s19, %s3882_s18 }
   0x9   : > { %p265_p1 = scmp.eq.s32.totalorder %s264_s25, 0  ;;  %p278_p2 = scmp.eq.s32.totalorder %s4015_s21, 1 }
   0xa   : > { %p283_p3 = scmp.ne.s32.totalorder %s3882_s18, %s3878_s17  ;;  %p284_p4 = scmp.eq.s32.totalorder %s3396_s22, 1 }
   0xb   : > { %s4030_s26 = scalar_select %p265_p1, %s3886_s19, %s267_s24  }
   0xc   : > { %p4032_p5 = por %p278_p2, %p277_p0  ;;  %p4036_p6 = por %p284_p4, %p283_p3 }
   0xd   : > { %p3399_p7 = scmp.ge.s32.totalorder %s3890_s20, 1  ;;  %p339_p8 = scmp.lt.s32.totalorder %s3890_s20, 3 }
   0xf   : > { %p340_p9 = pnand %p3399_p7, %p339_p8 }
  0x10   : > { %s5527_s1 = sld [smem:[#allocation10_spill]] (!%p340_p9)  ;;  %p377_p10 = scmp.lt.s32.totalorder (!%p340_p9), %s4015_s21, 1 }
  0x11   : > { %343 = sbr.rel (%p340_p9) target bundleno = 2481 (0x9b1), region = 64  ;;  %s5528_s0 = sld [smem:[#allocation9_spill]] (!%p340_p9) }
  0x12   : > { %s5519_s15 = smov (!%p340_p9), 127   ;;  %s3894_s16 = smov (!%p340_p9), 98  }
  0x13   : > { %s3895_s22 = smov (!%p340_p9), 126   ;;  %s3896_s24 = smov (!%p340_p9), 97  }
  0x14   : > { %s5517_s25 = smov (!%p340_p9), 96   ;;  %s3900_s12 = smov (!%p340_p9), 66  }
  0x15   : > { %s3901_s13 = smov (!%p340_p9), 76  }
  0x16   : > { %v3403_v0 = vld [vmem:[%s5527_s1 + $0x18] sm:$0xff]  ;;  %v3401_v1 = vld [vmem:[%s5527_s1 + $0x8] sm:$0xff]  ;;  %v3892_v2 = vmov 0   ;;  %v3404_v4 = vld [vmem:[%s5527_s1 + $0x20] sm:$0xff]  ;;  %s378_s29 = scalar_select %p377_p10, %s4015_s21, 1  ;;  %vm452_vm0 = vcmask 1039360  }
  0x17   : > { %3786 = vset.pattern.permute.xlu1 %v3892_v2  ;;  %3785 = vset.pattern.permute.xlu0 %v3892_v2  ;;  %v3405_v3 = vld [vmem:[%s5527_s1 + $0x28] sm:$0xff]  ;;  %v3402_v5 = vld [vmem:[%s5527_s1 + $0x10] sm:$0xff]  ;;  %v3408_v7 = vld [vmem:[%s5527_s1 + $0x40] sm:$0xff]  ;;  %vm508_vm1 = vcmask 1031168   ;;  %vm564_vm2 = vcmask 801792   ;;  %vm620_vm3 = vcmask 793600  }
  0x18   : > { %533 = vperm.xlu1 %3786, %v3403_v0   ;;  %421 = vperm.xlu0 %3785, %v3401_v1   ;;  %v3406_v6 = vld [vmem:[%s5527_s1 + $0x30] sm:$0xff]  ;;  %v3407_v8 = vld [vmem:[%s5527_s1 + $0x38] sm:$0xff]  ;;  %v382_v9 = vld [vmem:[%s5527_s1] sm:$0xff]  ;;  %s3400_s30 = sshll.u32 %s378_s29, 3  ;;  %s3898_s29 = smov 68   ;;  %vm676_vm4 = vcmask 785408  }
  0x19   : > { %3787 = vset.pattern.permute.xlu2 %v3892_v2  ;;  %v898_v10 = vld [vmem:[%s5505_s2] sm:$0xff]  ;;  %s4077_s14 = scalar_lea.vmem %s5528_s0, %s3400_s30  ;;  %s3899_s30 = smov 67   ;;  %vm754_vm5 = vcmask 556032   ;;  %vm815_vm6 = vcmask 547840   ;;  %vm876_vm7 = vcmask 539648   ;;  %vm924_vm8 = vcmask 588800  }
  0x1a   : > { %645 = vperm.xlu2 %3787, %v3405_v3   ;;  %v4080_v11 = vld [vmem:[%s4077_s14] sm:$0x7f]  ;;  %vm965_vm9 = vcmask 1043456   ;;  %vm961_vm14 = vcmask 228352   ;;  %vm948_vm15 = vcmask 130048   ;;  %s3848_s0 = scalar_lea.hbm %s5514_s11, 2 }
  0x1b   : > { %v4083_v12 = vperm.slane %v4080_v11, 1  ;;  %v4086_v13 = vperm.slane %v4080_v11, 0  ;;  %v4121_v26 = vperm.slane %v4080_v11, 2  ;;  %v4135_v31 = vld [vmem:[%s4077_s14] sm:$0xff]  ;;  %v4158_v42 = vperm.slane %v4080_v11, 4  ;;  %s3902_s14 = smov 24  }
  0x1c   : > { %v707_v32 = vperm.slane %v4135_v31, 1  ;;  %v706_v34 = vperm.slane %v4135_v31, 0  ;;  %v4161_v43 = vperm.slane %v4080_v11, 3  ;;  %v708_v51 = vperm.slane %v4135_v31, 2 }
  0x1d   : > { %v4199_v58 = vperm.slane %v4080_v11, 5  ;;  %v4213_v63 = vperm.slane %v4080_v11, 6 }
  0x20   : > { %589 = vperm.xlu1 %3786, %v3404_v4   ;;  %477 = vperm.xlu0 %3785, %v3402_v5  }
  0x22   : > { %702 = vperm.xlu2 %3787, %v3406_v6  }
  0x28   : > { %841 = vperm.xlu1 %3786, %v3408_v7   ;;  %780 = vperm.xlu0 %3785, %v3407_v8   ;;  %v710_v8 = vperm.slane %v4135_v31, 4 }
  0x2a   : > { %385 = vperm.xlu2 %3787, %v382_v9   ;;  %v709_v9 = vperm.slane %v4135_v31, 3 }
  0x32   : > { %901 = vperm.xlu2 %3787, %v898_v10  }
  0x74   : > { %v4123_v27 = vpop.permute.xlu2 %645 }
  0x75   : > { %v649_v28 = vmul.f32 %v4123_v27, %v4083_v12  ;;  %v648_v29 = vmul.f32 %v4123_v27, %v4086_v13  ;;  %v650_v48 = vmul.f32 %v4123_v27, %v4121_v26  ;;  %v651_v1 = vmul.f32 %v4123_v27, %v4161_v43 }
  0x76   : > { %v652_v6 = vmul.f32 %v4123_v27, %v4158_v42 }
  0x7c   : > { %v4138_v33 = vpop.permute.xlu2 %702 }
  0x7d   : > { %v723_v35 = vmul.f32 %v707_v32, %v4138_v33  ;;  %v722_v37 = vmul.f32 %v706_v34, %v4138_v33  ;;  %v724_v52 = vmul.f32 %v708_v51, %v4138_v33  ;;  %v726_v10 = vmul.f32 %v710_v8, %v4138_v33 }
  0x84   : > { %v4207_v62 = vpop.permute.xlu2 %385 }
  0x8a   : > { %v4088_v14 = vpop.permute.xlu0 %421  ;;  %v4096_v17 = vpop.permute.xlu1 %533 }
  0x8b   : > { %v425_v15 = vmul.f32 %v4088_v14, %v4083_v12  ;;  %v424_v16 = vmul.f32 %v4088_v14, %v4086_v13  ;;  %v536_v18 = vmul.f32 %v4096_v17, %v4086_v13  ;;  %v537_v24 = vmul.f32 %v4096_v17, %v4083_v12 }
  0x8c   : > { %v426_v30 = vmul.f32 %v4088_v14, %v4121_v26  ;;  %v538_v40 = vmul.f32 %v4096_v17, %v4121_v26  ;;  %v428_v44 = vmul.f32 %v4088_v14, %v4158_v42  ;;  %v427_v46 = vmul.f32 %v4088_v14, %v4161_v43  ;;  %v4223_v3 = vpop.permute.xlu2 %901 }
  0x8d   : > { %440 = vrot.lane.b32.xlu1 %v425_v15, %s5519_s15  ;;  %438 = vrot.lane.b32.xlu0 %v424_v16, %s5519_s15  ;;  %v540_v55 = vmul.f32 %v4096_v17, %v4158_v42  ;;  %v539_v57 = vmul.f32 %v4096_v17, %v4161_v43  ;;  %v429_v60 = vmul.f32 %v4088_v14, %v4199_v58 }
  0x8e   : > { %v430_v2 = vmul.f32 %v4088_v14, %v4213_v63  ;;  %v541_v11 = vmul.f32 %v4096_v17, %v4199_v58  ;;  %v725_v14 = vmul.f32 %v709_v9, %v4138_v33 }
  0x92   : > { %v4100_v19 = vpop.permute.xlu0 %477  ;;  %v4109_v22 = vpop.permute.xlu1 %589 }
  0x93   : > { %v480_v20 = vmul.f32 %v4100_v19, %v4086_v13  ;;  %v481_v21 = vmul.f32 %v4100_v19, %v4083_v12  ;;  %v593_v23 = vmul.f32 %v4109_v22, %v4083_v12  ;;  %v592_v25 = vmul.f32 %v4109_v22, %v4086_v13 }
  0x94   : > { %v482_v36 = vmul.f32 %v4100_v19, %v4121_v26  ;;  %v594_v45 = vmul.f32 %v4109_v22, %v4121_v26  ;;  %v483_v53 = vmul.f32 %v4100_v19, %v4161_v43  ;;  %v484_v54 = vmul.f32 %v4100_v19, %v4158_v42 }
  0x95   : > { %550 = vrot.lane.b32.xlu1 %v536_v18, %s3894_s16  ;;  %494 = vrot.lane.b32.xlu2 %v480_v20, %s3895_s22  ;;  %v596_v59 = vmul.f32 %v4109_v22, %v4158_v42  ;;  %v595_v61 = vmul.f32 %v4109_v22, %v4161_v43  ;;  %v485_v4 = vmul.f32 %v4100_v19, %v4199_v58 }
  0x96   : > { %496 = vrot.lane.b32.xlu0 %v481_v21, %s3895_s22  ;;  %v486_v5 = vmul.f32 %v4100_v19, %v4213_v63  ;;  %v542_v19 = vmul.f32 %v4096_v17, %v4213_v63 }
  0x9a   : > { %v4148_v38 = vpop.permute.xlu0 %780  ;;  %v4172_v47 = vpop.permute.xlu1 %841 }
  0x9b   : > { %v784_v39 = vmul.f32 %v4148_v38, %v707_v32  ;;  %v783_v41 = vmul.f32 %v4148_v38, %v706_v34  ;;  %v844_v49 = vmul.f32 %v4172_v47, %v706_v34  ;;  %v845_v50 = vmul.f32 %v4172_v47, %v707_v32 }
  0x9c   : > { %v785_v56 = vmul.f32 %v4148_v38, %v708_v51  ;;  %v846_v0 = vmul.f32 %v4172_v47, %v708_v51  ;;  %v786_v16 = vmul.f32 %v4148_v38, %v709_v9  ;;  %v787_v18 = vmul.f32 %v4148_v38, %v710_v8 }
  0x9d   : > { %608 = vrot.lane.b32.xlu1 %v593_v23, %s3896_s24  ;;  %552 = vrot.lane.b32.xlu2 %v537_v24, %s3894_s16  ;;  %v598_v24 = vmul.f32 %v4109_v22, %v4213_v63  ;;  %v653_v32 = vmul.f32 %v4123_v27, %v4199_v58  ;;  %v654_v34 = vmul.f32 %v4123_v27, %v4213_v63 }
  0x9e   : > { %606 = vrot.lane.b32.xlu0 %v592_v25, %s3896_s24  ;;  %v847_v25 = vmul.f32 %v4172_v47, %v709_v9 }
  0xa5   : > { %664 = vrot.lane.b32.xlu1 %v649_v28, %s5517_s25  ;;  %442 = vrot.lane.b32.xlu2 %v426_v30, %s5519_s15  ;;  %v597_v28 = vmul.f32 %v4109_v22, %v4199_v58 }
  0xa6   : > { %662 = vrot.lane.b32.xlu0 %v648_v29, %s5517_s25 }
  0xad   : > { %740 = vrot.lane.b32.xlu1 %v723_v35, %s3898_s29  ;;  %498 = vrot.lane.b32.xlu2 %v482_v36, %s3895_s22  ;;  %v848_v35 = vmul.f32 %v4172_v47, %v710_v8 }
  0xae   : > { %738 = vrot.lane.b32.xlu0 %v722_v37, %s3898_s29  ;;  %v711_v37 = vperm.slane %v4135_v31, 5 }
  0xb0   : > { %v788_v27 = vmul.f32 %v4148_v38, %v711_v37 }
  0xb5   : > { %801 = vrot.lane.b32.xlu1 %v784_v39, %s3899_s30  ;;  %554 = vrot.lane.b32.xlu2 %v538_v40, %s3894_s16  ;;  %v712_v40 = vperm.slane %v4135_v31, 6 }
  0xb6   : > { %799 = vrot.lane.b32.xlu0 %v783_v41, %s3899_s30 }
  0xb7   : > { %v728_v41 = vmul.f32 %v712_v40, %v4138_v33  ;;  %v789_v51 = vmul.f32 %v4148_v38, %v712_v40 }
  0xbd   : > { %446 = vrot.lane.b32.xlu1 %v428_v44, %s5519_s15  ;;  %610 = vrot.lane.b32.xlu2 %v594_v45, %s3896_s24  ;;  %v727_v44 = vmul.f32 %v711_v37, %v4138_v33 }
  0xbe   : > { %444 = vrot.lane.b32.xlu0 %v427_v46, %s5519_s15 }
  0xc5   : > { %666 = vrot.lane.b32.xlu1 %v650_v48, %s5517_s25  ;;  %860 = vrot.lane.b32.xlu2 %v844_v49, %s3900_s12  ;;  %v849_v49 = vmul.f32 %v4172_v47, %v711_v37 }
  0xc6   : > { %862 = vrot.lane.b32.xlu0 %v845_v50, %s3900_s12  ;;  %v850_v50 = vmul.f32 %v4172_v47, %v712_v40 }
  0xcd   : > { %742 = vrot.lane.b32.xlu1 %v724_v52, %s3898_s29  ;;  %500 = vrot.lane.b32.xlu2 %v483_v53, %s3895_s22 }
  0xce   : > { %502 = vrot.lane.b32.xlu0 %v484_v54, %s3895_s22  ;;  %v713_v54 = vperm.slane %v4135_v31, 7  ;;  %v403_v31 = vmul.f32 %v4086_v13, %v4207_v62 }
  0xd5   : > { %558 = vrot.lane.b32.xlu1 %v540_v55, %s3894_s16  ;;  %803 = vrot.lane.b32.xlu2 %v785_v56, %s3899_s30  ;;  %v790_v56 = vmul.f32 %v4148_v38, %v713_v54 }
  0xd6   : > { %556 = vrot.lane.b32.xlu0 %v539_v57, %s3894_s16  ;;  %v851_v57 = vmul.f32 %v4172_v47, %v713_v54 }
  0xdd   : > { %614 = vrot.lane.b32.xlu1 %v596_v59, %s3896_s24  ;;  %448 = vrot.lane.b32.xlu2 %v429_v60, %s5519_s15  ;;  %v729_v59 = vmul.f32 %v713_v54, %v4138_v33 }
  0xde   : > { %612 = vrot.lane.b32.xlu0 %v595_v61, %s3896_s24 }
  0xe5   : > { %864 = vrot.lane.b32.xlu1 %v846_v0, %s3900_s12  ;;  %668 = vrot.lane.b32.xlu2 %v651_v1, %s5517_s25 }
  0xe6   : > { %450 = vrot.lane.b32.xlu0 %v430_v2, %s5519_s15 }
  0xed   : > { %504 = vrot.lane.b32.xlu1 %v485_v4, %s3895_s22  ;;  %506 = vrot.lane.b32.xlu2 %v486_v5, %s3895_s22 }
  0xee   : > { %670 = vrot.lane.b32.xlu0 %v652_v6, %s5517_s25 }
  0xef   : > { %v4234_v7 = vpop.permute.xlu2 %494 }
  0xf5   : > { %746 = vrot.lane.b32.xlu1 %v726_v10, %s3898_s29  ;;  %560 = vrot.lane.b32.xlu2 %v541_v11, %s3894_s16 }
  0xf6   : > { %744 = vrot.lane.b32.xlu0 %v725_v14, %s3898_s29 }
  0xf7   : > { %v4245_v15 = vpop.permute.xlu2 %552 }
  0xfd   : > { %805 = vrot.lane.b32.xlu1 %v786_v16, %s3899_s30  ;;  %807 = vrot.lane.b32.xlu2 %v787_v18, %s3899_s30 }
  0xfe   : > { %562 = vrot.lane.b32.xlu0 %v542_v19, %s3894_s16 }
  0xff   : > { %v4254_v20 = vpop.permute.xlu1 %440  ;;  %v4256_v21 = vpop.permute.xlu2 %442 }
 0x100   : > { %v439_v23 = vpop.permute.xlu0 %438  ;;  %v454_v37 = vsel %vm452_vm0, %v4254_v20, %v4256_v21 }
 0x101   : > { %v453_v60 = vsel %vm452_vm0, %v439_v23, %v4254_v20 }
 0x102   : > { %v466_v0 = vadd.f32 %v453_v60, %v403_v31 }
 0x105   : > { %618 = vrot.lane.b32.xlu1 %v598_v24, %s3896_s24  ;;  %866 = vrot.lane.b32.xlu2 %v847_v25, %s3900_s12 }
 0x106   : > { %616 = vrot.lane.b32.xlu0 %v597_v28, %s3896_s24 }
 0x107   : > { %v551_v17 = vpop.permute.xlu1 %550  ;;  %v4266_v29 = vpop.permute.xlu2 %498 }
 0x108   : > { %v4268_v30 = vpop.permute.xlu0 %496  ;;  %v565_v2 = vsel %vm564_vm2, %v551_v17, %v4245_v15 }
 0x109   : > { %v509_v47 = vsel %vm508_vm1, %v4234_v7, %v4268_v30 }
 0x10a   : > { %v522_v1 = vadd.f32 %v509_v47, %v466_v0 }
 0x10c   : > { %v578_v13 = vadd.f32 %v565_v2, %v522_v1 }
 0x10d   : > { %672 = vrot.lane.b32.xlu1 %v653_v32, %s5517_s25  ;;  %674 = vrot.lane.b32.xlu2 %v654_v34, %s5517_s25  ;;  %s3921_s25 = smov 113  }
 0x10e   : > { %868 = vrot.lane.b32.xlu0 %v848_v35, %s3900_s12 }
 0x10f   : > { %v4278_v22 = vpop.permute.xlu1 %608  ;;  %v4280_v36 = vpop.permute.xlu2 %554 }
 0x110   : > { %v607_v39 = vpop.permute.xlu0 %606 }
 0x111   : > { %v621_v4 = vsel %vm620_vm3, %v607_v39, %v4278_v22  ;;  %v404_v39 = vmul.f32 %v4083_v12, %v4207_v62 }
 0x112   : > { %v634_v8 = vadd.f32 %v621_v4, %v578_v13 }
 0x115   : > { %750 = vrot.lane.b32.xlu1 %v728_v41, %s3898_s29  ;;  %809 = vrot.lane.b32.xlu2 %v788_v27, %s3899_s30  ;;  %v510_v27 = vsel %vm508_vm1, %v4268_v30, %v4266_v29 }
 0x116   : > { %748 = vrot.lane.b32.xlu0 %v727_v44, %s3898_s29 }
 0x117   : > { %v4290_v45 = vpop.permute.xlu1 %664  ;;  %v4292_v46 = vpop.permute.xlu2 %610 }
 0x118   : > { %v663_v48 = vpop.permute.xlu0 %662  ;;  %v622_v20 = vsel %vm620_vm3, %v4278_v22, %v4292_v46 }
 0x119   : > { %v677_v7 = vsel %vm676_vm4, %v663_v48, %v4290_v45  ;;  %v467_v48 = vadd.f32 %v454_v37, %v404_v39 }
 0x11a   : > { %v690_v11 = vadd.f32 %v677_v7, %v634_v8 }
 0x11d   : > { %870 = vrot.lane.b32.xlu1 %v849_v49, %s3900_s12  ;;  %872 = vrot.lane.b32.xlu2 %v850_v50, %s3900_s12  ;;  %v566_v49 = vsel %vm564_vm2, %v4245_v15, %v4280_v36  ;;  %v523_v50 = vadd.f32 %v510_v27, %v467_v48  ;;  %v406_v48 = vmul.f32 %v4161_v43, %v4207_v62 }
 0x11e   : > { %811 = vrot.lane.b32.xlu0 %v789_v51, %s3899_s30 }
 0x11f   : > { %v4300_v52 = vpop.permute.xlu1 %740  ;;  %v861_v53 = vpop.permute.xlu2 %860  ;;  %v579_v12 = vadd.f32 %v566_v49, %v523_v50 }
 0x120   : > { %v739_v55 = vpop.permute.xlu0 %738 }
 0x121   : > { %v755_v9 = vsel %vm754_vm5, %v739_v55, %v4300_v52 }
 0x122   : > { %v769_v16 = vadd.f32 %v755_v9, %v690_v11 }
 0x125   : > { %813 = vrot.lane.b32.xlu1 %v790_v56, %s3899_s30  ;;  %874 = vrot.lane.b32.xlu2 %v851_v57, %s3900_s12  ;;  %s3904_s30 = smov 8   ;;  %s3908_s12 = smov 84  }
 0x126   : > { %752 = vrot.lane.b32.xlu0 %v729_v59, %s3898_s29 }
 0x127   : > { %v802_v61 = vpop.permute.xlu1 %801  ;;  %v4316_v33 = vpop.permute.xlu2 %500 }
 0x128   : > { %v800_v38 = vpop.permute.xlu0 %799  ;;  %v511_v7 = vsel %vm508_vm1, %v4266_v29, %v4316_v33 }
 0x129   : > { %v816_v14 = vsel %vm815_vm6, %v800_v38, %v802_v61 }
 0x12a   : > { %v830_v19 = vadd.f32 %v816_v14, %v769_v16 }
 0x12f   : > { %v4322_v5 = vpop.permute.xlu1 %446  ;;  %v4330_v10 = vpop.permute.xlu2 %803 }
 0x130   : > { %v4324_v6 = vpop.permute.xlu0 %444  ;;  %v817_v59 = vsel %vm815_vm6, %v802_v61, %v4330_v10  ;;  %v405_v61 = vmul.f32 %v4121_v26, %v4207_v62 }
 0x131   : > { %v455_v1 = vsel %vm452_vm0, %v4256_v21, %v4324_v6 }
 0x132   : > { %v468_v13 = vadd.f32 %v455_v1, %v405_v61 }
 0x134   : > { %v524_v9 = vadd.f32 %v511_v7, %v468_v13 }
 0x137   : > { %v667_v18 = vpop.permute.xlu1 %666  ;;  %v4335_v17 = vpop.permute.xlu2 %448 }
 0x138   : > { %v863_v23 = vpop.permute.xlu0 %862  ;;  %v678_v51 = vsel %vm676_vm4, %v4290_v45, %v667_v18 }
 0x139   : > { %v877_v24 = vsel %vm876_vm7, %v861_v53, %v863_v23  ;;  %v635_v53 = vadd.f32 %v622_v20, %v579_v12 }
 0x13a   : > { %v891_v25 = vadd.f32 %v877_v24, %v830_v19 }
 0x13b   : > { %v691_v56 = vadd.f32 %v678_v51, %v635_v53 }
 0x13c   : > { %v904_v28 = vadd.f32 %v4223_v3, %v891_v25 }
 0x13e   : > { %v4337_v32 = vmax.f32 %v904_v28, 0.0 }
 0x13f   : > { %v743_v34 = vpop.permute.xlu1 %742  ;;  %v4346_v40 = vpop.permute.xlu2 %668 }
 0x140   : > { %v4339_v35 = vpop.permute.xlu0 %502  ;;  %v756_v30 = vsel %vm754_vm5, %v4300_v52, %v743_v34 }
 0x141   : > { %v770_v15 = vadd.f32 %v756_v30, %v691_v56 }
 0x143   : > { %v831_v22 = vadd.f32 %v817_v59, %v770_v15 }
 0x147   : > { %v4348_v41 = vpop.permute.xlu1 %558  ;;  %v4365_v57 = vpop.permute.xlu2 %506 }
 0x148   : > { %v557_v44 = vpop.permute.xlu0 %556 }
 0x149   : > { %v567_v8 = vsel %vm564_vm2, %v4280_v36, %v557_v44 }
 0x14a   : > { %v580_v26 = vadd.f32 %v567_v8, %v524_v9 }
 0x14f   : > { %v4361_v54 = vpop.permute.xlu1 %614  ;;  %v4372_v47 = vpop.permute.xlu2 %560 }
 0x150   : > { %v613_v55 = vpop.permute.xlu0 %612 }
 0x151   : > { %v623_v21 = vsel %vm620_vm3, %v4292_v46, %v613_v55  ;;  %v456_v46 = vsel %vm452_vm0, %v4324_v6, %v4322_v5  ;;  %v624_v6 = vsel %vm620_vm3, %v613_v55, %v4361_v54  ;;  %v407_v55 = vmul.f32 %v4158_v42, %v4207_v62 }
 0x152   : > { %v636_v19 = vadd.f32 %v623_v21, %v580_v26  ;;  %v469_v50 = vadd.f32 %v456_v46, %v406_v48  ;;  %v569_v42 = vsel %vm564_vm2, %v4348_v41, %v4372_v47 }
 0x157   : > { %v865_v60 = vpop.permute.xlu1 %864  ;;  %v4389_v11 = vpop.permute.xlu2 %807 }
 0x158   : > { %v878_v31 = vsel %vm876_vm7, %v863_v23, %v865_v60  ;;  %v4370_v38 = vpop.permute.xlu0 %450  ;;  %v679_v23 = vsel %vm676_vm4, %v667_v18, %v4346_v40 }
 0x159   : > { %v892_v45 = vadd.f32 %v878_v31, %v831_v22  ;;  %v692_v29 = vadd.f32 %v679_v23, %v636_v19  ;;  %v458_v8 = vsel %vm452_vm0, %v4335_v17, %v4370_v38 }
 0x15b   : > { %v905_v0 = vadd.f32 %v4223_v3, %v892_v45 }
 0x15d   : > { %v4375_v52 = vmax.f32 %v905_v0, 0.0 }
 0x15f   : > { %v505_v2 = vpop.permute.xlu1 %504  ;;  %1043 = vrot.lane.b32.xlu1 %v4375_v52, %s5519_s15  ;;  %v867_v25 = vpop.permute.xlu2 %866 }
 0x160   : > { %v671_v4 = vpop.permute.xlu0 %670  ;;  %v879_v18 = vsel %vm876_vm7, %v865_v60, %v867_v25  ;;  %v513_v31 = vsel %vm508_vm1, %v4339_v35, %v505_v2  ;;  %v514_v26 = vsel %vm508_vm1, %v505_v2, %v4365_v57 }
 0x167   : > { %v4393_v14 = vpop.permute.xlu1 %746  ;;  %v675_v60 = vpop.permute.xlu2 %674 }
 0x168   : > { %v745_v16 = vpop.permute.xlu0 %744 }
 0x169   : > { %v757_v24 = vsel %vm754_vm5, %v743_v34, %v745_v16  ;;  %v512_v34 = vsel %vm508_vm1, %v4316_v33, %v4339_v35  ;;  %v680_v33 = vsel %vm676_vm4, %v4346_v40, %v671_v4  ;;  %v758_v15 = vsel %vm754_vm5, %v745_v16, %v4393_v14 }
 0x16a   : > { %v771_v28 = vadd.f32 %v757_v24, %v692_v29  ;;  %v525_v12 = vadd.f32 %v512_v34, %v469_v50  ;;  %v408_v35 = vmul.f32 %v4199_v58, %v4207_v62 }
 0x16c   : > { %v471_v19 = vadd.f32 %v458_v8, %v408_v35 }
 0x16f   : > { %v806_v36 = vpop.permute.xlu1 %805  ;;  %v810_v23 = vpop.permute.xlu2 %809 }
 0x170   : > { %v818_v37 = vsel %vm815_vm6, %v4330_v10, %v806_v36  ;;  %v4400_v39 = vpop.permute.xlu0 %562  ;;  %v568_v10 = vsel %vm564_vm2, %v557_v44, %v4348_v41  ;;  %v457_v44 = vsel %vm452_vm0, %v4322_v5, %v4335_v17  ;;  %v819_v22 = vsel %vm815_vm6, %v806_v36, %v4389_v11 }
 0x171   : > { %v832_v27 = vadd.f32 %v818_v37, %v771_v28  ;;  %v581_v53 = vadd.f32 %v568_v10, %v525_v12  ;;  %v470_v45 = vadd.f32 %v457_v44, %v407_v55  ;;  %v570_v41 = vsel %vm564_vm2, %v4372_v47, %v4400_v39 }
 0x172   : > { %v409_v36 = vmul.f32 %v4213_v63, %v4207_v62  ;;  %v820_v34 = vsel %vm815_vm6, %v4389_v11, %v810_v23 }
 0x173   : > { %v893_v49 = vadd.f32 %v879_v18, %v832_v27  ;;  %v637_v56 = vadd.f32 %v624_v6, %v581_v53  ;;  %v526_v13 = vadd.f32 %v513_v31, %v470_v45 }
 0x174   : > { %v472_v27 = vadd.f32 %v4370_v38, %v409_v36 }
 0x175   : > { %v906_v20 = vadd.f32 %v4223_v3, %v893_v49  ;;  %v693_v59 = vadd.f32 %v680_v33, %v637_v56  ;;  %v582_v16 = vadd.f32 %v569_v42, %v526_v13 }
 0x177   : > { %v4416_v51 = vmax.f32 %v906_v20, 0.0  ;;  %v4418_v43 = vpop.permute.xlu1 %618  ;;  %v772_v40 = vadd.f32 %v758_v15, %v693_v59  ;;  %v873_v20 = vpop.permute.xlu2 %872 }
 0x178   : > { %v617_v30 = vpop.permute.xlu0 %616 }
 0x179   : > { %v833_v1 = vadd.f32 %v819_v22, %v772_v40  ;;  %v625_v9 = vsel %vm620_vm3, %v4361_v54, %v617_v30  ;;  %v626_v2 = vsel %vm620_vm3, %v617_v30, %v4418_v43  ;;  %vm1062_vm3 = vcmask 64512  }
 0x17a   : > { %v638_v58 = vadd.f32 %v625_v9, %v582_v16 }
 0x17f   : > { %v673_v0 = vpop.permute.xlu1 %672 }
 0x180   : > { %v869_v61 = vpop.permute.xlu0 %868  ;;  %v681_v17 = vsel %vm676_vm4, %v671_v4, %v673_v0  ;;  %v682_v47 = vsel %vm676_vm4, %v673_v0, %v675_v60 }
 0x181   : > { %v880_v7 = vsel %vm876_vm7, %v867_v25, %v869_v61  ;;  %v527_v25 = vadd.f32 %v514_v26, %v471_v19  ;;  %v694_v28 = vadd.f32 %v681_v17, %v638_v58 }
 0x182   : > { %v894_v5 = vadd.f32 %v880_v7, %v833_v1 }
 0x183   : > { %v583_v37 = vadd.f32 %v570_v41, %v527_v25 }
 0x184   : > { %v907_v21 = vadd.f32 %v4223_v3, %v894_v5 }
 0x185   : > { %v639_v48 = vadd.f32 %v626_v2, %v583_v37 }
 0x186   : > { %v4448_v24 = vmax.f32 %v907_v21, 0.0 }
 0x187   : > { %v751_v29 = vpop.permute.xlu1 %750  ;;  %v695_v49 = vadd.f32 %v682_v47, %v639_v48 }
 0x188   : > { %v749_v54 = vpop.permute.xlu0 %748  ;;  %1236 = vrot.lane.b32.xlu1 %v4448_v24, %s5519_s15 }
 0x189   : > { %v759_v4 = vsel %vm754_vm5, %v4393_v14, %v749_v54  ;;  %v760_v18 = vsel %vm754_vm5, %v749_v54, %v751_v29  ;;  %v528_v14 = vadd.f32 %v4365_v57, %v472_v27 }
 0x18a   : > { %v773_v46 = vadd.f32 %v759_v4, %v694_v28  ;;  %v774_v12 = vadd.f32 %v760_v18, %v695_v49 }
 0x18b   : > { %v584_v53 = vadd.f32 %v4400_v39, %v528_v14  ;;  %v875_v39 = vpop.permute.xlu2 %874 }
 0x18c   : > { %v834_v10 = vadd.f32 %v820_v34, %v773_v46  ;;  %v883_v1 = vsel %vm876_vm7, %v873_v20, %v875_v39 }
 0x18d   : > { %v640_v57 = vadd.f32 %v4418_v43, %v584_v53 }
 0x18f   : > { %v871_v50 = vpop.permute.xlu1 %870  ;;  %v696_v59 = vadd.f32 %v675_v60, %v640_v57 }
 0x190   : > { %v881_v62 = vsel %vm876_vm7, %v869_v61, %v871_v50  ;;  %v812_v63 = vpop.permute.xlu0 %811  ;;  %1329 = vrot.lane.b32.xlu1 %v4448_v24, %s5519_s15  ;;  %v882_v11 = vsel %vm876_vm7, %v871_v50, %v873_v20  ;;  %vm1090_vm7 = vcmask 515464  }
 0x191   : > { %v895_v38 = vadd.f32 %v881_v62, %v834_v10  ;;  %v821_v6 = vsel %vm815_vm6, %v810_v23, %v812_v63 }
 0x192   : > { %v835_v30 = vadd.f32 %v821_v6, %v774_v12 }
 0x193   : > { %v908_v33 = vadd.f32 %v4223_v3, %v895_v38 }
 0x194   : > { %v896_v56 = vadd.f32 %v882_v11, %v835_v30 }
 0x195   : > { %v4475_v15 = vmax.f32 %v908_v33, 0.0 }
 0x196   : > { %v909_v44 = vadd.f32 %v4223_v3, %v896_v56 }
 0x197   : > { %v814_v22 = vpop.permute.xlu1 %813 }
 0x198   : > { %v4478_v55 = vmax.f32 %v909_v44, 0.0  ;;  %v753_v31 = vpop.permute.xlu0 %752  ;;  %v822_v0 = vsel %vm815_vm6, %v812_v63, %v814_v22  ;;  %vm1035_vm6 = vcmask 384264  }
 0x199   : > { %v761_v40 = vsel %vm754_vm5, %v751_v29, %v753_v31  ;;  %vm993_vm5 = vcmask 253064  }
 0x19a   : > { %v775_v45 = vadd.f32 %v761_v40, %v696_v59  ;;  %1430 = vrot.lane.b32.xlu1 %v4478_v55, %s5519_s15 }
 0x19c   : > { %v836_v43 = vadd.f32 %v822_v0, %v775_v45 }
 0x19e   : > { %v897_v61 = vadd.f32 %v883_v1, %v836_v43 }
 0x1a0   : > { %v910_v13 = vadd.f32 %v4223_v3, %v897_v61 }
 0x1a2   : > { %v917_v60 = vmax.f32 %v910_v13, 0.0  ;;  %1519 = vrot.lane.b32.xlu1 %v4478_v55, %s5519_s15 }
 0x1a4   : > { %925 = vst.msk [vmem:[#allocation2 + $0x30] sm:$0xff] %vm924_vm8, %v917_v60  ;;  %vm1132_vm8 = vcmask 646664  }
 0x1aa   : > { %1234 = vrot.lane.b32.xlu1 %v4416_v51, %s5519_s15 }
 0x1ab   : > { %v4490_v7 = vld [vmem:[#allocation2 + $0x30] sm:$0xff] }
 0x1ac   : > { %1573 = vrot.lane.b32.xlu0 %v4490_v7, %s5519_s15  ;;  %1525 = vrot.lane.b32.xlu2 %v4490_v7, %s5519_s15 }
 0x1b4   : > { %1094 = vrot.lane.b32.xlu2 %v4375_v52, %s5519_s15  ;;  %997 = vrot.lane.b32.xlu0 %v4337_v32, %s5519_s15 }
 0x1bc   : > { %1190 = vrot.lane.b32.xlu2 %v4416_v51, %s5519_s15  ;;  %1140 = vrot.lane.b32.xlu0 %v4416_v51, %s5519_s15 }
 0x1c4   : > { %1335 = vrot.lane.b32.xlu2 %v4475_v15, %s5519_s15  ;;  %1287 = vrot.lane.b32.xlu0 %v4448_v24, %s5519_s15 }
 0x1cc   : > { %1383 = vrot.lane.b32.xlu2 %v4475_v15, %s5519_s15  ;;  %1424 = vrot.lane.b32.xlu0 %v4475_v15, %s5519_s15 }
 0x1d1   : > { %v4520_v3 = vpop.permute.xlu1 %1043 }
 0x1d2   : > { %v1049_v36 = vmax.f32 %v4375_v52, %v4520_v3 }
 0x1d4   : > { %1041 = vrot.lane.b32.xlu2 %v4337_v32, %s5519_s15  ;;  %1478 = vrot.lane.b32.xlu0 %v4478_v55, %s5519_s15 }
 0x1dc   : > { %952 = vrot.lane.b32.xlu0 %v4337_v32, %s5519_s15 }
 0x1e4   : > { %1138 = vrot.lane.b32.xlu0 %v4375_v52, %s5519_s15 }
 0x1fa   : > { %v1237_v5 = vpop.permute.xlu1 %1236 }
 0x1fb   : > { %v4523_v8 = vmax.f32 %v4448_v24, %v1237_v5 }
 0x1fd   : > { %1244 = vrot.lane.b32.xlu0 %v4523_v8, %s3894_s16 }
 0x202   : > { %v4527_v42 = vpop.permute.xlu1 %1329 }
 0x206   : > { %v1526_v35 = vpop.permute.xlu2 %1525 }
 0x207   : > { %v1531_v20 = vmax.f32 %v4490_v7, %v1526_v35 }
 0x20c   : > { %v1431_v9 = vpop.permute.xlu1 %1430 }
 0x20d   : > { %v1436_v21 = vmax.f32 %v4478_v55, %v1431_v9 }
 0x20e   : > { %v1095_v26 = vpop.permute.xlu2 %1094 }
 0x20f   : > { %v1097_v16 = vmax.f32 %v4375_v52, %v1095_v26  ;;  %1441 = vrot.lane.b32.xlu0 %v1436_v21, %s3894_s16  ;;  %v3905_v26 = vmov 0.0  }
 0x210   : > { %946 = vst [vmem:[#allocation3] sm:$0xff] %v3905_v26 }
 0x211   : > { %1099 = vrot.lane.b32.xlu2 %v1097_v16, %s3894_s16  ;;  %947 = vst [vmem:[#allocation3 + $0x8] sm:$0xff] %v3905_v26 }
 0x212   : > { %949 = vst.msk [vmem:[#allocation3 + $0x10] sm:$0xff] %vm948_vm15, %v3905_v26 }
 0x214   : > { %v4536_v29 = vpop.permute.xlu1 %1519 }
 0x215   : > { %v1527_v25 = vsel %vm452_vm0, %v4536_v29, %v1526_v35 }
 0x216   : > { %v1191_v19 = vpop.permute.xlu2 %1190  ;;  %v1530_v28 = vmax.f32 %v4478_v55, %v1527_v25  ;;  %v3906_v25 = vmov 1.0  }
 0x217   : > { %v4557_v46 = vmax.f32 %v4416_v51, %v1191_v19 }
 0x21c   : > { %v1235_v11 = vpop.permute.xlu1 %1234 }
 0x21d   : > { %v1238_v57 = vsel %vm452_vm0, %v1235_v11, %v1237_v5 }
 0x21e   : > { %v1574_v23 = vpop.permute.xlu0 %1573  ;;  %v1336_v17 = vpop.permute.xlu2 %1335  ;;  %v1241_v44 = vmax.f32 %v4416_v51, %v1238_v57 }
 0x21f   : > { %v1337_v41 = vsel %vm452_vm0, %v4527_v42, %v1336_v17  ;;  %v1341_v18 = vmax.f32 %v4475_v15, %v1336_v17  ;;  %v4584_v63 = vmax.f32 %v4490_v7, %v1574_v23 }
 0x220   : > { %v1340_v58 = vmax.f32 %v4448_v24, %v1337_v41 }
 0x222   : > { %1344 = vrot.lane.b32.xlu0 %v1340_v58, %s3894_s16 }
 0x226   : > { %v998_v54 = vpop.permute.xlu0 %997  ;;  %v1384_v34 = vpop.permute.xlu2 %1383 }
 0x227   : > { %v1000_v2 = vmax.f32 %v4337_v32, %v998_v54  ;;  %v4568_v50 = vmax.f32 %v4475_v15, %v1384_v34 }
 0x229   : > { %1002 = vrot.lane.b32.xlu1 %v1000_v2, %s3894_s16 }
 0x22a   : > { %1534 = vrot.lane.b32.xlu0 %v1530_v28, %s3894_s16 }
 0x22e   : > { %v4545_v4 = vpop.permute.xlu0 %1140  ;;  %v1042_v6 = vpop.permute.xlu2 %1041 }
 0x22f   : > { %v4551_v37 = vmax.f32 %v4416_v51, %v4545_v4  ;;  %v1045_v0 = vsel %vm452_vm0, %v1042_v6, %v4520_v3  ;;  %v926_v51 = vlaneseq }
 0x230   : > { %v1048_v43 = vmax.f32 %v4337_v32, %v1045_v0 }
 0x231   : > { %1051 = vrot.lane.b32.xlu1 %v1049_v36, %s3894_s16  ;;  %1148 = vrot.lane.b32.xlu2 %v4551_v37, %s3894_s16  ;;  %v927_v60 = vshrl.u32 %v926_v51, 7  ;;  %v932_v7 = vand.u32 127, %v926_v51 }
 0x233   : > { %v930_v5 = vadd.s32 24, %v927_v60  ;;  %v929_v21 = vadd.s32 16, %v927_v60 }
 0x236   : > { %v1288_v47 = vpop.permute.xlu0 %1287 }
 0x237   : > { %v1290_v27 = vmax.f32 %v4448_v24, %v1288_v47 }
 0x239   : > { %1195 = vrot.lane.b32.xlu1 %v4557_v46, %s3894_s16  ;;  %1292 = vrot.lane.b32.xlu2 %v1290_v27, %s3894_s16 }
 0x23e   : > { %v4563_v48 = vpop.permute.xlu0 %1424 }
 0x23f   : > { %v1432_v14 = vsel %vm452_vm0, %v4563_v48, %v1431_v9  ;;  %v933_v9 = vmul.u32 2, %v932_v7 }
 0x240   : > { %v1435_v12 = vmax.f32 %v4475_v15, %v1432_v14 }
 0x241   : > { %1346 = vrot.lane.b32.xlu1 %v1341_v18, %s3894_s16  ;;  %vm937_vm10 = vcmp.eq.s32.totalorder %v930_v5, %v933_v9  ;;  %vm4611_vm11 = vcmp.eq.s32.totalorder %v929_v21, %v933_v9  ;;  %vm4636_vm13 = vcmp.eq.s32.totalorder %v927_v60, %v933_v9  ;;  %v1332_v18 = vmax.f32 %v4448_v24, %v4527_v42 }
 0x242   : > { %v1522_v42 = vmax.f32 %v4478_v55, %v4536_v29 }
 0x246   : > { %v1479_v49 = vpop.permute.xlu0 %1478 }
 0x247   : > { %v4571_v10 = vmax.f32 %v4478_v55, %v1479_v49 }
 0x249   : > { %1388 = vrot.lane.b32.xlu1 %v4568_v50, %s3894_s16  ;;  %1483 = vrot.lane.b32.xlu2 %v4571_v10, %s3894_s16 }
 0x24e   : > { %v953_v62 = vpop.permute.xlu0 %952 }
 0x24f   : > { %v4587_v38 = vmax.f32 %v4337_v32, %v953_v62  ;;  %v928_v32 = vadd.s32 8, %v927_v60 }
 0x251   : > { %1536 = vrot.lane.b32.xlu1 %v1531_v20, %s3894_s16  ;;  %1439 = vrot.lane.b32.xlu2 %v1435_v12, %s3894_s16  ;;  %vm4622_vm12 = vcmp.eq.s32.totalorder %v928_v32, %v933_v9 }
 0x256   : > { %v1139_v53 = vpop.permute.xlu0 %1138 }
 0x257   : > { %v1142_v35 = vsel %vm452_vm0, %v1139_v53, %v4545_v4 }
 0x258   : > { %v1145_v3 = vmax.f32 %v4375_v52, %v1142_v35 }
 0x259   : > { %1578 = vrot.lane.b32.xlu2 %v4584_v63, %s3894_s16  ;;  %957 = vrot.lane.b32.xlu1 %v4587_v38, %s3894_s16  ;;  %s3903_s16 = smov 92  }
 0x26b   : > { %v1100_v30 = vpop.permute.xlu2 %1099 }
 0x26c   : > { %v1102_v33 = vmax.f32 %v1097_v16, %v1100_v30  ;;  %v4609_v16 = vsel %vm937_vm10, 1.0, %v3905_v26  ;;  %vm1325_vm10 = vcmask 121864  }
 0x26d   : > { %3413 = vmatpush.msk.msra.mxu0 %vm965_vm9, %v4609_v16  ;;  %3428 = vmatpush.msk.msra.mxu3 %vm965_vm9, %v4609_v16 }
 0x26e   : > { %1104 = vrot.lane.b32.xlu1 %v1102_v33, %s3901_s13  ;;  %3418 = vmatpush.msk.msra.mxu1 %vm965_vm9, %v4609_v16  ;;  %s3909_s13 = smov 100  }
 0x26f   : > { %v4594_v56 = vpop.permute.xlu0 %1244  ;;  %3443 = vmatpush.msk.msra.mxu2 %vm965_vm9, %v4609_v16  ;;  %3414 = vmatpush.msk.msra.mxu0 %vm4611_vm11, %v3906_v25 }
 0x270   : > { %v1247_v59 = vmax.f32 %v1241_v44, %v4594_v56  ;;  %3429 = vmatpush.msk.msra.mxu3 %vm4611_vm11, %v3906_v25  ;;  %3419 = vmatpush.msk.msra.mxu1 %vm4611_vm11, %v3906_v25  ;;  %v1248_v4 = vmax.f32 %v4523_v8, %v4594_v56 }
 0x271   : > { %3415 = vmatpush.msk.msra.mxu0 %vm4622_vm12, %v3906_v25  ;;  %3444 = vmatpush.msk.msra.mxu2 %vm4611_vm11, %v3906_v25 }
 0x272   : > { %3430 = vmatpush.msk.msra.mxu3 %vm4622_vm12, %v3906_v25  ;;  %3420 = vmatpush.msk.msra.mxu1 %vm4622_vm12, %v3906_v25 }
 0x273   : > { %3416 = vmatpush.msk.msra.mxu0 %vm4636_vm13, %v3906_v25  ;;  %3445 = vmatpush.msk.msra.mxu2 %vm4622_vm12, %v3906_v25 }
 0x274   : > { %3431 = vmatpush.msk.msra.mxu3 %vm4636_vm13, %v3906_v25  ;;  %3421 = vmatpush.msk.msra.mxu1 %vm4636_vm13, %v3906_v25 }
 0x275   : > { %3433 = vmatpush.msk.msrb.mxu0 %vm965_vm9, %v4609_v16  ;;  %3446 = vmatpush.msk.msra.mxu2 %vm4636_vm13, %v3906_v25 }
 0x276   : > { %1251 = vrot.lane.b32.xlu1 %v1247_v59, %s3902_s14  ;;  %3448 = vmatpush.msk.msrb.mxu3 %vm965_vm9, %v4609_v16 }
 0x277   : > { %3423 = vmatpush.msk.msrb.mxu1 %vm965_vm9, %v4609_v16  ;;  %3434 = vmatpush.msk.msrb.mxu0 %vm4611_vm11, %v3906_v25 }
 0x278   : > { %3449 = vmatpush.msk.msrb.mxu3 %vm4611_vm11, %v3906_v25  ;;  %3463 = vmatpush.msk.msrb.mxu2 %vm965_vm9, %v4609_v16 }
 0x279   : > { %3424 = vmatpush.msk.msrb.mxu1 %vm4611_vm11, %v3906_v25  ;;  %3435 = vmatpush.msk.msrb.mxu0 %vm4622_vm12, %v3906_v25 }
 0x27a   : > { %3450 = vmatpush.msk.msrb.mxu3 %vm4622_vm12, %v3906_v25  ;;  %3464 = vmatpush.msk.msrb.mxu2 %vm4611_vm11, %v3906_v25 }
 0x27b   : > { %3425 = vmatpush.msk.msrb.mxu1 %vm4622_vm12, %v3906_v25  ;;  %3436 = vmatpush.msk.msrb.mxu0 %vm4636_vm13, %v3906_v25 }
 0x27c   : > { %3451 = vmatpush.msk.msrb.mxu3 %vm4636_vm13, %v3906_v25  ;;  %3465 = vmatpush.msk.msrb.mxu2 %vm4622_vm12, %v3906_v25 }
 0x27d   : > { %3426 = vmatpush.msk.msrb.mxu1 %vm4636_vm13, %v3906_v25 }
 0x27e   : > { %3466 = vmatpush.msk.msrb.mxu2 %vm4636_vm13, %v3906_v25 }
 0x28b   : > { %v1149_v22 = vpop.permute.xlu2 %1148 }
 0x28c   : > { %v1151_v17 = vmax.f32 %v1145_v3, %v1149_v22  ;;  %v1152_v41 = vmax.f32 %v4551_v37, %v1149_v22 }
 0x293   : > { %v1293_v31 = vpop.permute.xlu2 %1292 }
 0x294   : > { %v1295_v40 = vmax.f32 %v1290_v27, %v1293_v31 }
 0x296   : > { %1297 = vrot.lane.b32.xlu1 %v1295_v40, %s3903_s16  ;;  %s5515_s16 = smov 32  }
 0x29b   : > { %v1003_v39 = vpop.permute.xlu1 %1002 }
 0x29c   : > { %v1005_v45 = vmax.f32 %v1000_v2, %v1003_v39  ;;  %v1442_v2 = vpop.permute.xlu0 %1441 }
 0x29e   : > { %1007 = vrot.lane.b32.xlu0 %v1005_v45, %s3898_s29  ;;  %s3907_s29 = smov 16  }
 0x2a3   : > { %v1052_v1 = vpop.permute.xlu1 %1051  ;;  %v4620_v58 = vpop.permute.xlu2 %1483 }
 0x2a4   : > { %v1054_v61 = vmax.f32 %v1048_v43, %v1052_v1  ;;  %v1055_v13 = vmax.f32 %v1049_v36, %v1052_v1  ;;  %v1345_v8 = vpop.permute.xlu0 %1344  ;;  %v1486_v62 = vmax.f32 %v4571_v10, %v4620_v58 }
 0x2a6   : > { %1058 = vrot.lane.b32.xlu2 %v1054_v61, %s3904_s30  ;;  %1060 = vrot.lane.b32.xlu0 %v1055_v13, %s3904_s30  ;;  %s3912_s30 = smov 116  }
 0x2ab   : > { %v1196_v23 = vpop.permute.xlu1 %1195  ;;  %v1440_v37 = vpop.permute.xlu2 %1439 }
 0x2ac   : > { %v1198_v36 = vmax.f32 %v4557_v46, %v1196_v23  ;;  %v1443_v47 = vsel %vm564_vm2, %v1440_v37, %v1442_v2  ;;  %v1427_v46 = vmax.f32 %v4475_v15, %v4563_v48 }
 0x2ae   : > { %1157 = vrot.lane.b32.xlu0 %v1152_v41, %s3907_s29  ;;  %1155 = vrot.lane.b32.xlu2 %v1151_v17, %s3907_s29  ;;  %v1445_v49 = vmax.f32 %v1427_v46, %v1443_v47  ;;  %s3913_s29 = smov 108  }
 0x2b3   : > { %v1347_v28 = vpop.permute.xlu1 %1346  ;;  %v1579_v24 = vpop.permute.xlu2 %1578 }
 0x2b4   : > { %v1348_v27 = vsel %vm564_vm2, %v1345_v8, %v1347_v28  ;;  %v1581_v20 = vmax.f32 %v4584_v63, %v1579_v24  ;;  %v2067_v24 = vld [vmem:[#allocation3 + $0x10] sm:$0xff] }
 0x2b5   : > { %v1350_v48 = vmax.f32 %v1332_v18, %v1348_v27 }
 0x2b6   : > { %1200 = vrot.lane.b32.xlu0 %v1198_v36, %s3908_s12  ;;  %1253 = vrot.lane.b32.xlu2 %v1248_v4, %s3902_s14  ;;  %s3910_s14 = smov 40   ;;  %s3914_s12 = smov 48  }
 0x2bb   : > { %v1389_v34 = vpop.permute.xlu1 %1388 }
 0x2bc   : > { %v1391_v15 = vmax.f32 %v4568_v50, %v1389_v34  ;;  %v1535_v50 = vpop.permute.xlu0 %1534 }
 0x2be   : > { %1393 = vrot.lane.b32.xlu1 %v1391_v15, %s3909_s13  ;;  %1447 = vrot.lane.b32.xlu0 %v1445_v49, %s3910_s14  ;;  %s3915_s13 = smov 17   ;;  %s3916_s14 = smov 65  }
 0x2bf   : > { %1352 = vrot.lane.b32.xlu2 %v1350_v48, %s5515_s16  ;;  %s3920_s16 = smov 81  }
 0x2c3   : > { %v1537_v14 = vpop.permute.xlu1 %1536 }
 0x2c4   : > { %v1538_v12 = vsel %vm564_vm2, %v1535_v50, %v1537_v14  ;;  %vm1255_vm2 = vcmask 195584   ;;  %v2211_v50 = vld [vmem:[%s5507_s4] sm:$0xff] }
 0x2c5   : > { %v1540_v6 = vmax.f32 %v1522_v42, %v1538_v12  ;;  %v2212_v42 = vld [vmem:[%s5507_s4 + $0x8] sm:$0xff]  ;;  %v1614_v14 = vld [vmem:[%s5506_s3] sm:$0xff] }
 0x2c6   : > { %1583 = vrot.lane.b32.xlu1 %v1581_v20, %s3912_s30  ;;  %s3917_s30 = smov 33   ;;  %v1615_v20 = vld [vmem:[%s5506_s3 + $0x8] sm:$0xff] }
 0x2c7   : > { %1488 = vrot.lane.b32.xlu2 %v1486_v62, %s3913_s29  ;;  %1542 = vrot.lane.b32.xlu0 %v1540_v6, %s3914_s12  ;;  %s3918_s29 = smov 49   ;;  %s3919_s12 = smov 1  }
 0x2cb   : > { %v958_v53 = vpop.permute.xlu1 %957 }
 0x2cc   : > { %v960_v55 = vmax.f32 %v4587_v38, %v958_v53 }
 0x2ce   : > { %3417 = vmatmul.msk.f32.vlgmr.msra.gmra.mxu0 %vm961_vm14, %v960_v55 }
 0x2cf   : > { %3453 = vmatpush.msk.msra.mxu0 %vm965_vm9, %v4609_v16 }
 0x2d1   : > { %3454 = vmatpush.msk.msra.mxu0 %vm4611_vm11, %v3906_v25 }
 0x2d3   : > { %3455 = vmatpush.msk.msra.mxu0 %vm4622_vm12, %v3906_v25 }
 0x2d5   : > { %3456 = vmatpush.msk.msra.mxu0 %vm4636_vm13, %v3906_v25 }
 0x2e0   : > { %v1105_v29 = vpop.permute.xlu1 %1104 }
 0x2e1   : > { %3432 = vmatmul.msk.f32.vlgmr.msra.gmra.mxu3 %vm961_vm14, %v1105_v29 }
 0x2e2   : > { %3468 = vmatpush.msk.msra.mxu3 %vm965_vm9, %v4609_v16 }
 0x2e4   : > { %3469 = vmatpush.msk.msra.mxu3 %vm4611_vm11, %v3906_v25 }
 0x2e6   : > { %3470 = vmatpush.msk.msra.mxu3 %vm4622_vm12, %v3906_v25 }
 0x2e8   : > { %3471 = vmatpush.msk.msra.mxu3 %vm4636_vm13, %v3906_v25  ;;  %v1252_v10 = vpop.permute.xlu1 %1251 }
 0x300   : > { %v1059_v63 = vpop.permute.xlu2 %1058 }
 0x308   : > { %v1156_v38 = vpop.permute.xlu2 %1155  ;;  %v1298_v30 = vpop.permute.xlu1 %1297 }
 0x309   : > { %3452 = vmatmul.msk.f32.vlgmr.msrb.gmra.mxu3 %vm961_vm14, %v1298_v30 }
 0x310   : > { %v1254_v11 = vpop.permute.xlu2 %1253  ;;  %v1008_v33 = vpop.permute.xlu0 %1007 }
 0x311   : > { %3422 = vmatmul.msk.f32.vlgmr.msra.gmra.mxu1 %vm961_vm14, %v1008_v33  ;;  %v1256_v57 = vsel %vm1255_vm2, %v1252_v10, %v1254_v11  ;;  %vm1805_vm2 = vcmask 916480  }
 0x312   : > { %3447 = vmatmul.msk.f32.vlgmr.msra.gmra.mxu2 %vm961_vm14, %v1256_v57  ;;  %3438 = vmatpush.msk.msra.mxu1 %vm965_vm9, %v4609_v16 }
 0x314   : > { %3439 = vmatpush.msk.msra.mxu1 %vm4611_vm11, %v3906_v25 }
 0x316   : > { %3440 = vmatpush.msk.msra.mxu1 %vm4622_vm12, %v3906_v25 }
 0x318   : > { %v1061_v56 = vpop.permute.xlu0 %1060  ;;  %3441 = vmatpush.msk.msra.mxu1 %vm4636_vm13, %v3906_v25 }
 0x319   : > { %v1353_v44 = vpop.permute.xlu2 %1352  ;;  %v1063_v59 = vsel %vm1062_vm3, %v1059_v63, %v1061_v56 }
 0x31a   : > { %3427 = vmatmul.msk.f32.vlgmr.msrb.gmra.mxu1 %vm961_vm14, %v1063_v59 }
 0x31b   : > { %3458 = vmatpush.msk.msrb.mxu1 %vm965_vm9, %v4609_v16 }
 0x31d   : > { %3459 = vmatpush.msk.msrb.mxu1 %vm4611_vm11, %v3906_v25 }
 0x31f   : > { %3460 = vmatpush.msk.msrb.mxu1 %vm4622_vm12, %v3906_v25 }
 0x320   : > { %v1158_v22 = vpop.permute.xlu0 %1157 }
 0x321   : > { %v1489_v31 = vpop.permute.xlu2 %1488  ;;  %v1159_v40 = vsel %vm948_vm15, %v1156_v38, %v1158_v22  ;;  %3461 = vmatpush.msk.msrb.mxu1 %vm4636_vm13, %v3906_v25  ;;  %v3483_v38 = vld [vmem:[%s5506_s3 + $0x10] sm:$0xff]  ;;  %vm1872_vm15 = vcmask 908288  }
 0x322   : > { %3472 = vmatmul.msk.f32.vlgmr.msra.gmra.mxu3 %vm961_vm14, %v1489_v31  ;;  %3437 = vmatmul.msk.f32.vlgmr.msrb.gmra.mxu0 %vm961_vm14, %v1159_v40 }
 0x323   : > { %3473 = vmatpush.msk.msrb.mxu0 %vm965_vm9, %v4609_v16 }
 0x325   : > { %3474 = vmatpush.msk.msrb.mxu0 %vm4611_vm11, %v3906_v25 }
 0x327   : > { %3475 = vmatpush.msk.msrb.mxu0 %vm4622_vm12, %v3906_v25 }
 0x328   : > { %v1201_v39 = vpop.permute.xlu0 %1200 }
 0x329   : > { %3442 = vmatmul.msk.f32.vlgmr.msra.gmra.mxu1 %vm961_vm14, %v1201_v39  ;;  %3476 = vmatpush.msk.msrb.mxu0 %vm4636_vm13, %v3906_v25 }
 0x32a   : > { %3457 = vmatmul.msk.f32.vlgmr.msra.gmra.mxu0 %vm961_vm14, %v1353_v44  ;;  %3478 = vmatpush.msk.msra.mxu1 %vm965_vm9, %v4609_v16  ;;  %vm1186_vm9 = vcmask 777864  }
 0x32c   : > { %3479 = vmatpush.msk.msra.mxu1 %vm4611_vm11, %v3906_v25  ;;  %vm1228_vm11 = vcmask 909064  }
 0x32e   : > { %3480 = vmatpush.msk.msra.mxu1 %vm4622_vm12, %v3906_v25 }
 0x330   : > { %v1394_v45 = vpop.permute.xlu1 %1393  ;;  %v1448_v0 = vpop.permute.xlu0 %1447  ;;  %3481 = vmatpush.msk.msra.mxu1 %vm4636_vm13, %v3906_v25 }
 0x331   : > { %3462 = vmatmul.msk.f32.vlgmr.msrb.gmra.mxu1 %vm961_vm14, %v1394_v45  ;;  %3467 = vmatmul.msk.f32.vlgmr.msrb.gmra.mxu2 %vm961_vm14, %v1448_v0  ;;  %v3484_v0 = vld [vmem:[%s5506_s3 + $0x18] sm:$0xff] }
 0x338   : > { %v1584_v43 = vpop.permute.xlu1 %1583 }
 0x339   : > { %3482 = vmatmul.msk.f32.vlgmr.msra.gmra.mxu1 %vm961_vm14, %v1584_v43  ;;  %v1543_v51 = vpop.permute.xlu0 %1542 }
 0x33a   : > { %3477 = vmatmul.msk.f32.vlgmr.msrb.gmra.mxu0 %vm961_vm14, %v1543_v51  ;;  %vm1283_vm14 = vcmask 1040264  }
 0x34b   : > { %v986_v1 = vpop.f32.mrf.mxu0 }
 0x34c   : > { %990 = vrot.lane.b32.xlu2 %v986_v1, %s3915_s13 }
 0x364   : > { %v1125_v61 = vpop.f32.mrf.mxu3 }
 0x365   : > { %1129 = vrot.lane.b32.xlu2 %v1125_v61, %s3916_s14 }
 0x38c   : > { %v1318_v7 = vpop.f32.mrf.mxu3 }
 0x38e   : > { %v1028_v13 = vpop.f32.mrf.mxu1 }
 0x38f   : > { %1032 = vrot.lane.b32.xlu1 %v1028_v13, %s3917_s30  ;;  %v3499_v13 = vld [vmem:[%s5506_s3 + $0x30] sm:$0xff] }
 0x395   : > { %v1276_v32 = vpop.f32.mrf.mxu2 }
 0x397   : > { %v1083_v60 = vpop.f32.mrf.mxu1 }
 0x398   : > { %1087 = vrot.lane.b32.xlu0 %v1083_v60, %s3918_s29 }
 0x39f   : > { %v1179_v5 = vpop.f32.mrf.mxu0 }
 0x3a0   : > { %1322 = vrot.lane.b32.xlu0 %v1318_v7, %s3919_s12  ;;  %1183 = vrot.lane.b32.xlu1 %v1179_v5, %s3920_s16  ;;  %s3933_s12 = smov 28  }
 0x3a5   : > { %v1509_v16 = vpop.f32.mrf.mxu3 }
 0x3a6   : > { %v991_v35 = vpop.permute.xlu2 %990  ;;  %v1221_v9 = vpop.f32.mrf.mxu1 }
 0x3a7   : > { %994 = vst.msk [vmem:[#allocation3] sm:$0xff] %vm993_vm5, %v991_v35  ;;  %v1373_v21 = vpop.f32.mrf.mxu0 }
 0x3a8   : > { %1377 = vrot.lane.b32.xlu2 %v1373_v21, %s3915_s13  ;;  %s5521_s13 = smov 112   ;;  %v3500_v21 = vld [vmem:[%s5506_s3 + $0x38] sm:$0xff] }
 0x3ae   : > { %v1414_v3 = vpop.f32.mrf.mxu1 }
 0x3af   : > { %1418 = vrot.lane.b32.xlu1 %v1414_v3, %s3917_s30  ;;  %s3926_s30 = smov 95  }
 0x3b0   : > { %1513 = vrot.lane.b32.xlu2 %v1509_v16, %s3916_s14  ;;  %s3925_s14 = smov 94  }
 0x3b4   : > { %v1468_v19 = vpop.f32.mrf.mxu2 }
 0x3b5   : > { %1472 = vrot.lane.b32.xlu0 %v1468_v19, %s3918_s29  ;;  %v3494_v19 = vld [vmem:[%s5506_s3 + $0x28] sm:$0xff]  ;;  %s3932_s29 = smov 35  }
 0x3b6   : > { %v1604_v17 = vpop.f32.mrf.mxu1 }
 0x3b7   : > { %v1563_v23 = vpop.f32.mrf.mxu0 }
 0x3b8   : > { %1280 = vrot.lane.b32.xlu2 %v1276_v32, %s3921_s25  ;;  %1567 = vrot.lane.b32.xlu1 %v1563_v23, %s3920_s16  ;;  %s3923_s25 = smov 110   ;;  %s5535_s16 = smov 96   ;;  %v3511_v23 = vld [vmem:[%s5506_s3 + $0x50] sm:$0xff] }
 0x3bd   : > { %1225 = vrot.lane.b32.xlu0 %v1221_v9, %s3896_s24  ;;  %v3493_v9 = vld [vmem:[%s5506_s3 + $0x20] sm:$0xff] }
 0x3bf   : > { %v1130_v2 = vpop.permute.xlu2 %1129 }
 0x3c5   : > { %1608 = vrot.lane.b32.xlu0 %v1604_v17, %s3896_s24  ;;  %s3922_s24 = smov 111  }
 0x401   : > { %v1033_v41 = vpop.permute.xlu1 %1032 }
 0x402   : > { %1036 = vst.msk [vmem:[#allocation3] sm:$0xff] %vm1035_vm6, %v1033_v41  ;;  %v1378_v36 = vpop.permute.xlu2 %1377 }
 0x40a   : > { %v1088_v58 = vpop.permute.xlu0 %1087  ;;  %v1514_v8 = vpop.permute.xlu2 %1513 }
 0x40b   : > { %1091 = vst.msk [vmem:[#allocation3] sm:$0xff] %vm1090_vm7, %v1088_v58  ;;  %v3505_v58 = vld [vmem:[%s5506_s3 + $0x40] sm:$0xff] }
 0x40c   : > { %1133 = vst.msk [vmem:[#allocation3] sm:$0xff] %vm1132_vm8, %v1130_v2 }
 0x412   : > { %v1184_v28 = vpop.permute.xlu1 %1183  ;;  %v1323_v4 = vpop.permute.xlu0 %1322 }
 0x413   : > { %1187 = vst.msk [vmem:[#allocation3] sm:$0xff] %vm1186_vm9, %v1184_v28  ;;  %v1281_v18 = vpop.permute.xlu2 %1280  ;;  %v3512_v28 = vld [vmem:[%s5506_s3 + $0x58] sm:$0xff] }
 0x414   : > { %1326 = vst.msk [vmem:[#allocation3 + $0x8] sm:$0xff] %vm1325_vm10, %v1323_v4  ;;  %vm2617_vm10 = vcmask 343320  }
 0x415   : > { %1380 = vst.msk [vmem:[#allocation3 + $0x8] sm:$0xff] %vm993_vm5, %v1378_v36  ;;  %vm2150_vm5 = vcmask 769024  }
 0x421   : > { %v1419_v37 = vpop.permute.xlu1 %1418 }
 0x422   : > { %1421 = vst.msk [vmem:[#allocation3 + $0x8] sm:$0xff] %vm1035_vm6, %v1419_v37  ;;  %v3506_v37 = vld [vmem:[%s5506_s3 + $0x48] sm:$0xff]  ;;  %vm2357_vm6 = vcmask 113720  }
 0x427   : > { %v1473_v47 = vpop.permute.xlu0 %1472 }
 0x428   : > { %1475 = vst.msk [vmem:[#allocation3 + $0x8] sm:$0xff] %vm1090_vm7, %v1473_v47  ;;  %v3517_v47 = vld [vmem:[%s5506_s3 + $0x60] sm:$0xff]  ;;  %vm2423_vm7 = vcmask 171120  }
 0x429   : > { %1516 = vst.msk [vmem:[#allocation3 + $0x8] sm:$0xff] %vm1132_vm8, %v1514_v8  ;;  %v3523_v8 = vld [vmem:[%s5506_s3 + $0x70] sm:$0xff]  ;;  %vm2489_vm8 = vcmask 228520  }
 0x42a   : > { %v1568_v46 = vpop.permute.xlu1 %1567 }
 0x42b   : > { %1570 = vst.msk [vmem:[#allocation3 + $0x8] sm:$0xff] %vm1186_vm9, %v1568_v46  ;;  %v3524_v46 = vld [vmem:[%s5506_s3 + $0x78] sm:$0xff]  ;;  %vm2551_vm9 = vcmask 285920  }
 0x42f   : > { %v1226_v27 = vpop.permute.xlu0 %1225 }
 0x430   : > { %1229 = vst.msk [vmem:[#allocation3] sm:$0xff] %vm1228_vm11, %v1226_v27  ;;  %v3518_v27 = vld [vmem:[%s5506_s3 + $0x68] sm:$0xff] }
 0x431   : > { %1284 = vst.msk [vmem:[#allocation3] sm:$0xff] %vm1283_vm14, %v1281_v18  ;;  %v3529_v18 = vld [vmem:[%s5506_s3 + $0x80] sm:$0xff]  ;;  %vm2703_vm14 = vcmask 400384  }
 0x437   : > { %v1609_v34 = vpop.permute.xlu0 %1608 }
 0x438   : > { %1611 = vst.msk [vmem:[#allocation3 + $0x8] sm:$0xff] %vm1228_vm11, %v1609_v34  ;;  %v1612_v49 = vld [vmem:[#allocation3] sm:$0xff]  ;;  %v3530_v34 = vld [vmem:[%s5506_s3 + $0x88] sm:$0xff]  ;;  %vm2683_vm11 = vcmask 400720  }
 0x439   : > { %1701 = vmatpush.msra.mxu0 %v1612_v49 }
 0x43a   : > { %3489 = vmatmul.msk.f32.vlgmr.msra.gmra.mxu0 %vm1062_vm3, %v1614_v14 }
 0x43f   : > { %v1613_v15 = vld [vmem:[#allocation3 + $0x8] sm:$0xff] }
 0x440   : > { %1724 = vmatpush.msrb.mxu1 %v1613_v15  ;;  %v3798_v48 = vpack.i.bf16 %v1613_v15, %v1612_v49 }
 0x441   : > { %3491 = vmatmul.msk.f32.vlgmr.msrb.gmra.mxu1 %vm1062_vm3, %v1614_v14 }
 0x442   : > { %3799 = vrot.lane.b32.xlu0 %v3798_v48, %s3922_s24  ;;  %3794 = vrot.lane.b32.xlu2 %v3798_v48, %s3895_s22  ;;  %s5536_s22 = smov 127   ;;  %s5537_s24 = smov 112  }
 0x443   : > { %3789 = vrot.lane.b32.xlu1 %v3798_v48, %s5519_s15  ;;  %3490 = vmatmul.msk.f32.gmra.mxu0 %vm1062_vm3, %v1615_v20  ;;  %s3929_s15 = smov 14  }
 0x449   : > { %3492 = vmatmul.msk.f32.gmra.mxu1 %vm1062_vm3, %v1615_v20 }
 0x44a   : > { %3814 = vrot.lane.b32.xlu0 %v3798_v48, %s3923_s25  ;;  %3809 = vrot.lane.b32.xlu2 %v3798_v48, %s5535_s16  ;;  %s3927_s25 = smov 64  }
 0x44b   : > { %3804 = vrot.lane.b32.xlu1 %v3798_v48, %s5521_s13  ;;  %s3931_s13 = smov 42  }
 0x452   : > { %2148 = vrot.lane.b32.xlu0 %v2067_v24, %s3925_s14  ;;  %3824 = vrot.lane.b32.xlu2 %v3798_v48, %s3926_s30 }
 0x453   : > { %3819 = vrot.lane.b32.xlu1 %v3798_v48, %s3925_s14  ;;  %s5538_s14 = smov 32  }
 0x45a   : > { %2220 = vperm.xlu0 %3785, %v2212_v42   ;;  %2215 = vperm.xlu2 %3787, %v2211_v50  }
 0x45b   : > { %2078 = vrot.lane.b32.xlu1 %v2067_v24, %s3926_s30  ;;  %s3930_s30 = smov 21  }
 0x49c   : > { %v3795_v12 = vpop.permute.xlu2 %3794 }
 0x49d   : > { %v3797_v55 = vunpack.i.h.bf16 %v3795_v12  ;;  %v3796_v29 = vunpack.i.l.bf16 %v3795_v12 }
 0x49f   : > { %v1739_v57 = vsel %vm508_vm1, %v3796_v29, %v3797_v55  ;;  %vm2080_vm1 = vcmask 777216  }
 0x4a4   : > { %v3810_v62 = vpop.permute.xlu2 %3809 }
 0x4a5   : > { %v3812_v5 = vunpack.i.h.bf16 %v3810_v62  ;;  %v3811_v35 = vunpack.i.l.bf16 %v3810_v62 }
 0x4a7   : > { %v2006_v32 = vsel %vm676_vm4, %v3811_v35, %v3812_v5 }
 0x4ac   : > { %v3825_v59 = vpop.permute.xlu2 %3824 }
 0x4ad   : > { %v3827_v43 = vunpack.i.h.bf16 %v3825_v59  ;;  %v3826_v51 = vunpack.i.l.bf16 %v3825_v59 }
 0x4af   : > { %v2081_v60 = vsel %vm2080_vm1, %v3826_v51, %v3827_v43 }
 0x4b4   : > { %v3800_v6 = vpop.permute.xlu0 %3799 }
 0x4b5   : > { %v3790_v53 = vpop.permute.xlu1 %3789  ;;  %v3802_v30 = vunpack.i.h.bf16 %v3800_v6  ;;  %v3801_v11 = vunpack.i.l.bf16 %v3800_v6 }
 0x4b6   : > { %v3792_v10 = vunpack.i.h.bf16 %v3790_v53  ;;  %v3791_v63 = vunpack.i.l.bf16 %v3790_v53 }
 0x4b7   : > { %v1873_v56 = vsel %vm1872_vm15, %v3801_v11, %v3802_v30  ;;  %v1703_v24 = vpop.f32.mrf.mxu0  ;;  %vm3273_vm15 = vcmask 523264  }
 0x4b8   : > { %1672 = vmatpush.msrb.mxu3 %v3792_v10  ;;  %v1625_v33 = vsel %vm452_vm0, %v3791_v63, %v3792_v10  ;;  %vm1939_vm0 = vcmask 900096  }
 0x4b9   : > { %1649 = vmatpush.msra.mxu2 %v1625_v33  ;;  %3487 = vmatmul.msk.f32.vlgmr.msrb.gmra.mxu3 %vm1062_vm3, %v3483_v38 }
 0x4ba   : > { %1786 = vmatpush.msra.mxu3 %v3797_v55  ;;  %3485 = vmatmul.msk.f32.vlgmr.msra.gmra.mxu2 %vm1062_vm3, %v3483_v38 }
 0x4bb   : > { %1763 = vmatpush.msrb.mxu2 %v1739_v57 }
 0x4bc   : > { %1920 = vmatpush.msrb.mxu3 %v3802_v30  ;;  %v3815_v44 = vpop.permute.xlu0 %3814 }
 0x4bd   : > { %1897 = vmatpush.msra.mxu2 %v1873_v56  ;;  %v3817_v22 = vunpack.i.h.bf16 %v3815_v44  ;;  %v3816_v31 = vunpack.i.l.bf16 %v3815_v44  ;;  %v3805_v40 = vpop.permute.xlu1 %3804 }
 0x4be   : > { %v3807_v39 = vunpack.i.h.bf16 %v3805_v40  ;;  %v3806_v45 = vunpack.i.l.bf16 %v3805_v40  ;;  %v1726_v49 = vpop.f32.mrf.mxu1 }
 0x4bf   : > { %v1940_v61 = vsel %vm1939_vm0, %v3816_v31, %v3817_v22 }
 0x4c0   : > { %1853 = vmatpush.msra.mxu1 %v3807_v39  ;;  %v1806_v1 = vsel %vm1805_vm2, %v3806_v45, %v3807_v39  ;;  %v1706_v20 = vpop.f32.mrf.mxu0  ;;  %vm3303_vm2 = vcmask 261120  }
 0x4c1   : > { %3488 = vmatmul.msk.f32.gmra.mxu3 %vm1062_vm3, %v3484_v0  ;;  %1830 = vmatpush.msrb.mxu0 %v1806_v1 }
 0x4c2   : > { %1987 = vmatpush.msrb.mxu1 %v3817_v22  ;;  %3486 = vmatmul.msk.f32.gmra.mxu2 %vm1062_vm3, %v3484_v0 }
 0x4c3   : > { %1964 = vmatpush.msra.mxu0 %v1940_v61  ;;  %3503 = vmatmul.msk.f32.vlgmr.msra.gmra.mxu1 %vm1062_vm3, %v3499_v13 }
 0x4c4   : > { %3501 = vmatmul.msk.f32.vlgmr.msrb.gmra.mxu0 %vm1062_vm3, %v3499_v13  ;;  %v2149_v2 = vpop.permute.xlu0 %2148 }
 0x4c5   : > { %2106 = vmatpush.msrb.mxu0 %v2081_v60  ;;  %v3820_v7 = vpop.permute.xlu1 %3819 }
 0x4c6   : > { %v3822_v17 = vunpack.i.h.bf16 %v3820_v7  ;;  %v3821_v41 = vunpack.i.l.bf16 %v3820_v7  ;;  %v1729_v50 = vpop.f32.mrf.mxu1 }
 0x4c8   : > { %v2152_v4 = vsel %vm2150_vm5, %v3822_v17, %v2149_v2  ;;  %v2151_v36 = vsel %vm2150_vm5, %v3821_v41, %v3822_v17 }
 0x4c9   : > { %3497 = vmatmul.msk.f32.vlgmr.msra.gmra.mxu3 %vm1062_vm3, %v3493_v9 }
 0x4ca   : > { %2053 = vmatpush.msra.mxu3 %v3812_v5  ;;  %3495 = vmatmul.msk.f32.vlgmr.msrb.gmra.mxu2 %vm1062_vm3, %v3493_v9 }
 0x4cb   : > { %2030 = vmatpush.msrb.mxu2 %v2006_v32  ;;  %3504 = vmatmul.msk.f32.gmra.mxu1 %vm1062_vm3, %v3500_v21 }
 0x4cc   : > { %3502 = vmatmul.msk.f32.gmra.mxu0 %vm1062_vm3, %v3500_v21 }
 0x4cd   : > { %v2079_v3 = vpop.permute.xlu1 %2078 }
 0x4ce   : > { %v2082_v16 = vsel %vm2080_vm1, %v3827_v43, %v2079_v3 }
 0x4cf   : > { %2129 = vmatpush.msra.mxu1 %v2082_v16 }
 0x4d1   : > { %3498 = vmatmul.msk.f32.gmra.mxu3 %vm1062_vm3, %v3494_v19 }
 0x4d2   : > { %3496 = vmatmul.msk.f32.gmra.mxu2 %vm1062_vm3, %v3494_v19 }
 0x4d3   : > { %3515 = vmatmul.msk.f32.vlgmr.msrb.gmra.mxu1 %vm1062_vm3, %v3511_v23 }
 0x4d4   : > { %3513 = vmatmul.msk.f32.vlgmr.msra.gmra.mxu0 %vm1062_vm3, %v3511_v23 }
 0x4d9   : > { %3509 = vmatmul.msk.f32.vlgmr.msrb.gmra.mxu3 %vm1062_vm3, %v3505_v58 }
 0x4da   : > { %2199 = vmatpush.msrb.mxu3 %v2152_v4  ;;  %3507 = vmatmul.msk.f32.vlgmr.msra.gmra.mxu2 %vm1062_vm3, %v3505_v58 }
 0x4db   : > { %2176 = vmatpush.msra.mxu2 %v2151_v36  ;;  %3516 = vmatmul.msk.f32.gmra.mxu1 %vm1062_vm3, %v3512_v28 }
 0x4dc   : > { %3514 = vmatmul.msk.f32.gmra.mxu0 %vm1062_vm3, %v3512_v28 }
 0x4e1   : > { %3510 = vmatmul.msk.f32.gmra.mxu3 %vm1062_vm3, %v3506_v37 }
 0x4e2   : > { %3508 = vmatmul.msk.f32.gmra.mxu2 %vm1062_vm3, %v3506_v37 }
 0x4e3   : > { %3527 = vmatmul.msk.f32.vlgmr.msra.gmra.mxu1 %vm1062_vm3, %v3523_v8 }
 0x4e4   : > { %3525 = vmatmul.msk.f32.vlgmr.msrb.gmra.mxu0 %vm1062_vm3, %v3523_v8 }
 0x4e9   : > { %3521 = vmatmul.msk.f32.vlgmr.msra.gmra.mxu3 %vm1062_vm3, %v3517_v47 }
 0x4ea   : > { %3519 = vmatmul.msk.f32.vlgmr.msrb.gmra.mxu2 %vm1062_vm3, %v3517_v47 }
 0x4eb   : > { %3528 = vmatmul.msk.f32.gmra.mxu1 %vm1062_vm3, %v3524_v46 }
 0x4ec   : > { %3526 = vmatmul.msk.f32.gmra.mxu0 %vm1062_vm3, %v3524_v46  ;;  %v2216_v46 = vpop.permute.xlu2 %2215 }
 0x4f1   : > { %3522 = vmatmul.msk.f32.gmra.mxu3 %vm1062_vm3, %v3518_v27 }
 0x4f2   : > { %3520 = vmatmul.msk.f32.gmra.mxu2 %vm1062_vm3, %v3518_v27 }
 0x4f9   : > { %3533 = vmatmul.msk.f32.vlgmr.msrb.gmra.mxu3 %vm1062_vm3, %v3529_v18 }
 0x4fa   : > { %3531 = vmatmul.msk.f32.vlgmr.msra.gmra.mxu2 %vm1062_vm3, %v3529_v18 }
 0x501   : > { %3534 = vmatmul.msk.f32.gmra.mxu3 %vm1062_vm3, %v3530_v34 }
 0x502   : > { %3532 = vmatmul.msk.f32.gmra.mxu2 %vm1062_vm3, %v3530_v34  ;;  %vm2707_vm3 = vcmask 1040384  }
 0x53c   : > { %v1674_v15 = vpop.f32.mrf.mxu3 }
 0x53d   : > { %v1651_v48 = vpop.f32.mrf.mxu2  ;;  %v1727_v56 = vadd.f32 %v1726_v49, %v1674_v15 }
 0x53e   : > { %v1704_v22 = vadd.f32 %v1703_v24, %v1651_v48 }
 0x540   : > { %v1855_v6 = vpop.f32.mrf.mxu1 }
 0x541   : > { %v1832_v53 = vpop.f32.mrf.mxu0 }
 0x544   : > { %v1677_v42 = vpop.f32.mrf.mxu3 }
 0x545   : > { %v1654_v14 = vpop.f32.mrf.mxu2  ;;  %v1730_v45 = vadd.f32 %v1729_v50, %v1677_v42 }
 0x546   : > { %v1707_v60 = vadd.f32 %v1706_v20, %v1654_v14 }
 0x548   : > { %v1858_v10 = vpop.f32.mrf.mxu1 }
 0x549   : > { %v1835_v63 = vpop.f32.mrf.mxu0 }
 0x54c   : > { %v1788_v12 = vpop.f32.mrf.mxu3 }
 0x54d   : > { %v1765_v62 = vpop.f32.mrf.mxu2  ;;  %v1795_v59 = vadd.f32 %v1788_v12, %v1727_v56 }
 0x54e   : > { %v1794_v31 = vadd.f32 %v1765_v62, %v1704_v22 }
 0x54f   : > { %v1862_v0 = vadd.f32 %v1855_v6, %v1795_v59 }
 0x550   : > { %v1989_v11 = vpop.f32.mrf.mxu1  ;;  %v1861_v1 = vadd.f32 %v1832_v53, %v1794_v31 }
 0x551   : > { %v1966_v33 = vpop.f32.mrf.mxu0 }
 0x554   : > { %v1791_v55 = vpop.f32.mrf.mxu3 }
 0x555   : > { %v1768_v29 = vpop.f32.mrf.mxu2  ;;  %v1797_v61 = vadd.f32 %v1791_v55, %v1730_v45  ;;  %v2221_v55 = vpop.permute.xlu0 %2220 }
 0x556   : > { %v1796_v5 = vadd.f32 %v1768_v29, %v1707_v60 }
 0x557   : > { %v1864_v9 = vadd.f32 %v1858_v10, %v1797_v61 }
 0x558   : > { %v1992_v40 = vpop.f32.mrf.mxu1  ;;  %v1863_v17 = vadd.f32 %v1835_v63, %v1796_v5 }
 0x559   : > { %v1969_v43 = vpop.f32.mrf.mxu0 }
 0x55c   : > { %v1922_v38 = vpop.f32.mrf.mxu3 }
 0x55d   : > { %v1899_v30 = vpop.f32.mrf.mxu2  ;;  %v1929_v13 = vadd.f32 %v1922_v38, %v1862_v0 }
 0x55e   : > { %v1928_v7 = vadd.f32 %v1899_v30, %v1861_v1 }
 0x55f   : > { %v1996_v21 = vadd.f32 %v1989_v11, %v1929_v13 }
 0x560   : > { %v1995_v3 = vadd.f32 %v1966_v33, %v1928_v7  ;;  %v2131_v16 = vpop.f32.mrf.mxu1 }
 0x561   : > { %v2108_v23 = vpop.f32.mrf.mxu0 }
 0x564   : > { %v1925_v57 = vpop.f32.mrf.mxu3 }
 0x565   : > { %v1902_v44 = vpop.f32.mrf.mxu2  ;;  %v1931_v58 = vadd.f32 %v1925_v57, %v1864_v9 }
 0x566   : > { %v1930_v2 = vadd.f32 %v1902_v44, %v1863_v17 }
 0x567   : > { %v1998_v37 = vadd.f32 %v1992_v40, %v1931_v58  ;;  %v3410_v58 = vsel %vm4622_vm12, 1.0, %v3905_v26  ;;  %vm2257_vm12 = vcmask 113664  }
 0x568   : > { %v1997_v27 = vadd.f32 %v1969_v43, %v1930_v2  ;;  %v2134_v48 = vpop.f32.mrf.mxu1 }
 0x569   : > { %v2111_v42 = vpop.f32.mrf.mxu0 }
 0x56c   : > { %v2055_v39 = vpop.f32.mrf.mxu3 }
 0x56d   : > { %v2032_v51 = vpop.f32.mrf.mxu2  ;;  %v2062_v19 = vadd.f32 %v2055_v39, %v1996_v21 }
 0x56e   : > { %v2061_v41 = vadd.f32 %v2032_v51, %v1995_v3 }
 0x56f   : > { %v2138_v28 = vadd.f32 %v2131_v16, %v2062_v19 }
 0x570   : > { %v2137_v4 = vadd.f32 %v2108_v23, %v2061_v41 }
 0x574   : > { %v2058_v35 = vpop.f32.mrf.mxu3 }
 0x575   : > { %v2035_v32 = vpop.f32.mrf.mxu2  ;;  %v2064_v34 = vadd.f32 %v2058_v35, %v1998_v37 }
 0x576   : > { %v2063_v15 = vadd.f32 %v2035_v32, %v1997_v27 }
 0x577   : > { %v2140_v20 = vadd.f32 %v2134_v48, %v2064_v34 }
 0x578   : > { %v2139_v12 = vadd.f32 %v2111_v42, %v2063_v15 }
 0x57c   : > { %v2201_v36 = vpop.f32.mrf.mxu3 }
 0x57d   : > { %v2208_v8 = vadd.f32 %v2201_v36, %v2138_v28  ;;  %v2178_v47 = vpop.f32.mrf.mxu2 }
 0x57e   : > { %v2207_v18 = vadd.f32 %v2178_v47, %v2137_v4 }
 0x57f   : > { %v2224_v49 = vadd.f32 %v2216_v46, %v2208_v8 }
 0x580   : > { %v2223_v24 = vadd.f32 %v2216_v46, %v2207_v18 }
 0x581   : > { %v2228_v50 = vmax.f32 %v2224_v49, 0.0 }
 0x582   : > { %v2227_v14 = vmax.f32 %v2223_v24, 0.0 }
 0x583   : > { %2232 = vst.msk [vmem:[#allocation4 + $0x8] sm:$0xff] %vm676_vm4, %v2228_v50 }
 0x584   : > { %v2204_v62 = vpop.f32.mrf.mxu3  ;;  %2364 = vrot.lane.b32.xlu1 %v2227_v14, %s5536_s22  ;;  %2298 = vrot.lane.b32.xlu2 %v2227_v14, %s5536_s22 }
 0x585   : > { %v2210_v6 = vadd.f32 %v2204_v62, %v2140_v20  ;;  %v2181_v53 = vpop.f32.mrf.mxu2 }
 0x586   : > { %v2209_v29 = vadd.f32 %v2181_v53, %v2139_v12 }
 0x587   : > { %v2226_v10 = vadd.f32 %v2221_v55, %v2210_v6 }
 0x588   : > { %v2225_v63 = vadd.f32 %v2221_v55, %v2209_v29 }
 0x589   : > { %v2230_v38 = vmax.f32 %v2226_v10, 0.0 }
 0x58a   : > { %v2229_v30 = vmax.f32 %v2225_v63, 0.0  ;;  %v4939_v11 = vld [vmem:[#allocation4 + $0x8] sm:$0xff] }
 0x58b   : > { %2234 = vst.msk [vmem:[#allocation4 + $0x18] sm:$0xff] %vm676_vm4, %v2230_v38  ;;  %vm2264_vm4 = vcmask 1045504  }
 0x58c   : > { %2430 = vrot.lane.b32.xlu2 %v2227_v14, %s5536_s22  ;;  %2366 = vrot.lane.b32.xlu0 %v2229_v30, %s5536_s22 }
 0x58d   : > { %2300 = vrot.lane.b32.xlu1 %v2229_v30, %s5536_s22  ;;  %3535 = vmatpush.msk.msra.mxu0 %vm2264_vm4, %v3410_v58 }
 0x58e   : > { %3539 = vmatpush.msk.msrb.mxu1 %vm2264_vm4, %v3410_v58  ;;  %3543 = vmatpush.msk.msrb.mxu2 %vm2264_vm4, %v3410_v58 }
 0x58f   : > { %3547 = vmatpush.msk.msra.mxu3 %vm2264_vm4, %v3410_v58  ;;  %3536 = vmatpush.msk.msra.mxu0 %vm4636_vm13, %v3906_v25 }
 0x590   : > { %3540 = vmatpush.msk.msrb.mxu1 %vm4636_vm13, %v3906_v25  ;;  %3544 = vmatpush.msk.msrb.mxu2 %vm4636_vm13, %v3906_v25 }
 0x591   : > { %3548 = vmatpush.msk.msra.mxu3 %vm4636_vm13, %v3906_v25  ;;  %3551 = vmatpush.msk.msrb.mxu0 %vm2264_vm4, %v3410_v58 }
 0x592   : > { %v4946_v33 = vld [vmem:[#allocation4 + $0x18] sm:$0xff]  ;;  %3559 = vmatpush.msk.msra.mxu2 %vm2264_vm4, %v3410_v58  ;;  %3555 = vmatpush.msk.msra.mxu1 %vm2264_vm4, %v3410_v58  ;;  %v2690_v58 = vld [vmem:[%s5508_s5 + $0x18] sm:$0xff] }
 0x593   : > { %3552 = vmatpush.msk.msrb.mxu0 %vm4636_vm13, %v3906_v25 }
 0x594   : > { %2432 = vrot.lane.b32.xlu2 %v2229_v30, %s5536_s22  ;;  %2624 = vrot.lane.b32.xlu0 %v4939_v11, %s5536_s22 }
 0x595   : > { %2558 = vrot.lane.b32.xlu1 %v4939_v11, %s5536_s22  ;;  %3560 = vmatpush.msk.msra.mxu2 %vm4636_vm13, %v3906_v25 }
 0x596   : > { %3556 = vmatpush.msk.msra.mxu1 %vm4636_vm13, %v3906_v25  ;;  %vm2291_vm13 = vcmask 56320  }
 0x59c   : > { %2626 = vrot.lane.b32.xlu0 %v4946_v33, %s5536_s22 }
 0x59d   : > { %2560 = vrot.lane.b32.xlu1 %v4946_v33, %s5536_s22 }
 0x5a4   : > { %2239 = vrot.lane.b32.xlu0 %v2227_v14, %s5536_s22 }
 0x5ac   : > { %2241 = vrot.lane.b32.xlu0 %v2229_v30, %s5536_s22 }
 0x5de   : > { %v2299_v57 = vpop.permute.xlu2 %2298 }
 0x5df   : > { %v2304_v56 = vmax.f32 %v2227_v14, %v2299_v57 }
 0x5e1   : > { %2308 = vrot.lane.b32.xlu1 %v2304_v56, %s5537_s24 }
 0x5e6   : > { %v2431_v45 = vpop.permute.xlu2 %2430 }
 0x5e7   : > { %v2436_v43 = vmax.f32 %v2227_v14, %v2431_v45 }
 0x5ee   : > { %v2433_v61 = vpop.permute.xlu2 %2432 }
 0x5ef   : > { %v4969_v60 = vmax.f32 %v2229_v30, %v2433_v61 }
 0x5f6   : > { %v2365_v44 = vpop.permute.xlu1 %2364 }
 0x5f7   : > { %v2370_v59 = vmax.f32 %v2227_v14, %v2365_v44 }
 0x5f9   : > { %2374 = vrot.lane.b32.xlu2 %v2370_v59, %s5537_s24 }
 0x5fe   : > { %v2367_v22 = vpop.permute.xlu0 %2366 }
 0x5ff   : > { %v2371_v31 = vmax.f32 %v2229_v30, %v2367_v22  ;;  %v2301_v40 = vpop.permute.xlu1 %2300 }
 0x600   : > { %v4956_v39 = vmax.f32 %v2229_v30, %v2301_v40 }
 0x601   : > { %2376 = vrot.lane.b32.xlu2 %v2371_v31, %s5537_s24 }
 0x602   : > { %2310 = vrot.lane.b32.xlu1 %v4956_v39, %s5537_s24 }
 0x606   : > { %v2625_v0 = vpop.permute.xlu0 %2624 }
 0x607   : > { %v4962_v51 = vmax.f32 %v4939_v11, %v2625_v0  ;;  %v2559_v1 = vpop.permute.xlu1 %2558 }
 0x608   : > { %v2564_v7 = vmax.f32 %v4939_v11, %v2559_v1 }
 0x609   : > { %2440 = vrot.lane.b32.xlu2 %v2436_v43, %s5537_s24  ;;  %2634 = vrot.lane.b32.xlu0 %v4962_v51, %s5537_s24 }
 0x60a   : > { %2496 = vrot.lane.b32.xlu1 %v4939_v11, %s5536_s22 }
 0x60e   : > { %v2627_v13 = vpop.permute.xlu0 %2626 }
 0x60f   : > { %v4973_v5 = vmax.f32 %v4946_v33, %v2627_v13  ;;  %v2561_v35 = vpop.permute.xlu1 %2560 }
 0x610   : > { %v4981_v9 = vmax.f32 %v4946_v33, %v2561_v35  ;;  %v2693_v35 = vld [vmem:[%s5508_s5 + $0x30] sm:$0x1] }
 0x611   : > { %2442 = vrot.lane.b32.xlu0 %v4969_v60, %s5537_s24  ;;  %2568 = vrot.lane.b32.xlu2 %v2564_v7, %s5537_s24 }
 0x612   : > { %2636 = vrot.lane.b32.xlu1 %v4973_v5, %s5537_s24 }
 0x616   : > { %v2240_v21 = vpop.permute.xlu0 %2239 }
 0x617   : > { %v2245_v32 = vmax.f32 %v2227_v14, %v2240_v21  ;;  %v3580_v21 = vld [vmem:[%s5508_s5 + $0xa0] sm:$0x1] }
 0x619   : > { %2498 = vrot.lane.b32.xlu2 %v4946_v33, %s5536_s22  ;;  %2570 = vrot.lane.b32.xlu0 %v4981_v9, %s5537_s24 }
 0x61e   : > { %v2242_v3 = vpop.permute.xlu0 %2241 }
 0x61f   : > { %v2246_v16 = vmax.f32 %v2229_v30, %v2242_v3  ;;  %v3579_v3 = vld [vmem:[%s5508_s5 + $0x98] sm:$0xff] }
 0x621   : > { %2249 = vrot.lane.b32.xlu2 %v2245_v32, %s5537_s24 }
 0x629   : > { %2251 = vrot.lane.b32.xlu2 %v2246_v16, %s5537_s24 }
 0x653   : > { %v2375_v19 = vpop.permute.xlu2 %2374  ;;  %v2309_v23 = vpop.permute.xlu1 %2308 }
 0x654   : > { %v2380_v17 = vmax.f32 %v2370_v59, %v2375_v19  ;;  %v2314_v41 = vmax.f32 %v2304_v56, %v2309_v23  ;;  %v2691_v19 = vld [vmem:[%s5508_s5 + $0x20] sm:$0xff]  ;;  %v3578_v23 = vld [vmem:[%s5508_s5 + $0x90] sm:$0xff] }
 0x656   : > { %2318 = vrot.lane.b32.xlu0 %v2314_v41, %s5535_s16  ;;  %2384 = vrot.lane.b32.xlu1 %v2380_v17, %s3927_s25  ;;  %v3566_v41 = vld [vmem:[%s5508_s5 + $0x50] sm:$0xff] }
 0x65b   : > { %v2377_v2 = vpop.permute.xlu2 %2376 }
 0x65c   : > { %v2381_v26 = vmax.f32 %v2371_v31, %v2377_v2  ;;  %v3577_v2 = vld [vmem:[%s5508_s5 + $0x88] sm:$0xff] }
 0x65e   : > { %2386 = vrot.lane.b32.xlu1 %v2381_v26, %s3927_s25  ;;  %v3565_v26 = vld [vmem:[%s5508_s5 + $0x48] sm:$0xff] }
 0x663   : > { %v2441_v52 = vpop.permute.xlu2 %2440 }
 0x664   : > { %v2446_v28 = vmax.f32 %v2436_v43, %v2441_v52  ;;  %v2689_v52 = vld [vmem:[%s5508_s5 + $0x10] sm:$0xff] }
 0x666   : > { %2450 = vrot.lane.b32.xlu1 %v2446_v28, %s5538_s14  ;;  %v3576_v28 = vld [vmem:[%s5508_s5 + $0x80] sm:$0xff] }
 0x66b   : > { %v2569_v4 = vpop.permute.xlu2 %2568 }
 0x66c   : > { %v2574_v36 = vmax.f32 %v2564_v7, %v2569_v4  ;;  %v3564_v4 = vld [vmem:[%s5508_s5 + $0x40] sm:$0xff] }
 0x66e   : > { %2578 = vrot.lane.b32.xlu1 %v2574_v36, %s5535_s16  ;;  %v2688_v36 = vld [vmem:[%s5508_s5 + $0x8] sm:$0xff] }
 0x673   : > { %v2499_v37 = vpop.permute.xlu2 %2498 }
 0x674   : > { %v2503_v8 = vmax.f32 %v4946_v33, %v2499_v37  ;;  %v2311_v47 = vpop.permute.xlu1 %2310  ;;  %v3598_v37 = vld [vmem:[%s5508_s5 + $0x110] sm:$0x1] }
 0x675   : > { %v2315_v46 = vmax.f32 %v4956_v39, %v2311_v47  ;;  %v3597_v47 = vld [vmem:[%s5508_s5 + $0x108] sm:$0xff] }
 0x676   : > { %2508 = vrot.lane.b32.xlu1 %v2503_v8, %s5537_s24 }
 0x677   : > { %2320 = vrot.lane.b32.xlu0 %v2315_v46, %s5535_s16  ;;  %v3563_v46 = vld [vmem:[%s5508_s5 + $0x38] sm:$0xff] }
 0x67b   : > { %v2635_v54 = vpop.permute.xlu0 %2634  ;;  %v2250_v25 = vpop.permute.xlu2 %2249 }
 0x67c   : > { %v2640_v27 = vmax.f32 %v4962_v51, %v2635_v54  ;;  %v2255_v18 = vmax.f32 %v2245_v32, %v2250_v25  ;;  %v2497_v34 = vpop.permute.xlu1 %2496  ;;  %v2692_v32 = vld [vmem:[%s5508_s5 + $0x28] sm:$0xff]  ;;  %v2687_v54 = vld [vmem:[%s5508_s5] sm:$0xff] }
 0x67d   : > { %v2502_v49 = vmax.f32 %v4939_v11, %v2497_v34 }
 0x67e   : > { %2644 = vrot.lane.b32.xlu2 %v2640_v27, %s3927_s25  ;;  %3537 = vmatmul.msk.f32.vlgmr.msra.gmra.mxu0 %vm2257_vm12, %v2255_v18  ;;  %v3574_v27 = vld [vmem:[%s5508_s5 + $0x70] sm:$0xff]  ;;  %v3589_v18 = vld [vmem:[%s5508_s5 + $0xd8] sm:$0x1] }
 0x67f   : > { %2506 = vrot.lane.b32.xlu0 %v2502_v49, %s5537_s24  ;;  %3572 = vmatpush.msk.msra.mxu0 %vm2707_vm3, %v2693_v35  ;;  %v3643_v35 = vld [vmem:[%s5508_s5 + $0x228] sm:$0x1]  ;;  %s3337_s24 = scalar_lea.hbm %s5514_s11, %s4015_s21 }
 0x681   : > { %2747 = vmatpush.msra.mxu0 %v2692_v32 }
 0x683   : > { %v2443_v15 = vpop.permute.xlu0 %2442  ;;  %v2252_v48 = vpop.permute.xlu2 %2251  ;;  %2748 = vmatpush.msra.mxu0 %v2691_v19 }
 0x684   : > { %v2447_v24 = vmax.f32 %v4969_v60, %v2443_v15  ;;  %v2256_v42 = vmax.f32 %v2246_v16, %v2252_v48  ;;  %v2637_v50 = vpop.permute.xlu1 %2636  ;;  %v3567_v16 = vld [vmem:[%s5508_s5 + $0x58] sm:$0xff]  ;;  %v3616_v15 = vld [vmem:[%s5508_s5 + $0x180] sm:$0x1] }
 0x685   : > { %v2641_v14 = vmax.f32 %v4973_v5, %v2637_v50  ;;  %v3569_v5 = vld [vmem:[%s5508_s5 + $0x68] sm:$0x1]  ;;  %2749 = vmatpush.msra.mxu0 %v2690_v58  ;;  %v3606_v48 = vld [vmem:[%s5508_s5 + $0x140] sm:$0xff]  ;;  %v3615_v50 = vld [vmem:[%s5508_s5 + $0x178] sm:$0xff] }
 0x686   : > { %2452 = vrot.lane.b32.xlu2 %v2447_v24, %s5538_s14  ;;  %3538 = vmatmul.msk.f32.gmra.mxu0 %vm2257_vm12, %v2256_v42  ;;  %v3588_v24 = vld [vmem:[%s5508_s5 + $0xd0] sm:$0xff]  ;;  %v3596_v42 = vld [vmem:[%s5508_s5 + $0x100] sm:$0xff]  ;;  %v3651_v58 = vld [vmem:[%s5508_s5 + $0x258] sm:$0xff] }
 0x687   : > { %2646 = vrot.lane.b32.xlu0 %v2641_v14, %s3927_s25  ;;  %3570 = vmatpush.msk.msrb.mxu3 %vm2707_vm3, %v3569_v5  ;;  %v3587_v14 = vld [vmem:[%s5508_s5 + $0xc8] sm:$0xff]  ;;  %v3625_v5 = vld [vmem:[%s5508_s5 + $0x1b8] sm:$0x1] }
 0x688   : > { %2750 = vmatpush.msra.mxu0 %v2689_v52  ;;  %v3641_v52 = vld [vmem:[%s5508_s5 + $0x218] sm:$0xff] }
 0x68a   : > { %2751 = vmatpush.msra.mxu0 %v2688_v36 }
 0x68b   : > { %v2571_v20 = vpop.permute.xlu0 %2570 }
 0x68c   : > { %v2575_v12 = vmax.f32 %v4981_v9, %v2571_v20  ;;  %v3568_v9 = vld [vmem:[%s5508_s5 + $0x60] sm:$0xff]  ;;  %2752 = vmatpush.msra.mxu0 %v2687_v54  ;;  %v3595_v20 = vld [vmem:[%s5508_s5 + $0xf8] sm:$0xff] }
 0x68d   : > { %2721 = vmatpush.msrb.mxu3 %v3568_v9  ;;  %v3652_v9 = vld [vmem:[%s5508_s5 + $0x260] sm:$0x1] }
 0x68e   : > { %2580 = vrot.lane.b32.xlu2 %v2575_v12, %s5535_s16  ;;  %s3928_s16 = smov 7   ;;  %v3605_v12 = vld [vmem:[%s5508_s5 + $0x138] sm:$0xff] }
 0x68f   : > { %2722 = vmatpush.msrb.mxu3 %v3567_v16 }
 0x691   : > { %2723 = vmatpush.msrb.mxu3 %v3566_v41  ;;  %v3642_v41 = vld [vmem:[%s5508_s5 + $0x220] sm:$0xff] }
 0x693   : > { %2724 = vmatpush.msrb.mxu3 %v3565_v26  ;;  %v3623_v26 = vld [vmem:[%s5508_s5 + $0x1a8] sm:$0xff] }
 0x695   : > { %2725 = vmatpush.msrb.mxu3 %v3564_v4  ;;  %v3668_v4 = vld [vmem:[%s5508_s5 + $0x2c0] sm:$0xff] }
 0x697   : > { %2726 = vmatpush.msrb.mxu3 %v3563_v46  ;;  %v3649_v46 = vld [vmem:[%s5508_s5 + $0x248] sm:$0xff] }
 0x6c8   : > { %v2319_v62 = vpop.permute.xlu0 %2318  ;;  %v2385_v6 = vpop.permute.xlu1 %2384 }
 0x6c9   : > { %3541 = vmatmul.msk.f32.vlgmr.msrb.gmra.mxu1 %vm2257_vm12, %v2319_v62  ;;  %3545 = vmatmul.msk.f32.vlgmr.msrb.gmra.mxu2 %vm2257_vm12, %v2385_v6  ;;  %v3614_v62 = vld [vmem:[%s5508_s5 + $0x170] sm:$0xff]  ;;  %v3586_v6 = vld [vmem:[%s5508_s5 + $0xc0] sm:$0xff] }
 0x6ca   : > { %3581 = vmatpush.msk.msrb.mxu1 %vm2707_vm3, %v3580_v21  ;;  %3599 = vmatpush.msk.msrb.mxu2 %vm2707_vm3, %v3598_v37  ;;  %v3670_v21 = vld [vmem:[%s5508_s5 + $0x2d0] sm:$0x1]  ;;  %v3622_v37 = vld [vmem:[%s5508_s5 + $0x1a0] sm:$0xff] }
 0x6cc   : > { %2782 = vmatpush.msrb.mxu1 %v3579_v3  ;;  %2854 = vmatpush.msrb.mxu2 %v3597_v47 }
 0x6ce   : > { %2783 = vmatpush.msrb.mxu1 %v3578_v23  ;;  %2855 = vmatpush.msrb.mxu2 %v3596_v42  ;;  %v3638_v42 = vld [vmem:[%s5508_s5 + $0x200] sm:$0xff] }
 0x6d0   : > { %v2387_v53 = vpop.permute.xlu1 %2386  ;;  %2784 = vmatpush.msrb.mxu1 %v3577_v2  ;;  %2856 = vmatpush.msrb.mxu2 %v3595_v20  ;;  %v3669_v2 = vld [vmem:[%s5508_s5 + $0x2c8] sm:$0xff] }
 0x6d1   : > { %3546 = vmatmul.msk.f32.gmra.mxu2 %vm2257_vm12, %v2387_v53  ;;  %v3594_v53 = vld [vmem:[%s5508_s5 + $0xf0] sm:$0xff]  ;;  %v3619_v20 = vld [vmem:[%s5508_s5 + $0x188] sm:$0xff] }
 0x6d2   : > { %2785 = vmatpush.msrb.mxu1 %v3576_v28  ;;  %2857 = vmatpush.msrb.mxu2 %v3594_v53  ;;  %v3650_v28 = vld [vmem:[%s5508_s5 + $0x250] sm:$0xff]  ;;  %v3679_v53 = vld [vmem:[%s5508_s5 + $0x308] sm:$0x1] }
 0x6d8   : > { %v2645_v55 = vpop.permute.xlu2 %2644  ;;  %v2451_v29 = vpop.permute.xlu1 %2450 }
 0x6d9   : > { %3549 = vmatmul.msk.f32.vlgmr.msra.gmra.mxu3 %vm2257_vm12, %v2451_v29  ;;  %3561 = vmatmul.msk.f32.vlgmr.msra.gmra.mxu2 %vm2257_vm12, %v2645_v55  ;;  %v3604_v55 = vld [vmem:[%s5508_s5 + $0x130] sm:$0xff]  ;;  %v3613_v29 = vld [vmem:[%s5508_s5 + $0x168] sm:$0xff] }
 0x6da   : > { %3590 = vmatpush.msk.msra.mxu3 %vm2707_vm3, %v3589_v18  ;;  %v3639_v18 = vld [vmem:[%s5508_s5 + $0x208] sm:$0xff] }
 0x6dc   : > { %2818 = vmatpush.msra.mxu3 %v3588_v24  ;;  %v3620_v24 = vld [vmem:[%s5508_s5 + $0x190] sm:$0xff] }
 0x6de   : > { %2819 = vmatpush.msra.mxu3 %v3587_v14  ;;  %v3666_v14 = vld [vmem:[%s5508_s5 + $0x2b0] sm:$0xff] }
 0x6e0   : > { %v2453_v10 = vpop.permute.xlu2 %2452  ;;  %v2579_v38 = vpop.permute.xlu1 %2578  ;;  %2820 = vmatpush.msra.mxu3 %v3586_v6  ;;  %v3661_v6 = vld [vmem:[%s5508_s5 + $0x298] sm:$0x1] }
 0x6e1   : > { %3550 = vmatmul.msk.f32.gmra.mxu3 %vm2257_vm12, %v2453_v10  ;;  %v3585_v10 = vld [vmem:[%s5508_s5 + $0xb8] sm:$0xff] }
 0x6e2   : > { %2821 = vmatpush.msra.mxu3 %v3585_v10 }
 0x6e8   : > { %v2509_v33 = vpop.permute.xlu1 %2508  ;;  %v2581_v57 = vpop.permute.xlu2 %2580 }
 0x6e9   : > { %v2321_v63 = vpop.permute.xlu0 %2320  ;;  %v2513_v44 = vmax.f32 %v2503_v8, %v2509_v33  ;;  %v3575_v8 = vld [vmem:[%s5508_s5 + $0x78] sm:$0xff]  ;;  %v3584_v33 = vld [vmem:[%s5508_s5 + $0xb0] sm:$0xff] }
 0x6ea   : > { %3542 = vmatmul.msk.f32.gmra.mxu1 %vm2257_vm12, %v2321_v63  ;;  %v3593_v63 = vld [vmem:[%s5508_s5 + $0xe8] sm:$0xff]  ;;  %2822 = vmatpush.msra.mxu3 %v3584_v33 }
 0x6eb   : > { %2786 = vmatpush.msrb.mxu1 %v3575_v8  ;;  %2858 = vmatpush.msrb.mxu2 %v3593_v63  ;;  %v3640_v8 = vld [vmem:[%s5508_s5 + $0x210] sm:$0xff]  ;;  %v3678_v63 = vld [vmem:[%s5508_s5 + $0x300] sm:$0xff]  ;;  %v3659_v33 = vld [vmem:[%s5508_s5 + $0x288] sm:$0xff] }
 0x6ed   : > { %2787 = vmatpush.msrb.mxu1 %v3574_v27 }
 0x6f1   : > { %v2507_v30 = vpop.permute.xlu0 %2506 }
 0x6f2   : > { %v2512_v11 = vmax.f32 %v2502_v49, %v2507_v30  ;;  %3557 = vmatmul.msk.f32.vlgmr.msra.gmra.mxu1 %vm2257_vm12, %v2579_v38  ;;  %v3607_v49 = vld [vmem:[%s5508_s5 + $0x148] sm:$0x1]  ;;  %v3612_v30 = vld [vmem:[%s5508_s5 + $0x160] sm:$0xff] }
 0x6f3   : > { %3617 = vmatpush.msk.msra.mxu1 %vm2707_vm3, %v3616_v15  ;;  %v3603_v38 = vld [vmem:[%s5508_s5 + $0x128] sm:$0xff] }
 0x6f4   : > { %3553 = vmatmul.msk.f32.vlgmr.msrb.gmra.mxu0 %vm2257_vm12, %v2512_v11  ;;  %v3602_v11 = vld [vmem:[%s5508_s5 + $0x120] sm:$0xff] }
 0x6f5   : > { %3608 = vmatpush.msk.msrb.mxu0 %vm2707_vm3, %v3607_v49  ;;  %2926 = vmatpush.msra.mxu1 %v3615_v50  ;;  %v3647_v50 = vld [vmem:[%s5508_s5 + $0x238] sm:$0xff] }
 0x6f7   : > { %2890 = vmatpush.msrb.mxu0 %v3606_v48  ;;  %2927 = vmatpush.msra.mxu1 %v3614_v62  ;;  %v3667_v48 = vld [vmem:[%s5508_s5 + $0x2b8] sm:$0xff]  ;;  %v3646_v62 = vld [vmem:[%s5508_s5 + $0x230] sm:$0xff] }
 0x6f9   : > { %v2647_v56 = vpop.permute.xlu0 %2646  ;;  %2891 = vmatpush.msrb.mxu0 %v3605_v12  ;;  %2928 = vmatpush.msra.mxu1 %v3613_v29  ;;  %v3637_v12 = vld [vmem:[%s5508_s5 + $0x1f8] sm:$0xff]  ;;  %v3660_v29 = vld [vmem:[%s5508_s5 + $0x290] sm:$0xff] }
 0x6fa   : > { %3558 = vmatmul.msk.f32.gmra.mxu1 %vm2257_vm12, %v2581_v57  ;;  %3562 = vmatmul.msk.f32.gmra.mxu2 %vm2257_vm12, %v2647_v56  ;;  %v3592_v57 = vld [vmem:[%s5508_s5 + $0xe0] sm:$0xff]  ;;  %v3611_v56 = vld [vmem:[%s5508_s5 + $0x158] sm:$0xff] }
 0x6fb   : > { %v2285_v59 = vpop.f32.mrf.mxu0  ;;  %2892 = vmatpush.msrb.mxu0 %v3604_v55  ;;  %2929 = vmatpush.msra.mxu1 %v3612_v30  ;;  %v3688_v55 = vld [vmem:[%s5508_s5 + $0x340] sm:$0x1] }
 0x6fc   : > { %2292 = vst.msk [vmem:[#allocation5] sm:$0xff] %vm2291_vm13, %v2285_v59  ;;  %3554 = vmatmul.msk.f32.gmra.mxu0 %vm2257_vm12, %v2513_v44  ;;  %v3634_v44 = vld [vmem:[%s5508_s5 + $0x1f0] sm:$0x1]  ;;  %2859 = vmatpush.msrb.mxu2 %v3592_v57  ;;  %v3583_v59 = vld [vmem:[%s5508_s5 + $0xa8] sm:$0xff] }
 0x6fd   : > { %2893 = vmatpush.msrb.mxu0 %v3603_v38  ;;  %2930 = vmatpush.msra.mxu1 %v3611_v56  ;;  %v3687_v38 = vld [vmem:[%s5508_s5 + $0x338] sm:$0xff] }
 0x6fe   : > { %3635 = vmatpush.msk.msra.mxu2 %vm2707_vm3, %v3634_v44  ;;  %2823 = vmatpush.msra.mxu3 %v3583_v59  ;;  %v3677_v56 = vld [vmem:[%s5508_s5 + $0x2f8] sm:$0xff]  ;;  %v3686_v44 = vld [vmem:[%s5508_s5 + $0x330] sm:$0xff]  ;;  %v3658_v59 = vld [vmem:[%s5508_s5 + $0x280] sm:$0xff] }
 0x6ff   : > { %2894 = vmatpush.msrb.mxu0 %v3602_v11 }
 0x703   : > { %v2288_v22 = vpop.f32.mrf.mxu0 }
 0x704   : > { %2293 = vst.msk [vmem:[#allocation5 + $0x8] sm:$0xff] %vm2291_vm13, %v2288_v22  ;;  %v3601_v22 = vld [vmem:[%s5508_s5 + $0x118] sm:$0xff] }
 0x705   : > { %2895 = vmatpush.msrb.mxu0 %v3601_v22  ;;  %v3665_v22 = vld [vmem:[%s5508_s5 + $0x2a8] sm:$0xff] }
 0x746   : > { %v2343_v31 = vpop.f32.mrf.mxu1 }
 0x747   : > { %2351 = vrot.lane.b32.xlu0 %v2343_v31, %s3928_s16  ;;  %v3610_v31 = vld [vmem:[%s5508_s5 + $0x150] sm:$0xff] }
 0x748   : > { %2931 = vmatpush.msra.mxu1 %v3610_v31  ;;  %v3676_v31 = vld [vmem:[%s5508_s5 + $0x2f0] sm:$0xff] }
 0x74c   : > { %v2409_v40 = vpop.f32.mrf.mxu2 }
 0x74d   : > { %2417 = vrot.lane.b32.xlu1 %v2409_v40, %s3929_s15  ;;  %v3633_v40 = vld [vmem:[%s5508_s5 + $0x1e8] sm:$0xff] }
 0x74e   : > { %2998 = vmatpush.msra.mxu2 %v3633_v40  ;;  %v3685_v40 = vld [vmem:[%s5508_s5 + $0x328] sm:$0xff] }
 0x754   : > { %v2412_v39 = vpop.f32.mrf.mxu2 }
 0x75c   : > { %v2475_v45 = vpop.f32.mrf.mxu3  ;;  %v2669_v0 = vpop.f32.mrf.mxu2 }
 0x75d   : > { %2483 = vrot.lane.b32.xlu2 %v2475_v45, %s3930_s30  ;;  %v3631_v45 = vld [vmem:[%s5508_s5 + $0x1d8] sm:$0xff] }
 0x764   : > { %v2478_v51 = vpop.f32.mrf.mxu3 }
 0x765   : > { %2677 = vrot.lane.b32.xlu2 %v2669_v0, %s3931_s13  ;;  %v3630_v0 = vld [vmem:[%s5508_s5 + $0x1d0] sm:$0xff] }
 0x767   : > { %v2346_v43 = vpop.f32.mrf.mxu1 }
 0x76d   : > { %2485 = vrot.lane.b32.xlu2 %v2478_v51, %s3930_s30  ;;  %v3628_v51 = vld [vmem:[%s5508_s5 + $0x1c0] sm:$0xff] }
 0x76f   : > { %v2603_v1 = vpop.f32.mrf.mxu1 }
 0x770   : > { %2611 = vrot.lane.b32.xlu1 %v2603_v1, %s3932_s29 }
 0x771   : > { %v2537_v61 = vpop.f32.mrf.mxu0 }
 0x772   : > { %2545 = vrot.lane.b32.xlu0 %v2537_v61, %s3933_s12 }
 0x777   : > { %v2606_v60 = vpop.f32.mrf.mxu1 }
 0x778   : > { %2419 = vrot.lane.b32.xlu1 %v2412_v39, %s3929_s15  ;;  %v3632_v39 = vld [vmem:[%s5508_s5 + $0x1e0] sm:$0xff]  ;;  %s3341_s15 = sshll.u32 %s3337_s24, 4  ;;  %s3342_s15 = int_to_ptr.hbm [resolvable:$true] %s3341_s15 }
 0x779   : > { %v2540_v7 = vpop.f32.mrf.mxu0  ;;  %2999 = vmatpush.msra.mxu2 %v3632_v39  ;;  %v3657_v39 = vld [vmem:[%s5508_s5 + $0x278] sm:$0xff] }
 0x77a   : > { %2353 = vrot.lane.b32.xlu0 %v2346_v43, %s3928_s16  ;;  %v3629_v43 = vld [vmem:[%s5508_s5 + $0x1c8] sm:$0xff] }
 0x77b   : > { %3000 = vmatpush.msra.mxu2 %v3631_v45  ;;  %v3664_v45 = vld [vmem:[%s5508_s5 + $0x2a0] sm:$0xff] }
 0x77d   : > { %v2672_v13 = vpop.f32.mrf.mxu2  ;;  %3001 = vmatpush.msra.mxu2 %v3630_v0  ;;  %v3675_v0 = vld [vmem:[%s5508_s5 + $0x2e8] sm:$0xff] }
 0x77e   : > { %2679 = vrot.lane.b32.xlu2 %v2672_v13, %s3931_s13 }
 0x77f   : > { %3002 = vmatpush.msra.mxu2 %v3629_v43  ;;  %v3684_v43 = vld [vmem:[%s5508_s5 + $0x320] sm:$0xff] }
 0x780   : > { %2613 = vrot.lane.b32.xlu1 %v2606_v60, %s3932_s29  ;;  %s3842_s29 = sshra.s32 %s3342_s15, 4  ;;  %s3843_s29 = int_to_ptr.hbm [resolvable:$true] %s3842_s29 }
 0x781   : > { %3003 = vmatpush.msra.mxu2 %v3628_v51  ;;  %v3656_v51 = vld [vmem:[%s5508_s5 + $0x270] sm:$0xff]  ;;  %s3844_s1 = scalar_lea.hbm %s3843_s29, 1  ;;  %p3849_p0 = scmp.lt.s32.totalorder %s3843_s29, %s5514_s11 }
 0x782   : > { %2547 = vrot.lane.b32.xlu0 %v2540_v7, %s3933_s12  ;;  %s375_s12 = sand.u32 1, %s3882_s18   ;;  %p3845_p11 = scmp.ne.s32.totalorder %s3843_s29, %s3844_s1 }
 0x783   : > { %s376_s30 = scalar_lea.vmem [#allocation6], %s375_s12  ;;  %s3329_s13 = scalar_lea.sflag [#allocation7], %s375_s12 }
 0x784   : > { %s3339_s16 = sshll.u32 %s376_s30, 4  ;;  %p3846_p12 = pnand %p3845_p11, %p4032_p5  ;;  %s3340_s16 = int_to_ptr.vmem [resolvable:$true] %s3339_s16 }
 0x785   : > { %p3850_p1 = scmp.lt.s32.totalorder %s3848_s0, %s3844_s1 }
 0x786   : > { %p3847_p13 = pneg %p3846_p12 }
 0x787   : > { %p3851_p2 = por %p3850_p1, %p3849_p0 }
 0x789   : > { %p3852_p3 = pnand %p3851_p2, %p3847_p13 }
 0x7b7   : > { %v2484_v34 = vpop.permute.xlu2 %2483 }
 0x7b9   : > { %v2352_v17 = vpop.permute.xlu0 %2351 }
 0x7ba   : > { %2358 = vst.msk [vmem:[#allocation5] sm:$0xff] %vm2357_vm6, %v2352_v17  ;;  %v3624_v17 = vld [vmem:[%s5508_s5 + $0x1b0] sm:$0xff] }
 0x7bf   : > { %v2418_v25 = vpop.permute.xlu1 %2417  ;;  %v2678_v61 = vpop.permute.xlu2 %2677 }
 0x7c0   : > { %2424 = vst.msk [vmem:[#allocation5] sm:$0xff] %vm2423_vm7, %v2418_v25  ;;  %v3621_v25 = vld [vmem:[%s5508_s5 + $0x198] sm:$0xff] }
 0x7c1   : > { %2490 = vst.msk [vmem:[#allocation5] sm:$0xff] %vm2489_vm8, %v2484_v34  ;;  %v3648_v34 = vld [vmem:[%s5508_s5 + $0x240] sm:$0xff] }
 0x7c7   : > { %v2486_v32 = vpop.permute.xlu2 %2485 }
 0x7d8   : > { %v2680_v54 = vpop.permute.xlu2 %2679 }
 0x7e2   : > { %v2612_v1 = vpop.permute.xlu1 %2611 }
 0x7e4   : > { %v2546_v13 = vpop.permute.xlu0 %2545 }
 0x7e5   : > { %2552 = vst.msk [vmem:[#allocation5] sm:$0xff] %vm2551_vm9, %v2546_v13 }
 0x7e6   : > { %2618 = vst.msk [vmem:[#allocation5] sm:$0xff] %vm2617_vm10, %v2612_v1  ;;  %v3674_v1 = vld [vmem:[%s5508_s5 + $0x2e0] sm:$0xff] }
 0x7e7   : > { %2684 = vst.msk [vmem:[#allocation5] sm:$0xff] %vm2683_vm11, %v2678_v61  ;;  %v3683_v61 = vld [vmem:[%s5508_s5 + $0x318] sm:$0xff] }
 0x7ea   : > { %v2420_v60 = vpop.permute.xlu1 %2419 }
 0x7ec   : > { %v2354_v7 = vpop.permute.xlu0 %2353 }
 0x7ed   : > { %2359 = vst.msk [vmem:[#allocation5 + $0x8] sm:$0xff] %vm2357_vm6, %v2354_v7  ;;  %v3673_v7 = vld [vmem:[%s5508_s5 + $0x2d8] sm:$0xff] }
 0x7ee   : > { %2425 = vst.msk [vmem:[#allocation5 + $0x8] sm:$0xff] %vm2423_vm7, %v2420_v60  ;;  %v2694_v3 = vld [vmem:[#allocation5 + $0x1] sm:$0x1]  ;;  %v2686_v16 = vld [vmem:[#allocation5] sm:$0x1]  ;;  %v3655_v60 = vld [vmem:[%s5508_s5 + $0x268] sm:$0xff] }
 0x7ef   : > { %2491 = vst.msk [vmem:[#allocation5 + $0x8] sm:$0xff] %vm2489_vm8, %v2486_v32  ;;  %3571 = vmatmul.msk.f32.vlgmr.msrb.gmra.mxu3 %vm2703_vm14, %v2694_v3  ;;  %3573 = vmatmul.msk.f32.vlgmr.msra.gmra.mxu0 %vm2703_vm14, %v2686_v16  ;;  %v2757_v19 = vld [vmem:[#allocation5 + $0x2] sm:$0x1]  ;;  %v2829_v23 = vld [vmem:[#allocation5 + $0x4] sm:$0x1]  ;;  %v3695_v16 = vld [vmem:[%s5508_s5 + $0x368] sm:$0xff] }
 0x7f0   : > { %3582 = vmatmul.msk.f32.vlgmr.msrb.gmra.mxu1 %vm2703_vm14, %v2757_v19  ;;  %3600 = vmatmul.msk.f32.vlgmr.msrb.gmra.mxu2 %vm2703_vm14, %v2829_v23  ;;  %v2793_v27 = vld [vmem:[#allocation5 + $0x3] sm:$0x1]  ;;  %v2865_v49 = vld [vmem:[#allocation5 + $0x5] sm:$0x1]  ;;  %v2901_v15 = vld [vmem:[#allocation5 + $0x6] sm:$0x1] }
 0x7f1   : > { %3626 = vmatpush.msk.msrb.mxu3 %vm2707_vm3, %v3625_v5  ;;  %3644 = vmatpush.msk.msra.mxu0 %vm2707_vm3, %v3643_v35  ;;  %v2937_v57 = vld [vmem:[#allocation5 + $0x7] sm:$0x1]  ;;  %v3697_v35 = vld [vmem:[%s5508_s5 + $0x378] sm:$0x1]  ;;  %v3694_v19 = vld [vmem:[%s5508_s5 + $0x360] sm:$0xff] }
 0x7f2   : > { %3653 = vmatpush.msk.msrb.mxu1 %vm2707_vm3, %v3652_v9  ;;  %3671 = vmatpush.msk.msrb.mxu2 %vm2707_vm3, %v3670_v21  ;;  %v2614_v47 = vpop.permute.xlu1 %2613  ;;  %v3682_v5 = vld [vmem:[%s5508_s5 + $0x310] sm:$0xff]  ;;  %v3693_v23 = vld [vmem:[%s5508_s5 + $0x358] sm:$0xff] }
 0x7f3   : > { %2962 = vmatpush.msrb.mxu3 %v3624_v17  ;;  %3034 = vmatpush.msra.mxu0 %v3642_v41  ;;  %v3696_v3 = vld [vmem:[%s5508_s5 + $0x370] sm:$0xff]  ;;  %v3691_v41 = vld [vmem:[%s5508_s5 + $0x348] sm:$0xff] }
 0x7f4   : > { %3070 = vmatpush.msrb.mxu1 %v3651_v58  ;;  %v2548_v36 = vpop.permute.xlu0 %2547  ;;  %3142 = vmatpush.msrb.mxu2 %v3669_v2  ;;  %v3692_v17 = vld [vmem:[%s5508_s5 + $0x350] sm:$0xff] }
 0x7f5   : > { %2963 = vmatpush.msrb.mxu3 %v3623_v26  ;;  %3035 = vmatpush.msra.mxu0 %v3641_v52  ;;  %2553 = vst.msk [vmem:[#allocation5 + $0x8] sm:$0xff] %vm2551_vm9, %v2548_v36  ;;  %v3271_v26 = vld [vmem:[%s5510_s7 + $0x38] sm:$0xff]  ;;  %v3270_v52 = vld [vmem:[%s5510_s7 + $0x30] sm:$0xff]  ;;  %v3269_v36 = vld [vmem:[%s5510_s7 + $0x28] sm:$0xff] }
 0x7f6   : > { %3071 = vmatpush.msrb.mxu1 %v3650_v28  ;;  %2619 = vst.msk [vmem:[#allocation5 + $0x8] sm:$0xff] %vm2617_vm10, %v2614_v47  ;;  %3143 = vmatpush.msrb.mxu2 %v3668_v4 }
 0x7f7   : > { %2685 = vst.msk [vmem:[#allocation5 + $0x8] sm:$0xff] %vm2683_vm11, %v2680_v54  ;;  %2964 = vmatpush.msrb.mxu3 %v3622_v37  ;;  %3036 = vmatpush.msra.mxu0 %v3640_v8  ;;  %v3268_v8 = vld [vmem:[%s5510_s7 + $0x20] sm:$0xff] }
 0x7f8   : > { %3072 = vmatpush.msrb.mxu1 %v3649_v46  ;;  %3591 = vmatmul.msk.f32.vlgmr.msra.gmra.mxu3 %vm2703_vm14, %v2793_v27 }
 0x7f9   : > { %3609 = vmatmul.msk.f32.vlgmr.msrb.gmra.mxu0 %vm2703_vm14, %v2865_v49  ;;  %3618 = vmatmul.msk.f32.vlgmr.msra.gmra.mxu1 %vm2703_vm14, %v2901_v15  ;;  %v3266_v15 = vld [vmem:[%s5510_s7 + $0x10] sm:$0xff] }
 0x7fa   : > { %2965 = vmatpush.msrb.mxu3 %v3621_v25  ;;  %3037 = vmatpush.msra.mxu0 %v3639_v18  ;;  %v3267_v18 = vld [vmem:[%s5510_s7 + $0x18] sm:$0xff] }
 0x7fb   : > { %3073 = vmatpush.msrb.mxu1 %v3648_v34  ;;  %3144 = vmatpush.msrb.mxu2 %v3667_v48 }
 0x7fc   : > { %2966 = vmatpush.msrb.mxu3 %v3620_v24  ;;  %3038 = vmatpush.msra.mxu0 %v3638_v42  ;;  %v3265_v24 = vld [vmem:[%s5510_s7 + $0x8] sm:$0xff] }
 0x7fd   : > { %3074 = vmatpush.msrb.mxu1 %v3647_v50  ;;  %3145 = vmatpush.msrb.mxu2 %v3666_v14  ;;  %v3264_v50 = vld [vmem:[%s5510_s7] sm:$0xff] }
 0x7fe   : > { %2967 = vmatpush.msrb.mxu3 %v3619_v20  ;;  %3039 = vmatpush.msra.mxu0 %v3637_v12  ;;  %v2973_v10 = vld [vmem:[#allocation5 + $0x8] sm:$0x1]  ;;  %v3009_v30 = vld [vmem:[#allocation5 + $0x9] sm:$0x1]  ;;  %v3045_v11 = vld [vmem:[#allocation5 + $0xa] sm:$0x1] }
 0x7ff   : > { %3075 = vmatpush.msrb.mxu1 %v3646_v62  ;;  %3636 = vmatmul.msk.f32.vlgmr.msra.gmra.mxu2 %vm2703_vm14, %v2973_v10  ;;  %v3117_v13 = vld [vmem:[#allocation5 + $0xc] sm:$0x1]  ;;  %v3081_v9 = vld [vmem:[#allocation5 + $0xb] sm:$0x1]  ;;  %v3153_v21 = vld [vmem:[#allocation5 + $0xd] sm:$0x1] }
 0x800   : > { %3662 = vmatpush.msk.msra.mxu3 %vm2707_vm3, %v3661_v6  ;;  %3680 = vmatpush.msk.msrb.mxu0 %vm2707_vm3, %v3679_v53  ;;  %v3189_v32 = vld [vmem:[#allocation5 + $0xe] sm:$0x1]  ;;  %v3225_v58 = vld [vmem:[#allocation5 + $0xf] sm:$0x1]  ;;  %v3300_v12 = vld [vmem:[%s5512_s9 + $0x10] sm:$0xff] }
 0x801   : > { %3689 = vmatpush.msk.msra.mxu1 %vm2707_vm3, %v3688_v55  ;;  %3627 = vmatmul.msk.f32.vlgmr.msrb.gmra.mxu3 %vm2703_vm14, %v2937_v57  ;;  %v3301_v20 = vld [vmem:[%s5512_s9 + $0x18] sm:$0xff] }
 0x802   : > { %3106 = vmatpush.msra.mxu3 %v3660_v29  ;;  %3178 = vmatpush.msrb.mxu0 %v3678_v63 }
 0x803   : > { %3214 = vmatpush.msra.mxu1 %v3687_v38  ;;  %3645 = vmatmul.msk.f32.vlgmr.msra.gmra.mxu0 %vm2703_vm14, %v3009_v30 }
 0x804   : > { %3654 = vmatmul.msk.f32.vlgmr.msrb.gmra.mxu1 %vm2703_vm14, %v3045_v11  ;;  %3107 = vmatpush.msra.mxu3 %v3659_v33 }
 0x805   : > { %3179 = vmatpush.msrb.mxu0 %v3677_v56  ;;  %3215 = vmatpush.msra.mxu1 %v3686_v44 }
 0x806   : > { %3108 = vmatpush.msra.mxu3 %v3658_v59  ;;  %3146 = vmatpush.msrb.mxu2 %v3665_v22 }
 0x807   : > { %3180 = vmatpush.msrb.mxu0 %v3676_v31  ;;  %3216 = vmatpush.msra.mxu1 %v3685_v40  ;;  %v3261_v31 = vld [vmem:[%s5509_s6] sm:$0x1] }
 0x808   : > { %3109 = vmatpush.msra.mxu3 %v3657_v39  ;;  %3147 = vmatpush.msrb.mxu2 %v3664_v45 }
 0x809   : > { %3181 = vmatpush.msrb.mxu0 %v3675_v0  ;;  %3217 = vmatpush.msra.mxu1 %v3684_v43  ;;  %v3299_v0 = vld [vmem:[%s5512_s9 + $0x8] sm:$0xff]  ;;  %v3298_v43 = vld [vmem:[%s5512_s9] sm:$0xff] }
 0x80a   : > { %3110 = vmatpush.msra.mxu3 %v3656_v51  ;;  %3672 = vmatmul.msk.f32.vlgmr.msrb.gmra.mxu2 %vm2703_vm14, %v3117_v13  ;;  %v3272_v51 = vld [vmem:[%s5511_s8] sm:$0x1] }
 0x80b   : > { %3182 = vmatpush.msrb.mxu0 %v3674_v1  ;;  %3218 = vmatpush.msra.mxu1 %v3683_v61 }
 0x80c   : > { %3111 = vmatpush.msra.mxu3 %v3655_v60  ;;  %3285 = vmatpush.msra.mxu2 %v3271_v26  ;;  %v3302_v60 = vld [vmem:[%s5513_s10] sm:$0x1] }
 0x80d   : > { %3183 = vmatpush.msrb.mxu0 %v3673_v7  ;;  %3219 = vmatpush.msra.mxu1 %v3682_v5 }
 0x80e   : > { %3663 = vmatmul.msk.f32.vlgmr.msra.gmra.mxu3 %vm2703_vm14, %v3081_v9  ;;  %3681 = vmatmul.msk.f32.vlgmr.msrb.gmra.mxu0 %vm2703_vm14, %v3153_v21 }
 0x80f   : > { %3690 = vmatmul.msk.f32.vlgmr.msra.gmra.mxu1 %vm2703_vm14, %v3189_v32  ;;  %3698 = vmatpush.msk.msrb.mxu3 %vm2707_vm3, %v3697_v35 }
 0x810   : > { %3286 = vmatpush.msra.mxu2 %v3270_v52  ;;  %3319 = vmatpush.msra.mxu0 %v3301_v20 }
 0x811   : > { %3250 = vmatpush.msrb.mxu3 %v3696_v3 }
 0x812   : > { %3287 = vmatpush.msra.mxu2 %v3269_v36  ;;  %3320 = vmatpush.msra.mxu0 %v3300_v12 }
 0x813   : > { %3251 = vmatpush.msrb.mxu3 %v3695_v16 }
 0x814   : > { %3288 = vmatpush.msra.mxu2 %v3268_v8  ;;  %3321 = vmatpush.msra.mxu0 %v3299_v0 }
 0x815   : > { %3252 = vmatpush.msrb.mxu3 %v3694_v19 }
 0x816   : > { %3289 = vmatpush.msra.mxu2 %v3267_v18  ;;  %3322 = vmatpush.msra.mxu0 %v3298_v43 }
 0x817   : > { %3253 = vmatpush.msrb.mxu3 %v3693_v23 }
 0x818   : > { %3290 = vmatpush.msra.mxu2 %v3266_v15 }
 0x819   : > { %3254 = vmatpush.msrb.mxu3 %v3692_v17 }
 0x81a   : > { %3291 = vmatpush.msra.mxu2 %v3265_v24 }
 0x81b   : > { %3255 = vmatpush.msrb.mxu3 %v3691_v41 }
 0x81c   : > { %3699 = vmatmul.msk.f32.vlgmr.msrb.gmra.mxu3 %vm2703_vm14, %v3225_v58  ;;  %3292 = vmatpush.msra.mxu2 %v3264_v50 }
 0x86c   : > { %v2754_v28 = vpop.f32.mrf.mxu0 }
 0x86d   : > { %v2789_v37 = vpop.f32.mrf.mxu1 }
 0x872   : > { %v2728_v2 = vpop.f32.mrf.mxu3 }
 0x873   : > { %v2755_v4 = vadd.f32 %v2754_v28, %v2728_v2  ;;  %v2861_v25 = vpop.f32.mrf.mxu2 }
 0x875   : > { %v2792_v47 = vadd.f32 %v2789_v37, %v2755_v4 }
 0x876   : > { %v2897_v34 = vpop.f32.mrf.mxu0  ;;  %v2933_v48 = vpop.f32.mrf.mxu1 }
 0x87b   : > { %v2825_v46 = vpop.f32.mrf.mxu3 }
 0x87c   : > { %v2828_v54 = vadd.f32 %v2825_v46, %v2792_v47 }
 0x87e   : > { %v2864_v27 = vadd.f32 %v2861_v25, %v2828_v54 }
 0x880   : > { %v2900_v49 = vadd.f32 %v2897_v34, %v2864_v27  ;;  %v3041_v55 = vpop.f32.mrf.mxu0 }
 0x881   : > { %v3077_v10 = vpop.f32.mrf.mxu1 }
 0x882   : > { %v2936_v42 = vadd.f32 %v2933_v48, %v2900_v49  ;;  %v3005_v6 = vpop.f32.mrf.mxu2 }
 0x884   : > { %v2969_v14 = vpop.f32.mrf.mxu3 }
 0x885   : > { %v2972_v62 = vadd.f32 %v2969_v14, %v2936_v42 }
 0x887   : > { %v3008_v53 = vadd.f32 %v3005_v6, %v2972_v62 }
 0x889   : > { %v3044_v29 = vadd.f32 %v3041_v55, %v3008_v53 }
 0x88b   : > { %v3080_v63 = vadd.f32 %v3077_v10, %v3044_v29  ;;  %v3185_v57 = vpop.f32.mrf.mxu0 }
 0x88c   : > { %v3221_v44 = vpop.f32.mrf.mxu1 }
 0x88d   : > { %v3149_v11 = vpop.f32.mrf.mxu2 }
 0x891   : > { %v3113_v38 = vpop.f32.mrf.mxu3 }
 0x892   : > { %v3116_v30 = vadd.f32 %v3113_v38, %v3080_v63 }
 0x894   : > { %v3152_v33 = vadd.f32 %v3149_v11, %v3116_v30 }
 0x896   : > { %v3188_v56 = vadd.f32 %v3185_v57, %v3152_v33 }
 0x898   : > { %v3224_v59 = vadd.f32 %v3221_v44, %v3188_v56 }
 0x89f   : > { %v3257_v22 = vpop.f32.mrf.mxu3 }
 0x8a0   : > { %v3260_v40 = vadd.f32 %v3257_v22, %v3224_v59 }
 0x8a2   : > { %v3262_v39 = vadd.f32 %v3261_v31, %v3260_v40 }
 0x8a4   : > { %v3263_v45 = vmax.f32 %v3262_v39, 0.0 }
 0x8a6   : > { %3700 = vmatmul.msk.f32.vlgmr.msra.gmra.mxu2 %vm3273_vm15, %v3263_v45 }
 0x929   : > { %v3294_v1 = vpop.f32.mrf.mxu2 }
 0x92a   : > { %v3295_v61 = vadd.f32 %v3294_v1, %v3272_v51 }
 0x92c   : > { %v3297_v13 = vmax.f32 %v3295_v61, 0.0 }
 0x92e   : > { %3701 = vmatmul.msk.f32.vlgmr.msra.gmra.mxu0 %vm3303_vm2, %v3297_v13 }
 0x9ab   : > { %v3324_v7 = vpop.f32.mrf.mxu0 }
 0x9ac   : > { %v3325_v5 = vadd.f32 %v3324_v7, %v3302_v60 }
 0x9ae   : > { %3327 = vst [vmem:[%s376_s30] sm:$0x1] %v3325_v5 }
 0x9af   : > { %3855 = shalt.err (!%p3852_p3)
}
 0x9b0   : > { %3704 = dma.vmem_to_hbm [thread:$0]  (%p4032_p5), %s3340_s16, 16, %s3342_s15, %s3329_s13  }
 0x9b1 PF: > { %p3710_p4 = scmp.ge.s32.totalorder %s3890_s20, 2  ;;  %s3353_s12 = sand.u32 1, %s3878_s17  }
 0x9b2   : > { %s3354_s24 = scalar_lea.sflag [#allocation7], %s3353_s12 }
 0x9b3   : > { %p3707_p7 = pnand %p3710_p4, %p4036_p6 }
 0x9b5   : > { %p3708_p8 = pneg %p3707_p7 }
 0x9b7   : > { %3873 = dma.done.wait (%p3708_p8), %s3354_s24, 16  }
 0x9b8   : > { %3875 = vsyncadd (%p3708_p8), %s3354_s24, 4294967280  ;;  %p21_p9 = scmp.ge.s32.totalorder %s4019_s23, 4   ;;  %s5539_s17 = smov %s3882_s18 }
 0x9b9   : > { %s5540_s18 = smov %s3886_s19  ;;  %s5541_s19 = smov %s4030_s26 }
 0x9ba   : > { %s5542_s20 = smov %s4019_s23  ;;  %23 = sbr.rel (!%p21_p9) target bundleno = 6 (0x6), region = 130 }
 0x9bf   :  { %3359 = vsyncpa [#allocation7], 1 }
 0x9c0   :  { %3361 = vsyncpa [#allocation7 + $0x1], 1 }

</bundles_post_ra>
